<compile_context>
chip_gen: v7x
topology: tpu7x:2x2x1
jax: 0.10.0
libtpu: 0.0.40
codegen_flags: <defaults>
</compile_context>

<pallas_src>
import functools
import numpy as np
import jax
import jax.numpy as jnp
from jax.experimental import pallas as pl
from jax.experimental.pallas import tpu as pltpu

# ----------------------------- model dims (small) ---------------------------
T = 4            # sequence length
B = 2            # batch
FEAT = 16        # feat_dim
HID = 32         # hidden_dim
LAT = 16         # latent_dim
NCLS = 8         # num_classes
NGOAL = 2        # num_goal_cand
NACT = 3         # num_act_cand


def varant_kernel(feat_ref, epsz_ref, h0_ref, epsg_ref, epsa_ref,
                  w16_ref, w32_ref, b_ref, out_ref,
                  *, offs16, offs32, offsb):
    """Entire VarAnt forward, grid-free (single invocation), all data in VMEM."""
    H, Z, C = HID, LAT, NCLS
    NG, NA = NGOAL, NACT
    NC = NG * NA

    # ----- packed-parameter accessors (static offsets, sliced once) ----------
    def w16(name):
        o, n = offs16[name]
        return w16_ref[:, o:o + n]

    def w32(name):
        o, n = offs32[name]
        return w32_ref[:, o:o + n]

    def bias(name):
        o, n = offsb[name]
        return b_ref[:, o:o + n]

    # ----- small math helpers (VPU / MXU / EUP) -------------------------------
    def relu(x):
        return jnp.maximum(x, 0.0)

    def softplus(x):
        return jnp.maximum(x, 0.0) + jnp.log(1.0 + jnp.exp(-jnp.abs(x)))

    def sigmoid(x):
        return 1.0 / (1.0 + jnp.exp(-x))

    def dot(a, b):
        return jnp.dot(a, b, preferred_element_type=jnp.float32)

    def kld_el(m1, s1, m2, s2):
        return (2.0 * jnp.log(s2) - 2.0 * jnp.log(s1)
                + (s1 * s1 + (m1 - m2) ** 2) / (s2 * s2) - 1.0)

    def ksum(e):
        return 0.5 * jnp.sum(e, keepdims=True)          # (1, 1)

    # ----- hoisted weight slices (loop-invariant) -----------------------------
    W_phi_x = w16("phi_x")
    b_phi_x = bias("phi_x")
    W_phi_z = w16("phi_z")
    W_enc1_x = w32("enc1_x")
    b_enc1 = bias("enc1")
    hs = offs32["enc1_h"][0]
    he = offs32["whh"][0] + offs32["whh"][1]
    W_h_big = w32_ref[:, hs:he]                          # [enc1_h | prior1 | whh]  (H, 5H)
    W_ih_x = w32("wih_x")
    b_ih = bias("bih")
    W_ih_z = w32("wih_z")
    W_enc2 = w32("enc2")
    W_prior2 = w32("prior2")

    # biases used inside the unrolled time loop: pre-broadcast once (no re-emit)
    bh_big = jnp.broadcast_to(bias("h_big"), (B, 5 * H))  # [0 | prior_b1 | bhh]
    b_enc2 = jnp.broadcast_to(bias("enc2"), (B, Z))
    b_prior2 = jnp.broadcast_to(bias("prior2"), (B, Z))
    b_phi_z = jnp.broadcast_to(bias("phi_z"), (B, H))

    # ----- precompute everything independent of the recurrence ---------------
    feat = feat_ref[...]                                  # (T*B, F)
    phi_x_all = relu(dot(feat, W_phi_x) + b_phi_x)        # (T*B, H)
    enc1x_all = dot(phi_x_all, W_enc1_x) + b_enc1         # (T*B, H)  enc l1 x-part (+bias)
    gix_all = dot(phi_x_all, W_ih_x) + b_ih               # (T*B, 3H) GRU gi x-part (+bias)
    epsz_all = epsz_ref[...]                              # (T*B, Z)

    # ------------------------------ time loop --------------------------------
    h = h0_ref[...]                                       # (B, H)
    kld_lat = jnp.zeros((1, 1), jnp.float32)

    for t in range(T):                                    # static unroll (small T)
        r0 = t * B
        enc1x = enc1x_all[r0:r0 + B]
        gix = gix_all[r0:r0 + B]
        eps_t = epsz_all[r0:r0 + B]

        hh = dot(h, W_h_big) + bh_big                     # one fused h-matmul: (B, 5H)
        enc_hid = relu(hh[:, 0:H] + enc1x)
        prior_hid = relu(hh[:, H:2 * H])
        gh_r = hh[:, 2 * H:3 * H]
        gh_z = hh[:, 3 * H:4 * H]
        gh_n = hh[:, 4 * H:5 * H]

        enc_t = dot(enc_hid, W_enc2) + b_enc2             # (B, Z)
        prior_t = dot(prior_hid, W_prior2) + b_prior2     # (B, Z)
        enc_std = softplus(enc_t)
        prior_std = softplus(prior_t)
        kld_lat = kld_lat + ksum(kld_el(enc_t, enc_std, prior_t, prior_std))

        z_t = eps_t * enc_std + enc_t                     # reparameterized sample
        phi_z_t = relu(dot(z_t, W_phi_z) + b_phi_z)       # (B, H)

        gi = gix + dot(phi_z_t, W_ih_z)                   # (B, 3H), b_ih folded in
        r = sigmoid(gi[:, 0:H] + gh_r)                    # PyTorch gate order [r, z, n]
        zg = sigmoid(gi[:, H:2 * H] + gh_z)
        n = jnp.tanh(gi[:, 2 * H:3 * H] + r * gh_n)       # b_hn inside r*(.) as in torch
        h = (1.0 - zg) * n + zg * h

    # -------------- goal / action candidate search (batched rows) ------------
    W_prior1 = w32("prior1")
    b_prior1 = bias("prior1")
    W_pn1 = w32("pnew1")
    b_pn1 = bias("pnew1")
    W_pn2 = w32("pnew2")
    b_pn2 = bias("pnew2")
    W_znew = w16("phi_z_new")
    b_znew = bias("phi_z_new")
    W_ga_zn = w32("ga_zn")
    W_ga_p1 = w16("ga_prior1")
    W_ga_p2 = w16("ga_prior2")
    W_ga_oa = w32("ga_obsact")
    b_ga = bias("ga")
    W_oa1 = w32("oa1")
    b_oa1 = bias("oa1")
    W_oa2 = w32("oa2")
    b_oa2 = bias("oa2")
    W_na1 = w32("na1")
    b_na1 = bias("na1")
    W_na2 = w32("na2")
    b_na2 = bias("na2")
    W_en_pn = w16("encnext_pn")
    W_en_oa = w16("encnext_oa")
    b_en = bias("encnext")
    W_ncls = w32("next_cls")
    b_ncls = bias("next_cls")
    W_ccls = w32("cur_cls")
    b_ccls = bias("cur_cls")

    # distribution params & phi_prior_new(h): depend only on the final h
    obs_mean = dot(relu(dot(h, W_prior1) + b_prior1), W_prior2) + b_prior2     # (B, Z)
    obs_std = softplus(obs_mean)
    pnh = dot(relu(dot(h, W_pn1) + b_pn1), W_pn2) + b_pn2                      # (B, Z)

    # goal-level batch: rows (g, b), g-major  -> NG*B rows
    obs_mean_g = jnp.concatenate([obs_mean] * NG, axis=0)
    obs_std_g = jnp.concatenate([obs_std] * NG, axis=0)
    pnh_g = jnp.concatenate([pnh] * NG, axis=0)

    obs_lat_goal = epsg_ref[...] * obs_std_g + obs_mean_g                      # (NG*B, Z)
    zn = relu(dot(obs_lat_goal, W_znew) + b_znew)                              # (NG*B, H)
    obs_act = relu(dot(zn, W_ga_zn) + dot(pnh_g, W_ga_p1) + b_ga)              # (NG*B, H)
    next_mean = relu(dot(pnh_g, W_ga_p2) + dot(obs_act, W_ga_oa) + b_ga)       # (NG*B, H)
    next_std = softplus(next_mean)
    oa = dot(relu(dot(obs_act, W_oa1) + b_oa1), W_oa2) + b_oa2                 # (NG*B, Z)

    # candidate-level batch: rows (a, g, b), a-major  -> NG*NA*B rows
    next_mean_c = jnp.concatenate([next_mean] * NA, axis=0)
    next_std_c = jnp.concatenate([next_std] * NA, axis=0)
    oa_c = jnp.concatenate([oa] * NA, axis=0)

    next_act = epsa_ref[...] * next_std_c + next_mean_c                        # (NC*B, H)
    pn = dot(relu(dot(next_act, W_na1) + b_na1), W_na2) + b_na2                # (NC*B, Z)
    pn_std = softplus(pn)
    enc_next = relu(dot(pn, W_en_pn) + dot(oa_c, W_en_oa) + b_en)              # (NC*B, Z)
    enc_next_std = softplus(enc_next)

    obs_mean_c = jnp.concatenate([obs_mean] * NC, axis=0)                      # (NC*B, Z)
    obs_std_c = jnp.concatenate([obs_std] * NC, axis=0)

    sym_el = (kld_el(obs_mean_c, obs_std_c, enc_next, enc_next_std)
              + kld_el(enc_next, enc_next_std, obs_mean_c, obs_std_c))         # (NC*B, Z)
    nxt_el = kld_el(enc_next, enc_next_std, pn, pn_std)                        # (NC*B, Z)

    # exact sequential selection, same control flow as the reference:
    # unconditional reset at i == 0 of EVERY goal, strict-less update otherwise.
    best_dis = jnp.zeros((1, 1), jnp.float32)
    best_kld = jnp.zeros((1, 1), jnp.float32)
    best_next = jnp.zeros((B, H), jnp.float32)
    best_obs = jnp.zeros((B, H), jnp.float32)
    for g in range(NG):
        obs_act_g = obs_act[g * B:(g + 1) * B]
        for a in range(NA):
            r0 = a * NG * B + g * B
            d = ksum(sym_el[r0:r0 + B])
            kc = ksum(nxt_el[r0:r0 + B])
            na_blk = next_act[r0:r0 + B]
            if a == 0:
                best_dis, best_kld = d, kc
                best_next, best_obs = na_blk, obs_act_g
            else:
                upd = d < best_dis
                best_dis = jnp.where(upd, d, best_dis)
                best_kld = jnp.where(upd, kc, best_kld)
                best_next = jnp.where(upd, na_blk, best_next)
                best_obs = jnp.where(upd, obs_act_g, best_obs)

    out_next = dot(best_next, W_ncls) + b_ncls                                 # (B, C)
    out_cur = dot(best_obs, W_ccls) + b_ccls                                   # (B, C)

    # pack all outputs into one lane-dense (8, 128) slab -> single output DMA
    out_ref[...] = jnp.zeros(out_ref.shape, jnp.float32)
    out_ref[0:B, 0:C] = out_next
    out_ref[0:B, C:2 * C] = out_cur
    out_ref[0:1, 2 * C:2 * C + 3] = jnp.concatenate(
        [kld_lat, best_kld, best_dis], axis=1)


# ------------------------- host-side parameter packing ----------------------
def pack_params(weights):
    (phi_x_w, phi_x_b,
     phi_enc_w1, phi_enc_b1, phi_enc_w2, phi_enc_b2,
     phi_prior_w1, phi_prior_b1, phi_prior_w2, phi_prior_b2,
     phi_z_w, phi_z_b,
     gru_wih, gru_whh, gru_bih, gru_bhh,
     phi_z_new_w, phi_z_new_b,
     phi_prior_new_w1, phi_prior_new_b1, phi_prior_new_w2, phi_prior_new_b2,
     phi_get_act_w, phi_get_act_b,
     phi_obs_act_w1, phi_obs_act_b1, phi_obs_act_w2, phi_obs_act_b2,
     phi_next_act_w1, phi_next_act_b1, phi_next_act_w2, phi_next_act_b2,
     phi_enc_next_w, phi_enc_next_b,
     cur_cls_w, cur_cls_b,
     next_cls_w, next_cls_b) = weights

    H, Z = HID, LAT

    def pack(named_blocks):
        offs, arrs, off = {}, [], 0
        for name, a in named_blocks:
            offs[name] = (off, a.shape[1])
            arrs.append(a)
            off += a.shape[1]
        return jnp.concatenate(arrs, axis=1), offs

    w16, offs16 = pack([
        ("phi_x", phi_x_w),                      # (F=16, H)
        ("phi_z", phi_z_w),                      # (Z, H)
        ("phi_z_new", phi_z_new_w),              # (Z, H)
        ("ga_prior1", phi_get_act_w[H:H + Z]),   # rows mult. phi_prior_new (call 1)
        ("ga_prior2", phi_get_act_w[0:Z]),       # rows mult. phi_prior_new (call 2)
        ("encnext_pn", phi_enc_next_w[0:Z]),     # rows mult. phi_next_act output
        ("encnext_oa", phi_enc_next_w[Z:2 * Z]), # rows mult. phi_obs_act output
    ])
    w32, offs32 = pack([
        ("enc1_x", phi_enc_w1[H:2 * H]),
        ("enc1_h", phi_enc_w1[0:H]),             # W_h_big = [enc1_h|prior1|whh] contiguous
        ("prior1", phi_prior_w1),
        ("whh", gru_whh),
        ("wih_x", gru_wih[0:H]),
        ("wih_z", gru_wih[H:2 * H]),
        ("enc2", phi_enc_w2),
        ("prior2", phi_prior_w2),
        ("pnew1", phi_prior_new_w1),
        ("pnew2", phi_prior_new_w2),
        ("ga_zn", phi_get_act_w[0:H]),           # rows mult. phi_z_new output (call 1)
        ("ga_obsact", phi_get_act_w[Z:Z + H]),   # rows mult. obs_act (call 2)
        ("oa1", phi_obs_act_w1),
        ("oa2", phi_obs_act_w2),
        ("na1", phi_next_act_w1),
        ("na2", phi_next_act_w2),
        ("next_cls", next_cls_w),
        ("cur_cls", cur_cls_w),
    ])
    b_h_big = jnp.concatenate(
        [jnp.zeros((1, H), jnp.float32), phi_prior_b1, gru_bhh], axis=1)
    bias, offsb = pack([
        ("phi_x", phi_x_b),
        ("h_big", b_h_big),                      # fused bias of the per-step h-matmul
        ("bih", gru_bih),
        ("enc1", phi_enc_b1),
        ("enc2", phi_enc_b2),
        ("prior1", phi_prior_b1),
        ("prior2", phi_prior_b2),
        ("phi_z", phi_z_b),
        ("phi_z_new", phi_z_new_b),
        ("pnew1", phi_prior_new_b1),
        ("pnew2", phi_prior_new_b2),
        ("ga", phi_get_act_b),
        ("oa1", phi_obs_act_b1),
        ("oa2", phi_obs_act_b2),
        ("na1", phi_next_act_b1),
        ("na2", phi_next_act_b2),
        ("encnext", phi_enc_next_b),
        ("next_cls", next_cls_b),
        ("cur_cls", cur_cls_b),
    ])
    return (w16, offs16), (w32, offs32), (bias, offsb)


def varant_forward(feat_seq, eps_z, h0, eps_goal, eps_act, packed):
    (w16, offs16), (w32, offs32), (bias, offsb) = packed
    t, b, f = feat_seq.shape
    ng, na = eps_act.shape[0], eps_act.shape[1]

    # host-side layout plumbing (free): time-major rows, a-major candidate rows
    feat_flat = feat_seq.reshape(t * b, f)
    epsz_flat = eps_z.reshape(t * b, eps_z.shape[-1])
    epsg_flat = eps_goal.reshape(ng * b, eps_goal.shape[-1])
    epsa_rows = jnp.transpose(eps_act, (1, 0, 2, 3)).reshape(
        na * ng * b, eps_act.shape[-1])

    kernel = functools.partial(
        varant_kernel, offs16=offs16, offs32=offs32, offsb=offsb)
    vmem = pl.BlockSpec(memory_space=pltpu.MemorySpace.VMEM)
    slab = pl.pallas_call(
        kernel,
        out_shape=jax.ShapeDtypeStruct((8, 128), jnp.float32),
        in_specs=[vmem] * 8,
        out_specs=vmem,
    )(feat_flat, epsz_flat, h0, epsg_flat, epsa_rows, w16, w32, bias)

    out_next = slab[0:b, 0:NCLS]
    out_cur = slab[0:b, NCLS:2 * NCLS]
    kld_lat = slab[0, 2 * NCLS]
    kld_next = slab[0, 2 * NCLS + 1]
    lat_dis = slab[0, 2 * NCLS + 2]
    return out_next, out_cur, kld_lat, kld_next, lat_dis


def init_weights(key):
    """Deterministic synthetic parameter init (shapes from VarAnt.__init__)."""
    keys = iter(jax.random.split(key, 64))

    def linear(in_d, out_d):
        w = jax.random.normal(next(keys), (in_d, out_d), jnp.float32) / np.sqrt(in_d)
        b = jax.random.normal(next(keys), (1, out_d), jnp.float32) * 0.01
        return w, b

    phi_x_w, phi_x_b = linear(FEAT, HID)
    phi_enc_w1, phi_enc_b1 = linear(2 * HID, HID)
    phi_enc_w2, phi_enc_b2 = linear(HID, LAT)
    phi_prior_w1, phi_prior_b1 = linear(HID, HID)
    phi_prior_w2, phi_prior_b2 = linear(HID, LAT)
    phi_z_w, phi_z_b = linear(LAT, HID)
    gru_wih, gru_bih = linear(2 * HID, 3 * HID)
    gru_whh, gru_bhh = linear(HID, 3 * HID)
    phi_z_new_w, phi_z_new_b = linear(LAT, HID)
    phi_prior_new_w1, phi_prior_new_b1 = linear(HID, HID)
    phi_prior_new_w2, phi_prior_new_b2 = linear(HID, LAT)
    phi_get_act_w, phi_get_act_b = linear(LAT + HID, HID)
    phi_obs_act_w1, phi_obs_act_b1 = linear(HID, HID)
    phi_obs_act_w2, phi_obs_act_b2 = linear(HID, LAT)
    phi_next_act_w1, phi_next_act_b1 = linear(HID, HID)
    phi_next_act_w2, phi_next_act_b2 = linear(HID, LAT)
    phi_enc_next_w, phi_enc_next_b = linear(2 * LAT, LAT)
    cur_cls_w, cur_cls_b = linear(HID, NCLS)
    next_cls_w, next_cls_b = linear(HID, NCLS)

    return [
        phi_x_w, phi_x_b,
        phi_enc_w1, phi_enc_b1, phi_enc_w2, phi_enc_b2,
        phi_prior_w1, phi_prior_b1, phi_prior_w2, phi_prior_b2,
        phi_z_w, phi_z_b,
        gru_wih, gru_whh, gru_bih, gru_bhh,
        phi_z_new_w, phi_z_new_b,
        phi_prior_new_w1, phi_prior_new_b1, phi_prior_new_w2, phi_prior_new_b2,
        phi_get_act_w, phi_get_act_b,
        phi_obs_act_w1, phi_obs_act_b1, phi_obs_act_w2, phi_obs_act_b2,
        phi_next_act_w1, phi_next_act_b1, phi_next_act_w2, phi_next_act_b2,
        phi_enc_next_w, phi_enc_next_b,
        cur_cls_w, cur_cls_b,
        next_cls_w, next_cls_b,
    ]


if __name__ == "__main__":
    key = jax.random.PRNGKey(0)
    k_feat, k_h0, k_ez, k_eg, k_ea, k_w = jax.random.split(key, 6)

    feat_seq = jax.random.normal(k_feat, (T, B, FEAT), jnp.float32)
    h0 = jax.random.normal(k_h0, (B, HID), jnp.float32)           # init_hidden (n_layers=1)
    eps_z = jax.random.normal(k_ez, (T, B, LAT), jnp.float32)     # reparam noise per step
    eps_goal = jax.random.normal(k_eg, (NGOAL, B, LAT), jnp.float32)
    eps_act = jax.random.normal(k_ea, (NGOAL, NACT, B, HID), jnp.float32)

    weights = init_weights(k_w)
    packed = pack_params(weights)

    out = varant_forward(feat_seq, eps_z, h0, eps_goal, eps_act, packed)
    out = jax.block_until_ready(out)

    out_next, out_cur, kld_lat, kld_next, dis = out
    assert out_next.shape == (B, NCLS) and out_cur.shape == (B, NCLS)
    assert all(bool(jnp.isfinite(jnp.asarray(o)).all()) for o in out)
    print("KERNEL_OK")
</pallas_src>

<mosaic_0001>
module attributes {stable_mosaic.version = 11 : i64} {
  func.func @varant_kernel(%arg0: memref<8x16xf32, #tpu.memory_space<vmem>>, %arg1: memref<8x16xf32, #tpu.memory_space<vmem>>, %arg2: memref<2x32xf32, #tpu.memory_space<vmem>>, %arg3: memref<4x16xf32, #tpu.memory_space<vmem>>, %arg4: memref<12x32xf32, #tpu.memory_space<vmem>>, %arg5: memref<16x192xf32, #tpu.memory_space<vmem>>, %arg6: memref<32x640xf32, #tpu.memory_space<vmem>>, %arg7: memref<1x656xf32, #tpu.memory_space<vmem>>, %arg8: memref<8x128xf32, #tpu.memory_space<vmem>>) attributes {dimension_semantics = [], scalar_prefetch = 0 : i64, scratch_operands = 0 : i64, tpu.core_type = #tpu.core_type<tc>} {
    %c0 = arith.constant 0 : index
    %c0_0 = arith.constant 0 : index
    %0 = vector.load %arg5[%c0, %c0_0] : memref<16x192xf32, #tpu.memory_space<vmem>>, vector<16x32xf32>
    %c0_1 = arith.constant 0 : index
    %c0_2 = arith.constant 0 : index
    %1 = vector.load %arg7[%c0_1, %c0_2] : memref<1x656xf32, #tpu.memory_space<vmem>>, vector<1x32xf32>
    %c0_3 = arith.constant 0 : index
    %c32 = arith.constant 32 : index
    %2 = vector.load %arg5[%c0_3, %c32] : memref<16x192xf32, #tpu.memory_space<vmem>>, vector<16x32xf32>
    %c0_4 = arith.constant 0 : index
    %c0_5 = arith.constant 0 : index
    %3 = vector.load %arg6[%c0_4, %c0_5] : memref<32x640xf32, #tpu.memory_space<vmem>>, vector<32x32xf32>
    %c0_6 = arith.constant 0 : index
    %c288 = arith.constant 288 : index
    %4 = vector.load %arg7[%c0_6, %c288] : memref<1x656xf32, #tpu.memory_space<vmem>>, vector<1x32xf32>
    %c0_7 = arith.constant 0 : index
    %c32_8 = arith.constant 32 : index
    %5 = vector.load %arg6[%c0_7, %c32_8] : memref<32x640xf32, #tpu.memory_space<vmem>>, vector<32x160xf32>
    %c0_9 = arith.constant 0 : index
    %c192 = arith.constant 192 : index
    %6 = vector.load %arg6[%c0_9, %c192] : memref<32x640xf32, #tpu.memory_space<vmem>>, vector<32x96xf32>
    %c0_10 = arith.constant 0 : index
    %c192_11 = arith.constant 192 : index
    %7 = vector.load %arg7[%c0_10, %c192_11] : memref<1x656xf32, #tpu.memory_space<vmem>>, vector<1x96xf32>
    %c0_12 = arith.constant 0 : index
    %c288_13 = arith.constant 288 : index
    %8 = vector.load %arg6[%c0_12, %c288_13] : memref<32x640xf32, #tpu.memory_space<vmem>>, vector<32x96xf32>
    %c0_14 = arith.constant 0 : index
    %c384 = arith.constant 384 : index
    %9 = vector.load %arg6[%c0_14, %c384] : memref<32x640xf32, #tpu.memory_space<vmem>>, vector<32x16xf32>
    %c0_15 = arith.constant 0 : index
    %c400 = arith.constant 400 : index
    %10 = vector.load %arg6[%c0_15, %c400] : memref<32x640xf32, #tpu.memory_space<vmem>>, vector<32x16xf32>
    %c0_16 = arith.constant 0 : index
    %c32_17 = arith.constant 32 : index
    %11 = vector.load %arg7[%c0_16, %c32_17] : memref<1x656xf32, #tpu.memory_space<vmem>>, vector<1x160xf32>
    %12 = vector.shape_cast %11 : vector<1x160xf32> to vector<1x160xf32>
    %13 = vector.broadcast %12 : vector<1x160xf32> to vector<2x160xf32>
    %c0_18 = arith.constant 0 : index
    %c320 = arith.constant 320 : index
    %14 = vector.load %arg7[%c0_18, %c320] : memref<1x656xf32, #tpu.memory_space<vmem>>, vector<1x16xf32>
    %15 = vector.shape_cast %14 : vector<1x16xf32> to vector<1x16xf32>
    %16 = vector.broadcast %15 : vector<1x16xf32> to vector<2x16xf32>
    %c0_19 = arith.constant 0 : index
    %c368 = arith.constant 368 : index
    %17 = vector.load %arg7[%c0_19, %c368] : memref<1x656xf32, #tpu.memory_space<vmem>>, vector<1x16xf32>
    %18 = vector.shape_cast %17 : vector<1x16xf32> to vector<1x16xf32>
    %19 = vector.broadcast %18 : vector<1x16xf32> to vector<2x16xf32>
    %c0_20 = arith.constant 0 : index
    %c384_21 = arith.constant 384 : index
    %20 = vector.load %arg7[%c0_20, %c384_21] : memref<1x656xf32, #tpu.memory_space<vmem>>, vector<1x32xf32>
    %21 = vector.shape_cast %20 : vector<1x32xf32> to vector<1x32xf32>
    %22 = vector.broadcast %21 : vector<1x32xf32> to vector<2x32xf32>
    %c0_22 = arith.constant 0 : index
    %c0_23 = arith.constant 0 : index
    %23 = vector.load %arg0[%c0_22, %c0_23] : memref<8x16xf32, #tpu.memory_space<vmem>>, vector<8x16xf32>
    %cst = arith.constant dense<0.000000e+00> : vector<8x32xf32>
    %24 = tpu.matmul %23, %0, %cst {dimension_numbers = #tpu.dot_dimension_numbers<[1], [0], [0], [1], [0, 0, 1, 1], [], []>} : vector<8x16xf32>, vector<16x32xf32>, vector<8x32xf32> -> vector<8x32xf32>
    %25 = vector.broadcast %1 : vector<1x32xf32> to vector<8x32xf32>
    %26 = arith.addf %24, %25 : vector<8x32xf32>
    %cst_24 = arith.constant 0.000000e+00 : f32
    %27 = vector.broadcast %cst_24 : f32 to vector<8x32xf32>
    %28 = arith.maximumf %26, %27 : vector<8x32xf32>
    %cst_25 = arith.constant dense<0.000000e+00> : vector<8x32xf32>
    %29 = tpu.matmul %28, %3, %cst_25 {dimension_numbers = #tpu.dot_dimension_numbers<[1], [0], [0], [1], [0, 0, 1, 1], [], []>} : vector<8x32xf32>, vector<32x32xf32>, vector<8x32xf32> -> vector<8x32xf32>
    %30 = vector.broadcast %4 : vector<1x32xf32> to vector<8x32xf32>
    %31 = arith.addf %29, %30 : vector<8x32xf32>
    %cst_26 = arith.constant dense<0.000000e+00> : vector<8x96xf32>
    %32 = tpu.matmul %28, %6, %cst_26 {dimension_numbers = #tpu.dot_dimension_numbers<[1], [0], [0], [1], [0, 0, 1, 1], [], []>} : vector<8x32xf32>, vector<32x96xf32>, vector<8x96xf32> -> vector<8x96xf32>
    %33 = vector.broadcast %7 : vector<1x96xf32> to vector<8x96xf32>
    %34 = arith.addf %32, %33 : vector<8x96xf32>
    %c0_27 = arith.constant 0 : index
    %c0_28 = arith.constant 0 : index
    %35 = vector.load %arg1[%c0_27, %c0_28] : memref<8x16xf32, #tpu.memory_space<vmem>>, vector<8x16xf32>
    %c0_29 = arith.constant 0 : index
    %c0_30 = arith.constant 0 : index
    %36 = vector.load %arg2[%c0_29, %c0_30] : memref<2x32xf32, #tpu.memory_space<vmem>>, vector<2x32xf32>
    %cst_31 = arith.constant 0.000000e+00 : f32
    %37 = vector.broadcast %cst_31 : f32 to vector<1x1xf32>
    %38 = vector.extract_strided_slice %31 {offsets = [0, 0], sizes = [2, 32], strides = [1, 1]} : vector<8x32xf32> to vector<2x32xf32>
    %39 = vector.extract_strided_slice %34 {offsets = [0, 0], sizes = [2, 96], strides = [1, 1]} : vector<8x96xf32> to vector<2x96xf32>
    %40 = vector.extract_strided_slice %35 {offsets = [0, 0], sizes = [2, 16], strides = [1, 1]} : vector<8x16xf32> to vector<2x16xf32>
    %cst_32 = arith.constant dense<0.000000e+00> : vector<2x160xf32>
    %41 = tpu.matmul %36, %5, %cst_32 {dimension_numbers = #tpu.dot_dimension_numbers<[1], [0], [0], [1], [0, 0, 1, 1], [], []>} : vector<2x32xf32>, vector<32x160xf32>, vector<2x160xf32> -> vector<2x160xf32>
    %42 = arith.addf %41, %13 : vector<2x160xf32>
    %43 = vector.extract_strided_slice %42 {offsets = [0, 0], sizes = [2, 32], strides = [1, 1]} : vector<2x160xf32> to vector<2x32xf32>
    %44 = arith.addf %43, %38 : vector<2x32xf32>
    %cst_33 = arith.constant 0.000000e+00 : f32
    %45 = vector.broadcast %cst_33 : f32 to vector<2x32xf32>
    %46 = arith.maximumf %44, %45 : vector<2x32xf32>
    %47 = vector.extract_strided_slice %42 {offsets = [0, 32], sizes = [2, 32], strides = [1, 1]} : vector<2x160xf32> to vector<2x32xf32>
    %cst_34 = arith.constant 0.000000e+00 : f32
    %48 = vector.broadcast %cst_34 : f32 to vector<2x32xf32>
    %49 = arith.maximumf %47, %48 : vector<2x32xf32>
    %50 = vector.extract_strided_slice %42 {offsets = [0, 64], sizes = [2, 32], strides = [1, 1]} : vector<2x160xf32> to vector<2x32xf32>
    %51 = vector.extract_strided_slice %42 {offsets = [0, 96], sizes = [2, 32], strides = [1, 1]} : vector<2x160xf32> to vector<2x32xf32>
    %52 = vector.extract_strided_slice %42 {offsets = [0, 128], sizes = [2, 32], strides = [1, 1]} : vector<2x160xf32> to vector<2x32xf32>
    %cst_35 = arith.constant dense<0.000000e+00> : vector<2x16xf32>
    %53 = tpu.matmul %46, %9, %cst_35 {dimension_numbers = #tpu.dot_dimension_numbers<[1], [0], [0], [1], [0, 0, 1, 1], [], []>} : vector<2x32xf32>, vector<32x16xf32>, vector<2x16xf32> -> vector<2x16xf32>
    %54 = arith.addf %53, %16 : vector<2x16xf32>
    %cst_36 = arith.constant dense<0.000000e+00> : vector<2x16xf32>
    %55 = tpu.matmul %49, %10, %cst_36 {dimension_numbers = #tpu.dot_dimension_numbers<[1], [0], [0], [1], [0, 0, 1, 1], [], []>} : vector<2x32xf32>, vector<32x16xf32>, vector<2x16xf32> -> vector<2x16xf32>
    %56 = arith.addf %55, %19 : vector<2x16xf32>
    %cst_37 = arith.constant 0.000000e+00 : f32
    %57 = vector.broadcast %cst_37 : f32 to vector<2x16xf32>
    %58 = arith.maximumf %54, %57 : vector<2x16xf32>
    %59 = math.absf %54 : vector<2x16xf32>
    %cst_38 = arith.constant 0.000000e+00 : f32
    %60 = vector.broadcast %cst_38 : f32 to vector<2x16xf32>
    %61 = arith.subf %60, %59 : vector<2x16xf32>
    %62 = math.exp %61 : vector<2x16xf32>
    %cst_39 = arith.constant 1.000000e+00 : f32
    %63 = vector.broadcast %cst_39 : f32 to vector<2x16xf32>
    %64 = arith.addf %63, %62 : vector<2x16xf32>
    %65 = math.log %64 : vector<2x16xf32>
    %66 = arith.addf %58, %65 : vector<2x16xf32>
    %cst_40 = arith.constant 0.000000e+00 : f32
    %67 = vector.broadcast %cst_40 : f32 to vector<2x16xf32>
    %68 = arith.maximumf %56, %67 : vector<2x16xf32>
    %69 = math.absf %56 : vector<2x16xf32>
    %cst_41 = arith.constant 0.000000e+00 : f32
    %70 = vector.broadcast %cst_41 : f32 to vector<2x16xf32>
    %71 = arith.subf %70, %69 : vector<2x16xf32>
    %72 = math.exp %71 : vector<2x16xf32>
    %cst_42 = arith.constant 1.000000e+00 : f32
    %73 = vector.broadcast %cst_42 : f32 to vector<2x16xf32>
    %74 = arith.addf %73, %72 : vector<2x16xf32>
    %75 = math.log %74 : vector<2x16xf32>
    %76 = arith.addf %68, %75 : vector<2x16xf32>
    %77 = math.log %76 : vector<2x16xf32>
    %cst_43 = arith.constant 2.000000e+00 : f32
    %78 = vector.broadcast %cst_43 : f32 to vector<2x16xf32>
    %79 = arith.mulf %78, %77 : vector<2x16xf32>
    %80 = math.log %66 : vector<2x16xf32>
    %cst_44 = arith.constant 2.000000e+00 : f32
    %81 = vector.broadcast %cst_44 : f32 to vector<2x16xf32>
    %82 = arith.mulf %81, %80 : vector<2x16xf32>
    %83 = arith.subf %79, %82 : vector<2x16xf32>
    %84 = arith.mulf %66, %66 : vector<2x16xf32>
    %85 = arith.subf %54, %56 : vector<2x16xf32>
    %86 = arith.mulf %85, %85 : vector<2x16xf32>
    %87 = arith.addf %84, %86 : vector<2x16xf32>
    %88 = arith.mulf %76, %76 : vector<2x16xf32>
    %89 = arith.divf %87, %88 : vector<2x16xf32>
    %90 = arith.addf %83, %89 : vector<2x16xf32>
    %cst_45 = arith.constant 1.000000e+00 : f32
    %91 = vector.broadcast %cst_45 : f32 to vector<2x16xf32>
    %92 = arith.subf %90, %91 : vector<2x16xf32>
    %93 = vector.shape_cast %92 : vector<2x16xf32> to vector<1x2x16xf32>
    %cst_46 = arith.constant dense<0.000000e+00> : vector<1xf32>
    %94 = vector.multi_reduction <add>, %93, %cst_46 [1, 2] : vector<1x2x16xf32> to vector<1xf32>
    %95 = vector.shape_cast %94 : vector<1xf32> to vector<1x1x1xf32>
    %96 = vector.extract %95[0, 0, 0] : f32 from vector<1x1x1xf32>
    %97 = vector.broadcast %96 : f32 to vector<1x1xf32>
    %cst_47 = arith.constant 5.000000e-01 : f32
    %98 = vector.broadcast %cst_47 : f32 to vector<1x1xf32>
    %99 = arith.mulf %98, %97 : vector<1x1xf32>
    %100 = arith.addf %37, %99 : vector<1x1xf32>
    %101 = arith.mulf %40, %66 : vector<2x16xf32>
    %102 = arith.addf %101, %54 : vector<2x16xf32>
    %cst_48 = arith.constant dense<0.000000e+00> : vector<2x32xf32>
    %103 = tpu.matmul %102, %2, %cst_48 {dimension_numbers = #tpu.dot_dimension_numbers<[1], [0], [0], [1], [0, 0, 1, 1], [], []>} : vector<2x16xf32>, vector<16x32xf32>, vector<2x32xf32> -> vector<2x32xf32>
    %104 = arith.addf %103, %22 : vector<2x32xf32>
    %cst_49 = arith.constant 0.000000e+00 : f32
    %105 = vector.broadcast %cst_49 : f32 to vector<2x32xf32>
    %106 = arith.maximumf %104, %105 : vector<2x32xf32>
    %cst_50 = arith.constant dense<0.000000e+00> : vector<2x96xf32>
    %107 = tpu.matmul %106, %8, %cst_50 {dimension_numbers = #tpu.dot_dimension_numbers<[1], [0], [0], [1], [0, 0, 1, 1], [], []>} : vector<2x32xf32>, vector<32x96xf32>, vector<2x96xf32> -> vector<2x96xf32>
    %108 = arith.addf %39, %107 : vector<2x96xf32>
    %109 = vector.extract_strided_slice %108 {offsets = [0, 0], sizes = [2, 32], strides = [1, 1]} : vector<2x96xf32> to vector<2x32xf32>
    %110 = arith.addf %109, %50 : vector<2x32xf32>
    %cst_51 = arith.constant 0.000000e+00 : f32
    %111 = vector.broadcast %cst_51 : f32 to vector<2x32xf32>
    %112 = arith.subf %111, %110 : vector<2x32xf32>
    %113 = math.exp %112 : vector<2x32xf32>
    %cst_52 = arith.constant 1.000000e+00 : f32
    %114 = vector.broadcast %cst_52 : f32 to vector<2x32xf32>
    %115 = arith.addf %114, %113 : vector<2x32xf32>
    %cst_53 = arith.constant 1.000000e+00 : f32
    %116 = vector.broadcast %cst_53 : f32 to vector<2x32xf32>
    %117 = arith.divf %116, %115 : vector<2x32xf32>
    %118 = vector.extract_strided_slice %108 {offsets = [0, 32], sizes = [2, 32], strides = [1, 1]} : vector<2x96xf32> to vector<2x32xf32>
    %119 = arith.addf %118, %51 : vector<2x32xf32>
    %cst_54 = arith.constant 0.000000e+00 : f32
    %120 = vector.broadcast %cst_54 : f32 to vector<2x32xf32>
    %121 = arith.subf %120, %119 : vector<2x32xf32>
    %122 = math.exp %121 : vector<2x32xf32>
    %cst_55 = arith.constant 1.000000e+00 : f32
    %123 = vector.broadcast %cst_55 : f32 to vector<2x32xf32>
    %124 = arith.addf %123, %122 : vector<2x32xf32>
    %cst_56 = arith.constant 1.000000e+00 : f32
    %125 = vector.broadcast %cst_56 : f32 to vector<2x32xf32>
    %126 = arith.divf %125, %124 : vector<2x32xf32>
    %127 = vector.extract_strided_slice %108 {offsets = [0, 64], sizes = [2, 32], strides = [1, 1]} : vector<2x96xf32> to vector<2x32xf32>
    %128 = arith.mulf %117, %52 : vector<2x32xf32>
    %129 = arith.addf %127, %128 : vector<2x32xf32>
    %130 = math.tanh %129 : vector<2x32xf32>
    %cst_57 = arith.constant 1.000000e+00 : f32
    %131 = vector.broadcast %cst_57 : f32 to vector<2x32xf32>
    %132 = arith.subf %131, %126 : vector<2x32xf32>
    %133 = arith.mulf %132, %130 : vector<2x32xf32>
    %134 = arith.mulf %126, %36 : vector<2x32xf32>
    %135 = arith.addf %133, %134 : vector<2x32xf32>
    %136 = vector.extract_strided_slice %31 {offsets = [2, 0], sizes = [2, 32], strides = [1, 1]} : vector<8x32xf32> to vector<2x32xf32>
    %137 = vector.extract_strided_slice %34 {offsets = [2, 0], sizes = [2, 96], strides = [1, 1]} : vector<8x96xf32> to vector<2x96xf32>
    %138 = vector.extract_strided_slice %35 {offsets = [2, 0], sizes = [2, 16], strides = [1, 1]} : vector<8x16xf32> to vector<2x16xf32>
    %cst_58 = arith.constant dense<0.000000e+00> : vector<2x160xf32>
    %139 = tpu.matmul %135, %5, %cst_58 {dimension_numbers = #tpu.dot_dimension_numbers<[1], [0], [0], [1], [0, 0, 1, 1], [], []>} : vector<2x32xf32>, vector<32x160xf32>, vector<2x160xf32> -> vector<2x160xf32>
    %140 = arith.addf %139, %13 : vector<2x160xf32>
    %141 = vector.extract_strided_slice %140 {offsets = [0, 0], sizes = [2, 32], strides = [1, 1]} : vector<2x160xf32> to vector<2x32xf32>
    %142 = arith.addf %141, %136 : vector<2x32xf32>
    %cst_59 = arith.constant 0.000000e+00 : f32
    %143 = vector.broadcast %cst_59 : f32 to vector<2x32xf32>
    %144 = arith.maximumf %142, %143 : vector<2x32xf32>
    %145 = vector.extract_strided_slice %140 {offsets = [0, 32], sizes = [2, 32], strides = [1, 1]} : vector<2x160xf32> to vector<2x32xf32>
    %cst_60 = arith.constant 0.000000e+00 : f32
    %146 = vector.broadcast %cst_60 : f32 to vector<2x32xf32>
    %147 = arith.maximumf %145, %146 : vector<2x32xf32>
    %148 = vector.extract_strided_slice %140 {offsets = [0, 64], sizes = [2, 32], strides = [1, 1]} : vector<2x160xf32> to vector<2x32xf32>
    %149 = vector.extract_strided_slice %140 {offsets = [0, 96], sizes = [2, 32], strides = [1, 1]} : vector<2x160xf32> to vector<2x32xf32>
    %150 = vector.extract_strided_slice %140 {offsets = [0, 128], sizes = [2, 32], strides = [1, 1]} : vector<2x160xf32> to vector<2x32xf32>
    %cst_61 = arith.constant dense<0.000000e+00> : vector<2x16xf32>
    %151 = tpu.matmul %144, %9, %cst_61 {dimension_numbers = #tpu.dot_dimension_numbers<[1], [0], [0], [1], [0, 0, 1, 1], [], []>} : vector<2x32xf32>, vector<32x16xf32>, vector<2x16xf32> -> vector<2x16xf32>
    %152 = arith.addf %151, %16 : vector<2x16xf32>
    %cst_62 = arith.constant dense<0.000000e+00> : vector<2x16xf32>
    %153 = tpu.matmul %147, %10, %cst_62 {dimension_numbers = #tpu.dot_dimension_numbers<[1], [0], [0], [1], [0, 0, 1, 1], [], []>} : vector<2x32xf32>, vector<32x16xf32>, vector<2x16xf32> -> vector<2x16xf32>
    %154 = arith.addf %153, %19 : vector<2x16xf32>
    %cst_63 = arith.constant 0.000000e+00 : f32
    %155 = vector.broadcast %cst_63 : f32 to vector<2x16xf32>
    %156 = arith.maximumf %152, %155 : vector<2x16xf32>
    %157 = math.absf %152 : vector<2x16xf32>
    %cst_64 = arith.constant 0.000000e+00 : f32
    %158 = vector.broadcast %cst_64 : f32 to vector<2x16xf32>
    %159 = arith.subf %158, %157 : vector<2x16xf32>
    %160 = math.exp %159 : vector<2x16xf32>
    %cst_65 = arith.constant 1.000000e+00 : f32
    %161 = vector.broadcast %cst_65 : f32 to vector<2x16xf32>
    %162 = arith.addf %161, %160 : vector<2x16xf32>
    %163 = math.log %162 : vector<2x16xf32>
    %164 = arith.addf %156, %163 : vector<2x16xf32>
    %cst_66 = arith.constant 0.000000e+00 : f32
    %165 = vector.broadcast %cst_66 : f32 to vector<2x16xf32>
    %166 = arith.maximumf %154, %165 : vector<2x16xf32>
    %167 = math.absf %154 : vector<2x16xf32>
    %cst_67 = arith.constant 0.000000e+00 : f32
    %168 = vector.broadcast %cst_67 : f32 to vector<2x16xf32>
    %169 = arith.subf %168, %167 : vector<2x16xf32>
    %170 = math.exp %169 : vector<2x16xf32>
    %cst_68 = arith.constant 1.000000e+00 : f32
    %171 = vector.broadcast %cst_68 : f32 to vector<2x16xf32>
    %172 = arith.addf %171, %170 : vector<2x16xf32>
    %173 = math.log %172 : vector<2x16xf32>
    %174 = arith.addf %166, %173 : vector<2x16xf32>
    %175 = math.log %174 : vector<2x16xf32>
    %cst_69 = arith.constant 2.000000e+00 : f32
    %176 = vector.broadcast %cst_69 : f32 to vector<2x16xf32>
    %177 = arith.mulf %176, %175 : vector<2x16xf32>
    %178 = math.log %164 : vector<2x16xf32>
    %cst_70 = arith.constant 2.000000e+00 : f32
    %179 = vector.broadcast %cst_70 : f32 to vector<2x16xf32>
    %180 = arith.mulf %179, %178 : vector<2x16xf32>
    %181 = arith.subf %177, %180 : vector<2x16xf32>
    %182 = arith.mulf %164, %164 : vector<2x16xf32>
    %183 = arith.subf %152, %154 : vector<2x16xf32>
    %184 = arith.mulf %183, %183 : vector<2x16xf32>
    %185 = arith.addf %182, %184 : vector<2x16xf32>
    %186 = arith.mulf %174, %174 : vector<2x16xf32>
    %187 = arith.divf %185, %186 : vector<2x16xf32>
    %188 = arith.addf %181, %187 : vector<2x16xf32>
    %cst_71 = arith.constant 1.000000e+00 : f32
    %189 = vector.broadcast %cst_71 : f32 to vector<2x16xf32>
    %190 = arith.subf %188, %189 : vector<2x16xf32>
    %191 = vector.shape_cast %190 : vector<2x16xf32> to vector<1x2x16xf32>
    %cst_72 = arith.constant dense<0.000000e+00> : vector<1xf32>
    %192 = vector.multi_reduction <add>, %191, %cst_72 [1, 2] : vector<1x2x16xf32> to vector<1xf32>
    %193 = vector.shape_cast %192 : vector<1xf32> to vector<1x1x1xf32>
    %194 = vector.extract %193[0, 0, 0] : f32 from vector<1x1x1xf32>
    %195 = vector.broadcast %194 : f32 to vector<1x1xf32>
    %cst_73 = arith.constant 5.000000e-01 : f32
    %196 = vector.broadcast %cst_73 : f32 to vector<1x1xf32>
    %197 = arith.mulf %196, %195 : vector<1x1xf32>
    %198 = arith.addf %100, %197 : vector<1x1xf32>
    %199 = arith.mulf %138, %164 : vector<2x16xf32>
    %200 = arith.addf %199, %152 : vector<2x16xf32>
    %cst_74 = arith.constant dense<0.000000e+00> : vector<2x32xf32>
    %201 = tpu.matmul %200, %2, %cst_74 {dimension_numbers = #tpu.dot_dimension_numbers<[1], [0], [0], [1], [0, 0, 1, 1], [], []>} : vector<2x16xf32>, vector<16x32xf32>, vector<2x32xf32> -> vector<2x32xf32>
    %202 = arith.addf %201, %22 : vector<2x32xf32>
    %cst_75 = arith.constant 0.000000e+00 : f32
    %203 = vector.broadcast %cst_75 : f32 to vector<2x32xf32>
    %204 = arith.maximumf %202, %203 : vector<2x32xf32>
    %cst_76 = arith.constant dense<0.000000e+00> : vector<2x96xf32>
    %205 = tpu.matmul %204, %8, %cst_76 {dimension_numbers = #tpu.dot_dimension_numbers<[1], [0], [0], [1], [0, 0, 1, 1], [], []>} : vector<2x32xf32>, vector<32x96xf32>, vector<2x96xf32> -> vector<2x96xf32>
    %206 = arith.addf %137, %205 : vector<2x96xf32>
    %207 = vector.extract_strided_slice %206 {offsets = [0, 0], sizes = [2, 32], strides = [1, 1]} : vector<2x96xf32> to vector<2x32xf32>
    %208 = arith.addf %207, %148 : vector<2x32xf32>
    %cst_77 = arith.constant 0.000000e+00 : f32
    %209 = vector.broadcast %cst_77 : f32 to vector<2x32xf32>
    %210 = arith.subf %209, %208 : vector<2x32xf32>
    %211 = math.exp %210 : vector<2x32xf32>
    %cst_78 = arith.constant 1.000000e+00 : f32
    %212 = vector.broadcast %cst_78 : f32 to vector<2x32xf32>
    %213 = arith.addf %212, %211 : vector<2x32xf32>
    %cst_79 = arith.constant 1.000000e+00 : f32
    %214 = vector.broadcast %cst_79 : f32 to vector<2x32xf32>
    %215 = arith.divf %214, %213 : vector<2x32xf32>
    %216 = vector.extract_strided_slice %206 {offsets = [0, 32], sizes = [2, 32], strides = [1, 1]} : vector<2x96xf32> to vector<2x32xf32>
    %217 = arith.addf %216, %149 : vector<2x32xf32>
    %cst_80 = arith.constant 0.000000e+00 : f32
    %218 = vector.broadcast %cst_80 : f32 to vector<2x32xf32>
    %219 = arith.subf %218, %217 : vector<2x32xf32>
    %220 = math.exp %219 : vector<2x32xf32>
    %cst_81 = arith.constant 1.000000e+00 : f32
    %221 = vector.broadcast %cst_81 : f32 to vector<2x32xf32>
    %222 = arith.addf %221, %220 : vector<2x32xf32>
    %cst_82 = arith.constant 1.000000e+00 : f32
    %223 = vector.broadcast %cst_82 : f32 to vector<2x32xf32>
    %224 = arith.divf %223, %222 : vector<2x32xf32>
    %225 = vector.extract_strided_slice %206 {offsets = [0, 64], sizes = [2, 32], strides = [1, 1]} : vector<2x96xf32> to vector<2x32xf32>
    %226 = arith.mulf %215, %150 : vector<2x32xf32>
    %227 = arith.addf %225, %226 : vector<2x32xf32>
    %228 = math.tanh %227 : vector<2x32xf32>
    %cst_83 = arith.constant 1.000000e+00 : f32
    %229 = vector.broadcast %cst_83 : f32 to vector<2x32xf32>
    %230 = arith.subf %229, %224 : vector<2x32xf32>
    %231 = arith.mulf %230, %228 : vector<2x32xf32>
    %232 = arith.mulf %224, %135 : vector<2x32xf32>
    %233 = arith.addf %231, %232 : vector<2x32xf32>
    %234 = vector.extract_strided_slice %31 {offsets = [4, 0], sizes = [2, 32], strides = [1, 1]} : vector<8x32xf32> to vector<2x32xf32>
    %235 = vector.extract_strided_slice %34 {offsets = [4, 0], sizes = [2, 96], strides = [1, 1]} : vector<8x96xf32> to vector<2x96xf32>
    %236 = vector.extract_strided_slice %35 {offsets = [4, 0], sizes = [2, 16], strides = [1, 1]} : vector<8x16xf32> to vector<2x16xf32>
    %cst_84 = arith.constant dense<0.000000e+00> : vector<2x160xf32>
    %237 = tpu.matmul %233, %5, %cst_84 {dimension_numbers = #tpu.dot_dimension_numbers<[1], [0], [0], [1], [0, 0, 1, 1], [], []>} : vector<2x32xf32>, vector<32x160xf32>, vector<2x160xf32> -> vector<2x160xf32>
    %238 = arith.addf %237, %13 : vector<2x160xf32>
    %239 = vector.extract_strided_slice %238 {offsets = [0, 0], sizes = [2, 32], strides = [1, 1]} : vector<2x160xf32> to vector<2x32xf32>
    %240 = arith.addf %239, %234 : vector<2x32xf32>
    %cst_85 = arith.constant 0.000000e+00 : f32
    %241 = vector.broadcast %cst_85 : f32 to vector<2x32xf32>
    %242 = arith.maximumf %240, %241 : vector<2x32xf32>
    %243 = vector.extract_strided_slice %238 {offsets = [0, 32], sizes = [2, 32], strides = [1, 1]} : vector<2x160xf32> to vector<2x32xf32>
    %cst_86 = arith.constant 0.000000e+00 : f32
    %244 = vector.broadcast %cst_86 : f32 to vector<2x32xf32>
    %245 = arith.maximumf %243, %244 : vector<2x32xf32>
    %246 = vector.extract_strided_slice %238 {offsets = [0, 64], sizes = [2, 32], strides = [1, 1]} : vector<2x160xf32> to vector<2x32xf32>
    %247 = vector.extract_strided_slice %238 {offsets = [0, 96], sizes = [2, 32], strides = [1, 1]} : vector<2x160xf32> to vector<2x32xf32>
    %248 = vector.extract_strided_slice %238 {offsets = [0, 128], sizes = [2, 32], strides = [1, 1]} : vector<2x160xf32> to vector<2x32xf32>
    %cst_87 = arith.constant dense<0.000000e+00> : vector<2x16xf32>
    %249 = tpu.matmul %242, %9, %cst_87 {dimension_numbers = #tpu.dot_dimension_numbers<[1], [0], [0], [1], [0, 0, 1, 1], [], []>} : vector<2x32xf32>, vector<32x16xf32>, vector<2x16xf32> -> vector<2x16xf32>
    %250 = arith.addf %249, %16 : vector<2x16xf32>
    %cst_88 = arith.constant dense<0.000000e+00> : vector<2x16xf32>
    %251 = tpu.matmul %245, %10, %cst_88 {dimension_numbers = #tpu.dot_dimension_numbers<[1], [0], [0], [1], [0, 0, 1, 1], [], []>} : vector<2x32xf32>, vector<32x16xf32>, vector<2x16xf32> -> vector<2x16xf32>
    %252 = arith.addf %251, %19 : vector<2x16xf32>
    %cst_89 = arith.constant 0.000000e+00 : f32
    %253 = vector.broadcast %cst_89 : f32 to vector<2x16xf32>
    %254 = arith.maximumf %250, %253 : vector<2x16xf32>
    %255 = math.absf %250 : vector<2x16xf32>
    %cst_90 = arith.constant 0.000000e+00 : f32
    %256 = vector.broadcast %cst_90 : f32 to vector<2x16xf32>
    %257 = arith.subf %256, %255 : vector<2x16xf32>
    %258 = math.exp %257 : vector<2x16xf32>
    %cst_91 = arith.constant 1.000000e+00 : f32
    %259 = vector.broadcast %cst_91 : f32 to vector<2x16xf32>
    %260 = arith.addf %259, %258 : vector<2x16xf32>
    %261 = math.log %260 : vector<2x16xf32>
    %262 = arith.addf %254, %261 : vector<2x16xf32>
    %cst_92 = arith.constant 0.000000e+00 : f32
    %263 = vector.broadcast %cst_92 : f32 to vector<2x16xf32>
    %264 = arith.maximumf %252, %263 : vector<2x16xf32>
    %265 = math.absf %252 : vector<2x16xf32>
    %cst_93 = arith.constant 0.000000e+00 : f32
    %266 = vector.broadcast %cst_93 : f32 to vector<2x16xf32>
    %267 = arith.subf %266, %265 : vector<2x16xf32>
    %268 = math.exp %267 : vector<2x16xf32>
    %cst_94 = arith.constant 1.000000e+00 : f32
    %269 = vector.broadcast %cst_94 : f32 to vector<2x16xf32>
    %270 = arith.addf %269, %268 : vector<2x16xf32>
    %271 = math.log %270 : vector<2x16xf32>
    %272 = arith.addf %264, %271 : vector<2x16xf32>
    %273 = math.log %272 : vector<2x16xf32>
    %cst_95 = arith.constant 2.000000e+00 : f32
    %274 = vector.broadcast %cst_95 : f32 to vector<2x16xf32>
    %275 = arith.mulf %274, %273 : vector<2x16xf32>
    %276 = math.log %262 : vector<2x16xf32>
    %cst_96 = arith.constant 2.000000e+00 : f32
    %277 = vector.broadcast %cst_96 : f32 to vector<2x16xf32>
    %278 = arith.mulf %277, %276 : vector<2x16xf32>
    %279 = arith.subf %275, %278 : vector<2x16xf32>
    %280 = arith.mulf %262, %262 : vector<2x16xf32>
    %281 = arith.subf %250, %252 : vector<2x16xf32>
    %282 = arith.mulf %281, %281 : vector<2x16xf32>
    %283 = arith.addf %280, %282 : vector<2x16xf32>
    %284 = arith.mulf %272, %272 : vector<2x16xf32>
    %285 = arith.divf %283, %284 : vector<2x16xf32>
    %286 = arith.addf %279, %285 : vector<2x16xf32>
    %cst_97 = arith.constant 1.000000e+00 : f32
    %287 = vector.broadcast %cst_97 : f32 to vector<2x16xf32>
    %288 = arith.subf %286, %287 : vector<2x16xf32>
    %289 = vector.shape_cast %288 : vector<2x16xf32> to vector<1x2x16xf32>
    %cst_98 = arith.constant dense<0.000000e+00> : vector<1xf32>
    %290 = vector.multi_reduction <add>, %289, %cst_98 [1, 2] : vector<1x2x16xf32> to vector<1xf32>
    %291 = vector.shape_cast %290 : vector<1xf32> to vector<1x1x1xf32>
    %292 = vector.extract %291[0, 0, 0] : f32 from vector<1x1x1xf32>
    %293 = vector.broadcast %292 : f32 to vector<1x1xf32>
    %cst_99 = arith.constant 5.000000e-01 : f32
    %294 = vector.broadcast %cst_99 : f32 to vector<1x1xf32>
    %295 = arith.mulf %294, %293 : vector<1x1xf32>
    %296 = arith.addf %198, %295 : vector<1x1xf32>
    %297 = arith.mulf %236, %262 : vector<2x16xf32>
    %298 = arith.addf %297, %250 : vector<2x16xf32>
    %cst_100 = arith.constant dense<0.000000e+00> : vector<2x32xf32>
    %299 = tpu.matmul %298, %2, %cst_100 {dimension_numbers = #tpu.dot_dimension_numbers<[1], [0], [0], [1], [0, 0, 1, 1], [], []>} : vector<2x16xf32>, vector<16x32xf32>, vector<2x32xf32> -> vector<2x32xf32>
    %300 = arith.addf %299, %22 : vector<2x32xf32>
    %cst_101 = arith.constant 0.000000e+00 : f32
    %301 = vector.broadcast %cst_101 : f32 to vector<2x32xf32>
    %302 = arith.maximumf %300, %301 : vector<2x32xf32>
    %cst_102 = arith.constant dense<0.000000e+00> : vector<2x96xf32>
    %303 = tpu.matmul %302, %8, %cst_102 {dimension_numbers = #tpu.dot_dimension_numbers<[1], [0], [0], [1], [0, 0, 1, 1], [], []>} : vector<2x32xf32>, vector<32x96xf32>, vector<2x96xf32> -> vector<2x96xf32>
    %304 = arith.addf %235, %303 : vector<2x96xf32>
    %305 = vector.extract_strided_slice %304 {offsets = [0, 0], sizes = [2, 32], strides = [1, 1]} : vector<2x96xf32> to vector<2x32xf32>
    %306 = arith.addf %305, %246 : vector<2x32xf32>
    %cst_103 = arith.constant 0.000000e+00 : f32
    %307 = vector.broadcast %cst_103 : f32 to vector<2x32xf32>
    %308 = arith.subf %307, %306 : vector<2x32xf32>
    %309 = math.exp %308 : vector<2x32xf32>
    %cst_104 = arith.constant 1.000000e+00 : f32
    %310 = vector.broadcast %cst_104 : f32 to vector<2x32xf32>
    %311 = arith.addf %310, %309 : vector<2x32xf32>
    %cst_105 = arith.constant 1.000000e+00 : f32
    %312 = vector.broadcast %cst_105 : f32 to vector<2x32xf32>
    %313 = arith.divf %312, %311 : vector<2x32xf32>
    %314 = vector.extract_strided_slice %304 {offsets = [0, 32], sizes = [2, 32], strides = [1, 1]} : vector<2x96xf32> to vector<2x32xf32>
    %315 = arith.addf %314, %247 : vector<2x32xf32>
    %cst_106 = arith.constant 0.000000e+00 : f32
    %316 = vector.broadcast %cst_106 : f32 to vector<2x32xf32>
    %317 = arith.subf %316, %315 : vector<2x32xf32>
    %318 = math.exp %317 : vector<2x32xf32>
    %cst_107 = arith.constant 1.000000e+00 : f32
    %319 = vector.broadcast %cst_107 : f32 to vector<2x32xf32>
    %320 = arith.addf %319, %318 : vector<2x32xf32>
    %cst_108 = arith.constant 1.000000e+00 : f32
    %321 = vector.broadcast %cst_108 : f32 to vector<2x32xf32>
    %322 = arith.divf %321, %320 : vector<2x32xf32>
    %323 = vector.extract_strided_slice %304 {offsets = [0, 64], sizes = [2, 32], strides = [1, 1]} : vector<2x96xf32> to vector<2x32xf32>
    %324 = arith.mulf %313, %248 : vector<2x32xf32>
    %325 = arith.addf %323, %324 : vector<2x32xf32>
    %326 = math.tanh %325 : vector<2x32xf32>
    %cst_109 = arith.constant 1.000000e+00 : f32
    %327 = vector.broadcast %cst_109 : f32 to vector<2x32xf32>
    %328 = arith.subf %327, %322 : vector<2x32xf32>
    %329 = arith.mulf %328, %326 : vector<2x32xf32>
    %330 = arith.mulf %322, %233 : vector<2x32xf32>
    %331 = arith.addf %329, %330 : vector<2x32xf32>
    %332 = vector.extract_strided_slice %31 {offsets = [6, 0], sizes = [2, 32], strides = [1, 1]} : vector<8x32xf32> to vector<2x32xf32>
    %333 = vector.extract_strided_slice %34 {offsets = [6, 0], sizes = [2, 96], strides = [1, 1]} : vector<8x96xf32> to vector<2x96xf32>
    %334 = vector.extract_strided_slice %35 {offsets = [6, 0], sizes = [2, 16], strides = [1, 1]} : vector<8x16xf32> to vector<2x16xf32>
    %cst_110 = arith.constant dense<0.000000e+00> : vector<2x160xf32>
    %335 = tpu.matmul %331, %5, %cst_110 {dimension_numbers = #tpu.dot_dimension_numbers<[1], [0], [0], [1], [0, 0, 1, 1], [], []>} : vector<2x32xf32>, vector<32x160xf32>, vector<2x160xf32> -> vector<2x160xf32>
    %336 = arith.addf %335, %13 : vector<2x160xf32>
    %337 = vector.extract_strided_slice %336 {offsets = [0, 0], sizes = [2, 32], strides = [1, 1]} : vector<2x160xf32> to vector<2x32xf32>
    %338 = arith.addf %337, %332 : vector<2x32xf32>
    %cst_111 = arith.constant 0.000000e+00 : f32
    %339 = vector.broadcast %cst_111 : f32 to vector<2x32xf32>
    %340 = arith.maximumf %338, %339 : vector<2x32xf32>
    %341 = vector.extract_strided_slice %336 {offsets = [0, 32], sizes = [2, 32], strides = [1, 1]} : vector<2x160xf32> to vector<2x32xf32>
    %cst_112 = arith.constant 0.000000e+00 : f32
    %342 = vector.broadcast %cst_112 : f32 to vector<2x32xf32>
    %343 = arith.maximumf %341, %342 : vector<2x32xf32>
    %344 = vector.extract_strided_slice %336 {offsets = [0, 64], sizes = [2, 32], strides = [1, 1]} : vector<2x160xf32> to vector<2x32xf32>
    %345 = vector.extract_strided_slice %336 {offsets = [0, 96], sizes = [2, 32], strides = [1, 1]} : vector<2x160xf32> to vector<2x32xf32>
    %346 = vector.extract_strided_slice %336 {offsets = [0, 128], sizes = [2, 32], strides = [1, 1]} : vector<2x160xf32> to vector<2x32xf32>
    %cst_113 = arith.constant dense<0.000000e+00> : vector<2x16xf32>
    %347 = tpu.matmul %340, %9, %cst_113 {dimension_numbers = #tpu.dot_dimension_numbers<[1], [0], [0], [1], [0, 0, 1, 1], [], []>} : vector<2x32xf32>, vector<32x16xf32>, vector<2x16xf32> -> vector<2x16xf32>
    %348 = arith.addf %347, %16 : vector<2x16xf32>
    %cst_114 = arith.constant dense<0.000000e+00> : vector<2x16xf32>
    %349 = tpu.matmul %343, %10, %cst_114 {dimension_numbers = #tpu.dot_dimension_numbers<[1], [0], [0], [1], [0, 0, 1, 1], [], []>} : vector<2x32xf32>, vector<32x16xf32>, vector<2x16xf32> -> vector<2x16xf32>
    %350 = arith.addf %349, %19 : vector<2x16xf32>
    %cst_115 = arith.constant 0.000000e+00 : f32
    %351 = vector.broadcast %cst_115 : f32 to vector<2x16xf32>
    %352 = arith.maximumf %348, %351 : vector<2x16xf32>
    %353 = math.absf %348 : vector<2x16xf32>
    %cst_116 = arith.constant 0.000000e+00 : f32
    %354 = vector.broadcast %cst_116 : f32 to vector<2x16xf32>
    %355 = arith.subf %354, %353 : vector<2x16xf32>
    %356 = math.exp %355 : vector<2x16xf32>
    %cst_117 = arith.constant 1.000000e+00 : f32
    %357 = vector.broadcast %cst_117 : f32 to vector<2x16xf32>
    %358 = arith.addf %357, %356 : vector<2x16xf32>
    %359 = math.log %358 : vector<2x16xf32>
    %360 = arith.addf %352, %359 : vector<2x16xf32>
    %cst_118 = arith.constant 0.000000e+00 : f32
    %361 = vector.broadcast %cst_118 : f32 to vector<2x16xf32>
    %362 = arith.maximumf %350, %361 : vector<2x16xf32>
    %363 = math.absf %350 : vector<2x16xf32>
    %cst_119 = arith.constant 0.000000e+00 : f32
    %364 = vector.broadcast %cst_119 : f32 to vector<2x16xf32>
    %365 = arith.subf %364, %363 : vector<2x16xf32>
    %366 = math.exp %365 : vector<2x16xf32>
    %cst_120 = arith.constant 1.000000e+00 : f32
    %367 = vector.broadcast %cst_120 : f32 to vector<2x16xf32>
    %368 = arith.addf %367, %366 : vector<2x16xf32>
    %369 = math.log %368 : vector<2x16xf32>
    %370 = arith.addf %362, %369 : vector<2x16xf32>
    %371 = math.log %370 : vector<2x16xf32>
    %cst_121 = arith.constant 2.000000e+00 : f32
    %372 = vector.broadcast %cst_121 : f32 to vector<2x16xf32>
    %373 = arith.mulf %372, %371 : vector<2x16xf32>
    %374 = math.log %360 : vector<2x16xf32>
    %cst_122 = arith.constant 2.000000e+00 : f32
    %375 = vector.broadcast %cst_122 : f32 to vector<2x16xf32>
    %376 = arith.mulf %375, %374 : vector<2x16xf32>
    %377 = arith.subf %373, %376 : vector<2x16xf32>
    %378 = arith.mulf %360, %360 : vector<2x16xf32>
    %379 = arith.subf %348, %350 : vector<2x16xf32>
    %380 = arith.mulf %379, %379 : vector<2x16xf32>
    %381 = arith.addf %378, %380 : vector<2x16xf32>
    %382 = arith.mulf %370, %370 : vector<2x16xf32>
    %383 = arith.divf %381, %382 : vector<2x16xf32>
    %384 = arith.addf %377, %383 : vector<2x16xf32>
    %cst_123 = arith.constant 1.000000e+00 : f32
    %385 = vector.broadcast %cst_123 : f32 to vector<2x16xf32>
    %386 = arith.subf %384, %385 : vector<2x16xf32>
    %387 = vector.shape_cast %386 : vector<2x16xf32> to vector<1x2x16xf32>
    %cst_124 = arith.constant dense<0.000000e+00> : vector<1xf32>
    %388 = vector.multi_reduction <add>, %387, %cst_124 [1, 2] : vector<1x2x16xf32> to vector<1xf32>
    %389 = vector.shape_cast %388 : vector<1xf32> to vector<1x1x1xf32>
    %390 = vector.extract %389[0, 0, 0] : f32 from vector<1x1x1xf32>
    %391 = vector.broadcast %390 : f32 to vector<1x1xf32>
    %cst_125 = arith.constant 5.000000e-01 : f32
    %392 = vector.broadcast %cst_125 : f32 to vector<1x1xf32>
    %393 = arith.mulf %392, %391 : vector<1x1xf32>
    %394 = arith.addf %296, %393 : vector<1x1xf32>
    %395 = arith.mulf %334, %360 : vector<2x16xf32>
    %396 = arith.addf %395, %348 : vector<2x16xf32>
    %cst_126 = arith.constant dense<0.000000e+00> : vector<2x32xf32>
    %397 = tpu.matmul %396, %2, %cst_126 {dimension_numbers = #tpu.dot_dimension_numbers<[1], [0], [0], [1], [0, 0, 1, 1], [], []>} : vector<2x16xf32>, vector<16x32xf32>, vector<2x32xf32> -> vector<2x32xf32>
    %398 = arith.addf %397, %22 : vector<2x32xf32>
    %cst_127 = arith.constant 0.000000e+00 : f32
    %399 = vector.broadcast %cst_127 : f32 to vector<2x32xf32>
    %400 = arith.maximumf %398, %399 : vector<2x32xf32>
    %cst_128 = arith.constant dense<0.000000e+00> : vector<2x96xf32>
    %401 = tpu.matmul %400, %8, %cst_128 {dimension_numbers = #tpu.dot_dimension_numbers<[1], [0], [0], [1], [0, 0, 1, 1], [], []>} : vector<2x32xf32>, vector<32x96xf32>, vector<2x96xf32> -> vector<2x96xf32>
    %402 = arith.addf %333, %401 : vector<2x96xf32>
    %403 = vector.extract_strided_slice %402 {offsets = [0, 0], sizes = [2, 32], strides = [1, 1]} : vector<2x96xf32> to vector<2x32xf32>
    %404 = arith.addf %403, %344 : vector<2x32xf32>
    %cst_129 = arith.constant 0.000000e+00 : f32
    %405 = vector.broadcast %cst_129 : f32 to vector<2x32xf32>
    %406 = arith.subf %405, %404 : vector<2x32xf32>
    %407 = math.exp %406 : vector<2x32xf32>
    %cst_130 = arith.constant 1.000000e+00 : f32
    %408 = vector.broadcast %cst_130 : f32 to vector<2x32xf32>
    %409 = arith.addf %408, %407 : vector<2x32xf32>
    %cst_131 = arith.constant 1.000000e+00 : f32
    %410 = vector.broadcast %cst_131 : f32 to vector<2x32xf32>
    %411 = arith.divf %410, %409 : vector<2x32xf32>
    %412 = vector.extract_strided_slice %402 {offsets = [0, 32], sizes = [2, 32], strides = [1, 1]} : vector<2x96xf32> to vector<2x32xf32>
    %413 = arith.addf %412, %345 : vector<2x32xf32>
    %cst_132 = arith.constant 0.000000e+00 : f32
    %414 = vector.broadcast %cst_132 : f32 to vector<2x32xf32>
    %415 = arith.subf %414, %413 : vector<2x32xf32>
    %416 = math.exp %415 : vector<2x32xf32>
    %cst_133 = arith.constant 1.000000e+00 : f32
    %417 = vector.broadcast %cst_133 : f32 to vector<2x32xf32>
    %418 = arith.addf %417, %416 : vector<2x32xf32>
    %cst_134 = arith.constant 1.000000e+00 : f32
    %419 = vector.broadcast %cst_134 : f32 to vector<2x32xf32>
    %420 = arith.divf %419, %418 : vector<2x32xf32>
    %421 = vector.extract_strided_slice %402 {offsets = [0, 64], sizes = [2, 32], strides = [1, 1]} : vector<2x96xf32> to vector<2x32xf32>
    %422 = arith.mulf %411, %346 : vector<2x32xf32>
    %423 = arith.addf %421, %422 : vector<2x32xf32>
    %424 = math.tanh %423 : vector<2x32xf32>
    %cst_135 = arith.constant 1.000000e+00 : f32
    %425 = vector.broadcast %cst_135 : f32 to vector<2x32xf32>
    %426 = arith.subf %425, %420 : vector<2x32xf32>
    %427 = arith.mulf %426, %424 : vector<2x32xf32>
    %428 = arith.mulf %420, %331 : vector<2x32xf32>
    %429 = arith.addf %427, %428 : vector<2x32xf32>
    %c0_136 = arith.constant 0 : index
    %c64 = arith.constant 64 : index
    %430 = vector.load %arg6[%c0_136, %c64] : memref<32x640xf32, #tpu.memory_space<vmem>>, vector<32x32xf32>
    %c0_137 = arith.constant 0 : index
    %c336 = arith.constant 336 : index
    %431 = vector.load %arg7[%c0_137, %c336] : memref<1x656xf32, #tpu.memory_space<vmem>>, vector<1x32xf32>
    %c0_138 = arith.constant 0 : index
    %c416 = arith.constant 416 : index
    %432 = vector.load %arg6[%c0_138, %c416] : memref<32x640xf32, #tpu.memory_space<vmem>>, vector<32x32xf32>
    %c0_139 = arith.constant 0 : index
    %c448 = arith.constant 448 : index
    %433 = vector.load %arg7[%c0_139, %c448] : memref<1x656xf32, #tpu.memory_space<vmem>>, vector<1x32xf32>
    %c0_140 = arith.constant 0 : index
    %c448_141 = arith.constant 448 : index
    %434 = vector.load %arg6[%c0_140, %c448_141] : memref<32x640xf32, #tpu.memory_space<vmem>>, vector<32x16xf32>
    %c0_142 = arith.constant 0 : index
    %c480 = arith.constant 480 : index
    %435 = vector.load %arg7[%c0_142, %c480] : memref<1x656xf32, #tpu.memory_space<vmem>>, vector<1x16xf32>
    %c0_143 = arith.constant 0 : index
    %c64_144 = arith.constant 64 : index
    %436 = vector.load %arg5[%c0_143, %c64_144] : memref<16x192xf32, #tpu.memory_space<vmem>>, vector<16x32xf32>
    %c0_145 = arith.constant 0 : index
    %c416_146 = arith.constant 416 : index
    %437 = vector.load %arg7[%c0_145, %c416_146] : memref<1x656xf32, #tpu.memory_space<vmem>>, vector<1x32xf32>
    %c0_147 = arith.constant 0 : index
    %c464 = arith.constant 464 : index
    %438 = vector.load %arg6[%c0_147, %c464] : memref<32x640xf32, #tpu.memory_space<vmem>>, vector<32x32xf32>
    %c0_148 = arith.constant 0 : index
    %c96 = arith.constant 96 : index
    %439 = vector.load %arg5[%c0_148, %c96] : memref<16x192xf32, #tpu.memory_space<vmem>>, vector<16x32xf32>
    %c0_149 = arith.constant 0 : index
    %c128 = arith.constant 128 : index
    %440 = vector.load %arg5[%c0_149, %c128] : memref<16x192xf32, #tpu.memory_space<vmem>>, vector<16x32xf32>
    %c0_150 = arith.constant 0 : index
    %c496 = arith.constant 496 : index
    %441 = vector.load %arg6[%c0_150, %c496] : memref<32x640xf32, #tpu.memory_space<vmem>>, vector<32x32xf32>
    %c0_151 = arith.constant 0 : index
    %c496_152 = arith.constant 496 : index
    %442 = vector.load %arg7[%c0_151, %c496_152] : memref<1x656xf32, #tpu.memory_space<vmem>>, vector<1x32xf32>
    %c0_153 = arith.constant 0 : index
    %c528 = arith.constant 528 : index
    %443 = vector.load %arg6[%c0_153, %c528] : memref<32x640xf32, #tpu.memory_space<vmem>>, vector<32x32xf32>
    %c0_154 = arith.constant 0 : index
    %c528_155 = arith.constant 528 : index
    %444 = vector.load %arg7[%c0_154, %c528_155] : memref<1x656xf32, #tpu.memory_space<vmem>>, vector<1x32xf32>
    %c0_156 = arith.constant 0 : index
    %c560 = arith.constant 560 : index
    %445 = vector.load %arg6[%c0_156, %c560] : memref<32x640xf32, #tpu.memory_space<vmem>>, vector<32x16xf32>
    %c0_157 = arith.constant 0 : index
    %c560_158 = arith.constant 560 : index
    %446 = vector.load %arg7[%c0_157, %c560_158] : memref<1x656xf32, #tpu.memory_space<vmem>>, vector<1x16xf32>
    %c0_159 = arith.constant 0 : index
    %c576 = arith.constant 576 : index
    %447 = vector.load %arg6[%c0_159, %c576] : memref<32x640xf32, #tpu.memory_space<vmem>>, vector<32x32xf32>
    %c0_160 = arith.constant 0 : index
    %c576_161 = arith.constant 576 : index
    %448 = vector.load %arg7[%c0_160, %c576_161] : memref<1x656xf32, #tpu.memory_space<vmem>>, vector<1x32xf32>
    %c0_162 = arith.constant 0 : index
    %c608 = arith.constant 608 : index
    %449 = vector.load %arg6[%c0_162, %c608] : memref<32x640xf32, #tpu.memory_space<vmem>>, vector<32x16xf32>
    %c0_163 = arith.constant 0 : index
    %c608_164 = arith.constant 608 : index
    %450 = vector.load %arg7[%c0_163, %c608_164] : memref<1x656xf32, #tpu.memory_space<vmem>>, vector<1x16xf32>
    %c0_165 = arith.constant 0 : index
    %c160 = arith.constant 160 : index
    %451 = vector.load %arg5[%c0_165, %c160] : memref<16x192xf32, #tpu.memory_space<vmem>>, vector<16x16xf32>
    %c0_166 = arith.constant 0 : index
    %c176 = arith.constant 176 : index
    %452 = vector.load %arg5[%c0_166, %c176] : memref<16x192xf32, #tpu.memory_space<vmem>>, vector<16x16xf32>
    %c0_167 = arith.constant 0 : index
    %c624 = arith.constant 624 : index
    %453 = vector.load %arg7[%c0_167, %c624] : memref<1x656xf32, #tpu.memory_space<vmem>>, vector<1x16xf32>
    %c0_168 = arith.constant 0 : index
    %c624_169 = arith.constant 624 : index
    %454 = vector.load %arg6[%c0_168, %c624_169] : memref<32x640xf32, #tpu.memory_space<vmem>>, vector<32x8xf32>
    %c0_170 = arith.constant 0 : index
    %c640 = arith.constant 640 : index
    %455 = vector.load %arg7[%c0_170, %c640] : memref<1x656xf32, #tpu.memory_space<vmem>>, vector<1x8xf32>
    %c0_171 = arith.constant 0 : index
    %c632 = arith.constant 632 : index
    %456 = vector.load %arg6[%c0_171, %c632] : memref<32x640xf32, #tpu.memory_space<vmem>>, vector<32x8xf32>
    %c0_172 = arith.constant 0 : index
    %c648 = arith.constant 648 : index
    %457 = vector.load %arg7[%c0_172, %c648] : memref<1x656xf32, #tpu.memory_space<vmem>>, vector<1x8xf32>
    %cst_173 = arith.constant dense<0.000000e+00> : vector<2x32xf32>
    %458 = tpu.matmul %429, %430, %cst_173 {dimension_numbers = #tpu.dot_dimension_numbers<[1], [0], [0], [1], [0, 0, 1, 1], [], []>} : vector<2x32xf32>, vector<32x32xf32>, vector<2x32xf32> -> vector<2x32xf32>
    %459 = vector.broadcast %431 : vector<1x32xf32> to vector<2x32xf32>
    %460 = arith.addf %458, %459 : vector<2x32xf32>
    %cst_174 = arith.constant 0.000000e+00 : f32
    %461 = vector.broadcast %cst_174 : f32 to vector<2x32xf32>
    %462 = arith.maximumf %460, %461 : vector<2x32xf32>
    %cst_175 = arith.constant dense<0.000000e+00> : vector<2x16xf32>
    %463 = tpu.matmul %462, %10, %cst_175 {dimension_numbers = #tpu.dot_dimension_numbers<[1], [0], [0], [1], [0, 0, 1, 1], [], []>} : vector<2x32xf32>, vector<32x16xf32>, vector<2x16xf32> -> vector<2x16xf32>
    %464 = arith.addf %463, %19 : vector<2x16xf32>
    %cst_176 = arith.constant 0.000000e+00 : f32
    %465 = vector.broadcast %cst_176 : f32 to vector<2x16xf32>
    %466 = arith.maximumf %464, %465 : vector<2x16xf32>
    %467 = math.absf %464 : vector<2x16xf32>
    %cst_177 = arith.constant 0.000000e+00 : f32
    %468 = vector.broadcast %cst_177 : f32 to vector<2x16xf32>
    %469 = arith.subf %468, %467 : vector<2x16xf32>
    %470 = math.exp %469 : vector<2x16xf32>
    %cst_178 = arith.constant 1.000000e+00 : f32
    %471 = vector.broadcast %cst_178 : f32 to vector<2x16xf32>
    %472 = arith.addf %471, %470 : vector<2x16xf32>
    %473 = math.log %472 : vector<2x16xf32>
    %474 = arith.addf %466, %473 : vector<2x16xf32>
    %cst_179 = arith.constant dense<0.000000e+00> : vector<2x32xf32>
    %475 = tpu.matmul %429, %432, %cst_179 {dimension_numbers = #tpu.dot_dimension_numbers<[1], [0], [0], [1], [0, 0, 1, 1], [], []>} : vector<2x32xf32>, vector<32x32xf32>, vector<2x32xf32> -> vector<2x32xf32>
    %476 = vector.broadcast %433 : vector<1x32xf32> to vector<2x32xf32>
    %477 = arith.addf %475, %476 : vector<2x32xf32>
    %cst_180 = arith.constant 0.000000e+00 : f32
    %478 = vector.broadcast %cst_180 : f32 to vector<2x32xf32>
    %479 = arith.maximumf %477, %478 : vector<2x32xf32>
    %cst_181 = arith.constant dense<0.000000e+00> : vector<2x16xf32>
    %480 = tpu.matmul %479, %434, %cst_181 {dimension_numbers = #tpu.dot_dimension_numbers<[1], [0], [0], [1], [0, 0, 1, 1], [], []>} : vector<2x32xf32>, vector<32x16xf32>, vector<2x16xf32> -> vector<2x16xf32>
    %481 = vector.broadcast %435 : vector<1x16xf32> to vector<2x16xf32>
    %482 = arith.addf %480, %481 : vector<2x16xf32>
    %483 = tpu.concatenate %464, %464 in 0 : vector<2x16xf32>, vector<2x16xf32> -> vector<4x16xf32>
    %484 = tpu.concatenate %474, %474 in 0 : vector<2x16xf32>, vector<2x16xf32> -> vector<4x16xf32>
    %485 = tpu.concatenate %482, %482 in 0 : vector<2x16xf32>, vector<2x16xf32> -> vector<4x16xf32>
    %c0_182 = arith.constant 0 : index
    %c0_183 = arith.constant 0 : index
    %486 = vector.load %arg3[%c0_182, %c0_183] : memref<4x16xf32, #tpu.memory_space<vmem>>, vector<4x16xf32>
    %487 = arith.mulf %486, %484 : vector<4x16xf32>
    %488 = arith.addf %487, %483 : vector<4x16xf32>
    %cst_184 = arith.constant dense<0.000000e+00> : vector<4x32xf32>
    %489 = tpu.matmul %488, %436, %cst_184 {dimension_numbers = #tpu.dot_dimension_numbers<[1], [0], [0], [1], [0, 0, 1, 1], [], []>} : vector<4x16xf32>, vector<16x32xf32>, vector<4x32xf32> -> vector<4x32xf32>
    %490 = vector.broadcast %437 : vector<1x32xf32> to vector<4x32xf32>
    %491 = arith.addf %489, %490 : vector<4x32xf32>
    %cst_185 = arith.constant 0.000000e+00 : f32
    %492 = vector.broadcast %cst_185 : f32 to vector<4x32xf32>
    %493 = arith.maximumf %491, %492 : vector<4x32xf32>
    %cst_186 = arith.constant dense<0.000000e+00> : vector<4x32xf32>
    %494 = tpu.matmul %493, %438, %cst_186 {dimension_numbers = #tpu.dot_dimension_numbers<[1], [0], [0], [1], [0, 0, 1, 1], [], []>} : vector<4x32xf32>, vector<32x32xf32>, vector<4x32xf32> -> vector<4x32xf32>
    %cst_187 = arith.constant dense<0.000000e+00> : vector<4x32xf32>
    %495 = tpu.matmul %485, %439, %cst_187 {dimension_numbers = #tpu.dot_dimension_numbers<[1], [0], [0], [1], [0, 0, 1, 1], [], []>} : vector<4x16xf32>, vector<16x32xf32>, vector<4x32xf32> -> vector<4x32xf32>
    %496 = arith.addf %494, %495 : vector<4x32xf32>
    %497 = vector.broadcast %442 : vector<1x32xf32> to vector<4x32xf32>
    %498 = arith.addf %496, %497 : vector<4x32xf32>
    %cst_188 = arith.constant 0.000000e+00 : f32
    %499 = vector.broadcast %cst_188 : f32 to vector<4x32xf32>
    %500 = arith.maximumf %498, %499 : vector<4x32xf32>
    %cst_189 = arith.constant dense<0.000000e+00> : vector<4x32xf32>
    %501 = tpu.matmul %485, %440, %cst_189 {dimension_numbers = #tpu.dot_dimension_numbers<[1], [0], [0], [1], [0, 0, 1, 1], [], []>} : vector<4x16xf32>, vector<16x32xf32>, vector<4x32xf32> -> vector<4x32xf32>
    %cst_190 = arith.constant dense<0.000000e+00> : vector<4x32xf32>
    %502 = tpu.matmul %500, %441, %cst_190 {dimension_numbers = #tpu.dot_dimension_numbers<[1], [0], [0], [1], [0, 0, 1, 1], [], []>} : vector<4x32xf32>, vector<32x32xf32>, vector<4x32xf32> -> vector<4x32xf32>
    %503 = arith.addf %501, %502 : vector<4x32xf32>
    %504 = vector.broadcast %442 : vector<1x32xf32> to vector<4x32xf32>
    %505 = arith.addf %503, %504 : vector<4x32xf32>
    %cst_191 = arith.constant 0.000000e+00 : f32
    %506 = vector.broadcast %cst_191 : f32 to vector<4x32xf32>
    %507 = arith.maximumf %505, %506 : vector<4x32xf32>
    %cst_192 = arith.constant 0.000000e+00 : f32
    %508 = vector.broadcast %cst_192 : f32 to vector<4x32xf32>
    %509 = arith.maximumf %507, %508 : vector<4x32xf32>
    %510 = math.absf %507 : vector<4x32xf32>
    %cst_193 = arith.constant 0.000000e+00 : f32
    %511 = vector.broadcast %cst_193 : f32 to vector<4x32xf32>
    %512 = arith.subf %511, %510 : vector<4x32xf32>
    %513 = math.exp %512 : vector<4x32xf32>
    %cst_194 = arith.constant 1.000000e+00 : f32
    %514 = vector.broadcast %cst_194 : f32 to vector<4x32xf32>
    %515 = arith.addf %514, %513 : vector<4x32xf32>
    %516 = math.log %515 : vector<4x32xf32>
    %517 = arith.addf %509, %516 : vector<4x32xf32>
    %cst_195 = arith.constant dense<0.000000e+00> : vector<4x32xf32>
    %518 = tpu.matmul %500, %443, %cst_195 {dimension_numbers = #tpu.dot_dimension_numbers<[1], [0], [0], [1], [0, 0, 1, 1], [], []>} : vector<4x32xf32>, vector<32x32xf32>, vector<4x32xf32> -> vector<4x32xf32>
    %519 = vector.broadcast %444 : vector<1x32xf32> to vector<4x32xf32>
    %520 = arith.addf %518, %519 : vector<4x32xf32>
    %cst_196 = arith.constant 0.000000e+00 : f32
    %521 = vector.broadcast %cst_196 : f32 to vector<4x32xf32>
    %522 = arith.maximumf %520, %521 : vector<4x32xf32>
    %cst_197 = arith.constant dense<0.000000e+00> : vector<4x16xf32>
    %523 = tpu.matmul %522, %445, %cst_197 {dimension_numbers = #tpu.dot_dimension_numbers<[1], [0], [0], [1], [0, 0, 1, 1], [], []>} : vector<4x32xf32>, vector<32x16xf32>, vector<4x16xf32> -> vector<4x16xf32>
    %524 = vector.broadcast %446 : vector<1x16xf32> to vector<4x16xf32>
    %525 = arith.addf %523, %524 : vector<4x16xf32>
    %526 = tpu.concatenate %507, %507, %507 in 0 : vector<4x32xf32>, vector<4x32xf32>, vector<4x32xf32> -> vector<12x32xf32>
    %527 = tpu.concatenate %517, %517, %517 in 0 : vector<4x32xf32>, vector<4x32xf32>, vector<4x32xf32> -> vector<12x32xf32>
    %528 = tpu.concatenate %525, %525, %525 in 0 : vector<4x16xf32>, vector<4x16xf32>, vector<4x16xf32> -> vector<12x16xf32>
    %c0_198 = arith.constant 0 : index
    %c0_199 = arith.constant 0 : index
    %529 = vector.load %arg4[%c0_198, %c0_199] : memref<12x32xf32, #tpu.memory_space<vmem>>, vector<12x32xf32>
    %530 = arith.mulf %529, %527 : vector<12x32xf32>
    %531 = arith.addf %530, %526 : vector<12x32xf32>
    %cst_200 = arith.constant dense<0.000000e+00> : vector<12x32xf32>
    %532 = tpu.matmul %531, %447, %cst_200 {dimension_numbers = #tpu.dot_dimension_numbers<[1], [0], [0], [1], [0, 0, 1, 1], [], []>} : vector<12x32xf32>, vector<32x32xf32>, vector<12x32xf32> -> vector<12x32xf32>
    %533 = vector.broadcast %448 : vector<1x32xf32> to vector<12x32xf32>
    %534 = arith.addf %532, %533 : vector<12x32xf32>
    %cst_201 = arith.constant 0.000000e+00 : f32
    %535 = vector.broadcast %cst_201 : f32 to vector<12x32xf32>
    %536 = arith.maximumf %534, %535 : vector<12x32xf32>
    %cst_202 = arith.constant dense<0.000000e+00> : vector<12x16xf32>
    %537 = tpu.matmul %536, %449, %cst_202 {dimension_numbers = #tpu.dot_dimension_numbers<[1], [0], [0], [1], [0, 0, 1, 1], [], []>} : vector<12x32xf32>, vector<32x16xf32>, vector<12x16xf32> -> vector<12x16xf32>
    %538 = vector.broadcast %450 : vector<1x16xf32> to vector<12x16xf32>
    %539 = arith.addf %537, %538 : vector<12x16xf32>
    %cst_203 = arith.constant 0.000000e+00 : f32
    %540 = vector.broadcast %cst_203 : f32 to vector<12x16xf32>
    %541 = arith.maximumf %539, %540 : vector<12x16xf32>
    %542 = math.absf %539 : vector<12x16xf32>
    %cst_204 = arith.constant 0.000000e+00 : f32
    %543 = vector.broadcast %cst_204 : f32 to vector<12x16xf32>
    %544 = arith.subf %543, %542 : vector<12x16xf32>
    %545 = math.exp %544 : vector<12x16xf32>
    %cst_205 = arith.constant 1.000000e+00 : f32
    %546 = vector.broadcast %cst_205 : f32 to vector<12x16xf32>
    %547 = arith.addf %546, %545 : vector<12x16xf32>
    %548 = math.log %547 : vector<12x16xf32>
    %549 = arith.addf %541, %548 : vector<12x16xf32>
    %cst_206 = arith.constant dense<0.000000e+00> : vector<12x16xf32>
    %550 = tpu.matmul %539, %451, %cst_206 {dimension_numbers = #tpu.dot_dimension_numbers<[1], [0], [0], [1], [0, 0, 1, 1], [], []>} : vector<12x16xf32>, vector<16x16xf32>, vector<12x16xf32> -> vector<12x16xf32>
    %cst_207 = arith.constant dense<0.000000e+00> : vector<12x16xf32>
    %551 = tpu.matmul %528, %452, %cst_207 {dimension_numbers = #tpu.dot_dimension_numbers<[1], [0], [0], [1], [0, 0, 1, 1], [], []>} : vector<12x16xf32>, vector<16x16xf32>, vector<12x16xf32> -> vector<12x16xf32>
    %552 = arith.addf %550, %551 : vector<12x16xf32>
    %553 = vector.broadcast %453 : vector<1x16xf32> to vector<12x16xf32>
    %554 = arith.addf %552, %553 : vector<12x16xf32>
    %cst_208 = arith.constant 0.000000e+00 : f32
    %555 = vector.broadcast %cst_208 : f32 to vector<12x16xf32>
    %556 = arith.maximumf %554, %555 : vector<12x16xf32>
    %cst_209 = arith.constant 0.000000e+00 : f32
    %557 = vector.broadcast %cst_209 : f32 to vector<12x16xf32>
    %558 = arith.maximumf %556, %557 : vector<12x16xf32>
    %559 = math.absf %556 : vector<12x16xf32>
    %cst_210 = arith.constant 0.000000e+00 : f32
    %560 = vector.broadcast %cst_210 : f32 to vector<12x16xf32>
    %561 = arith.subf %560, %559 : vector<12x16xf32>
    %562 = math.exp %561 : vector<12x16xf32>
    %cst_211 = arith.constant 1.000000e+00 : f32
    %563 = vector.broadcast %cst_211 : f32 to vector<12x16xf32>
    %564 = arith.addf %563, %562 : vector<12x16xf32>
    %565 = math.log %564 : vector<12x16xf32>
    %566 = arith.addf %558, %565 : vector<12x16xf32>
    %567 = tpu.concatenate %464, %464, %464, %464, %464, %464 in 0 : vector<2x16xf32>, vector<2x16xf32>, vector<2x16xf32>, vector<2x16xf32>, vector<2x16xf32>, vector<2x16xf32> -> vector<12x16xf32>
    %568 = tpu.concatenate %474, %474, %474, %474, %474, %474 in 0 : vector<2x16xf32>, vector<2x16xf32>, vector<2x16xf32>, vector<2x16xf32>, vector<2x16xf32>, vector<2x16xf32> -> vector<12x16xf32>
    %569 = math.log %566 : vector<12x16xf32>
    %cst_212 = arith.constant 2.000000e+00 : f32
    %570 = vector.broadcast %cst_212 : f32 to vector<12x16xf32>
    %571 = arith.mulf %570, %569 : vector<12x16xf32>
    %572 = math.log %568 : vector<12x16xf32>
    %cst_213 = arith.constant 2.000000e+00 : f32
    %573 = vector.broadcast %cst_213 : f32 to vector<12x16xf32>
    %574 = arith.mulf %573, %572 : vector<12x16xf32>
    %575 = arith.subf %571, %574 : vector<12x16xf32>
    %576 = arith.mulf %568, %568 : vector<12x16xf32>
    %577 = arith.subf %567, %556 : vector<12x16xf32>
    %578 = arith.mulf %577, %577 : vector<12x16xf32>
    %579 = arith.addf %576, %578 : vector<12x16xf32>
    %580 = arith.mulf %566, %566 : vector<12x16xf32>
    %581 = arith.divf %579, %580 : vector<12x16xf32>
    %582 = arith.addf %575, %581 : vector<12x16xf32>
    %cst_214 = arith.constant 1.000000e+00 : f32
    %583 = vector.broadcast %cst_214 : f32 to vector<12x16xf32>
    %584 = arith.subf %582, %583 : vector<12x16xf32>
    %585 = math.log %568 : vector<12x16xf32>
    %cst_215 = arith.constant 2.000000e+00 : f32
    %586 = vector.broadcast %cst_215 : f32 to vector<12x16xf32>
    %587 = arith.mulf %586, %585 : vector<12x16xf32>
    %588 = math.log %566 : vector<12x16xf32>
    %cst_216 = arith.constant 2.000000e+00 : f32
    %589 = vector.broadcast %cst_216 : f32 to vector<12x16xf32>
    %590 = arith.mulf %589, %588 : vector<12x16xf32>
    %591 = arith.subf %587, %590 : vector<12x16xf32>
    %592 = arith.mulf %566, %566 : vector<12x16xf32>
    %593 = arith.subf %556, %567 : vector<12x16xf32>
    %594 = arith.mulf %593, %593 : vector<12x16xf32>
    %595 = arith.addf %592, %594 : vector<12x16xf32>
    %596 = arith.mulf %568, %568 : vector<12x16xf32>
    %597 = arith.divf %595, %596 : vector<12x16xf32>
    %598 = arith.addf %591, %597 : vector<12x16xf32>
    %cst_217 = arith.constant 1.000000e+00 : f32
    %599 = vector.broadcast %cst_217 : f32 to vector<12x16xf32>
    %600 = arith.subf %598, %599 : vector<12x16xf32>
    %601 = arith.addf %584, %600 : vector<12x16xf32>
    %602 = math.log %549 : vector<12x16xf32>
    %cst_218 = arith.constant 2.000000e+00 : f32
    %603 = vector.broadcast %cst_218 : f32 to vector<12x16xf32>
    %604 = arith.mulf %603, %602 : vector<12x16xf32>
    %605 = math.log %566 : vector<12x16xf32>
    %cst_219 = arith.constant 2.000000e+00 : f32
    %606 = vector.broadcast %cst_219 : f32 to vector<12x16xf32>
    %607 = arith.mulf %606, %605 : vector<12x16xf32>
    %608 = arith.subf %604, %607 : vector<12x16xf32>
    %609 = arith.mulf %566, %566 : vector<12x16xf32>
    %610 = arith.subf %556, %539 : vector<12x16xf32>
    %611 = arith.mulf %610, %610 : vector<12x16xf32>
    %612 = arith.addf %609, %611 : vector<12x16xf32>
    %613 = arith.mulf %549, %549 : vector<12x16xf32>
    %614 = arith.divf %612, %613 : vector<12x16xf32>
    %615 = arith.addf %608, %614 : vector<12x16xf32>
    %cst_220 = arith.constant 1.000000e+00 : f32
    %616 = vector.broadcast %cst_220 : f32 to vector<12x16xf32>
    %617 = arith.subf %615, %616 : vector<12x16xf32>
    %618 = vector.extract_strided_slice %500 {offsets = [2, 0], sizes = [2, 32], strides = [1, 1]} : vector<4x32xf32> to vector<2x32xf32>
    %619 = vector.extract_strided_slice %601 {offsets = [2, 0], sizes = [2, 16], strides = [1, 1]} : vector<12x16xf32> to vector<2x16xf32>
    %620 = vector.shape_cast %619 : vector<2x16xf32> to vector<1x2x16xf32>
    %cst_221 = arith.constant dense<0.000000e+00> : vector<1xf32>
    %621 = vector.multi_reduction <add>, %620, %cst_221 [1, 2] : vector<1x2x16xf32> to vector<1xf32>
    %622 = vector.shape_cast %621 : vector<1xf32> to vector<1x1x1xf32>
    %623 = vector.extract %622[0, 0, 0] : f32 from vector<1x1x1xf32>
    %624 = vector.broadcast %623 : f32 to vector<1x1xf32>
    %cst_222 = arith.constant 5.000000e-01 : f32
    %625 = vector.broadcast %cst_222 : f32 to vector<1x1xf32>
    %626 = arith.mulf %625, %624 : vector<1x1xf32>
    %627 = vector.extract_strided_slice %617 {offsets = [2, 0], sizes = [2, 16], strides = [1, 1]} : vector<12x16xf32> to vector<2x16xf32>
    %628 = vector.shape_cast %627 : vector<2x16xf32> to vector<1x2x16xf32>
    %cst_223 = arith.constant dense<0.000000e+00> : vector<1xf32>
    %629 = vector.multi_reduction <add>, %628, %cst_223 [1, 2] : vector<1x2x16xf32> to vector<1xf32>
    %630 = vector.shape_cast %629 : vector<1xf32> to vector<1x1x1xf32>
    %631 = vector.extract %630[0, 0, 0] : f32 from vector<1x1x1xf32>
    %632 = vector.broadcast %631 : f32 to vector<1x1xf32>
    %cst_224 = arith.constant 5.000000e-01 : f32
    %633 = vector.broadcast %cst_224 : f32 to vector<1x1xf32>
    %634 = arith.mulf %633, %632 : vector<1x1xf32>
    %635 = vector.extract_strided_slice %531 {offsets = [2, 0], sizes = [2, 32], strides = [1, 1]} : vector<12x32xf32> to vector<2x32xf32>
    %636 = vector.extract_strided_slice %601 {offsets = [6, 0], sizes = [2, 16], strides = [1, 1]} : vector<12x16xf32> to vector<2x16xf32>
    %637 = vector.shape_cast %636 : vector<2x16xf32> to vector<1x2x16xf32>
    %cst_225 = arith.constant dense<0.000000e+00> : vector<1xf32>
    %638 = vector.multi_reduction <add>, %637, %cst_225 [1, 2] : vector<1x2x16xf32> to vector<1xf32>
    %639 = vector.shape_cast %638 : vector<1xf32> to vector<1x1x1xf32>
    %640 = vector.extract %639[0, 0, 0] : f32 from vector<1x1x1xf32>
    %641 = vector.broadcast %640 : f32 to vector<1x1xf32>
    %cst_226 = arith.constant 5.000000e-01 : f32
    %642 = vector.broadcast %cst_226 : f32 to vector<1x1xf32>
    %643 = arith.mulf %642, %641 : vector<1x1xf32>
    %644 = vector.extract_strided_slice %617 {offsets = [6, 0], sizes = [2, 16], strides = [1, 1]} : vector<12x16xf32> to vector<2x16xf32>
    %645 = vector.shape_cast %644 : vector<2x16xf32> to vector<1x2x16xf32>
    %cst_227 = arith.constant dense<0.000000e+00> : vector<1xf32>
    %646 = vector.multi_reduction <add>, %645, %cst_227 [1, 2] : vector<1x2x16xf32> to vector<1xf32>
    %647 = vector.shape_cast %646 : vector<1xf32> to vector<1x1x1xf32>
    %648 = vector.extract %647[0, 0, 0] : f32 from vector<1x1x1xf32>
    %649 = vector.broadcast %648 : f32 to vector<1x1xf32>
    %cst_228 = arith.constant 5.000000e-01 : f32
    %650 = vector.broadcast %cst_228 : f32 to vector<1x1xf32>
    %651 = arith.mulf %650, %649 : vector<1x1xf32>
    %652 = vector.extract_strided_slice %531 {offsets = [6, 0], sizes = [2, 32], strides = [1, 1]} : vector<12x32xf32> to vector<2x32xf32>
    %653 = arith.cmpf olt, %643, %626 : vector<1x1xf32>
    %654 = arith.select %653, %643, %626 : vector<1x1xi1>, vector<1x1xf32>
    %655 = arith.select %653, %651, %634 : vector<1x1xi1>, vector<1x1xf32>
    %656 = vector.shape_cast %653 : vector<1x1xi1> to vector<1x1xi1>
    %657 = vector.broadcast %656 : vector<1x1xi1> to vector<2x32xi1>
    %658 = arith.select %657, %652, %635 : vector<2x32xi1>, vector<2x32xf32>
    %659 = vector.shape_cast %653 : vector<1x1xi1> to vector<1x1xi1>
    %660 = vector.broadcast %659 : vector<1x1xi1> to vector<2x32xi1>
    %661 = arith.select %660, %618, %618 : vector<2x32xi1>, vector<2x32xf32>
    %662 = vector.extract_strided_slice %601 {offsets = [10, 0], sizes = [2, 16], strides = [1, 1]} : vector<12x16xf32> to vector<2x16xf32>
    %663 = vector.shape_cast %662 : vector<2x16xf32> to vector<1x2x16xf32>
    %cst_229 = arith.constant dense<0.000000e+00> : vector<1xf32>
    %664 = vector.multi_reduction <add>, %663, %cst_229 [1, 2] : vector<1x2x16xf32> to vector<1xf32>
    %665 = vector.shape_cast %664 : vector<1xf32> to vector<1x1x1xf32>
    %666 = vector.extract %665[0, 0, 0] : f32 from vector<1x1x1xf32>
    %667 = vector.broadcast %666 : f32 to vector<1x1xf32>
    %cst_230 = arith.constant 5.000000e-01 : f32
    %668 = vector.broadcast %cst_230 : f32 to vector<1x1xf32>
    %669 = arith.mulf %668, %667 : vector<1x1xf32>
    %670 = vector.extract_strided_slice %617 {offsets = [10, 0], sizes = [2, 16], strides = [1, 1]} : vector<12x16xf32> to vector<2x16xf32>
    %671 = vector.shape_cast %670 : vector<2x16xf32> to vector<1x2x16xf32>
    %cst_231 = arith.constant dense<0.000000e+00> : vector<1xf32>
    %672 = vector.multi_reduction <add>, %671, %cst_231 [1, 2] : vector<1x2x16xf32> to vector<1xf32>
    %673 = vector.shape_cast %672 : vector<1xf32> to vector<1x1x1xf32>
    %674 = vector.extract %673[0, 0, 0] : f32 from vector<1x1x1xf32>
    %675 = vector.broadcast %674 : f32 to vector<1x1xf32>
    %cst_232 = arith.constant 5.000000e-01 : f32
    %676 = vector.broadcast %cst_232 : f32 to vector<1x1xf32>
    %677 = arith.mulf %676, %675 : vector<1x1xf32>
    %678 = vector.extract_strided_slice %531 {offsets = [10, 0], sizes = [2, 32], strides = [1, 1]} : vector<12x32xf32> to vector<2x32xf32>
    %679 = arith.cmpf olt, %669, %654 : vector<1x1xf32>
    %680 = arith.select %679, %669, %654 : vector<1x1xi1>, vector<1x1xf32>
    %681 = arith.select %679, %677, %655 : vector<1x1xi1>, vector<1x1xf32>
    %682 = vector.shape_cast %679 : vector<1x1xi1> to vector<1x1xi1>
    %683 = vector.broadcast %682 : vector<1x1xi1> to vector<2x32xi1>
    %684 = arith.select %683, %678, %658 : vector<2x32xi1>, vector<2x32xf32>
    %685 = vector.shape_cast %679 : vector<1x1xi1> to vector<1x1xi1>
    %686 = vector.broadcast %685 : vector<1x1xi1> to vector<2x32xi1>
    %687 = arith.select %686, %618, %661 : vector<2x32xi1>, vector<2x32xf32>
    %cst_233 = arith.constant dense<0.000000e+00> : vector<2x8xf32>
    %688 = tpu.matmul %684, %454, %cst_233 {dimension_numbers = #tpu.dot_dimension_numbers<[1], [0], [0], [1], [0, 0, 1, 1], [], []>} : vector<2x32xf32>, vector<32x8xf32>, vector<2x8xf32> -> vector<2x8xf32>
    %689 = vector.broadcast %455 : vector<1x8xf32> to vector<2x8xf32>
    %690 = arith.addf %688, %689 : vector<2x8xf32>
    %cst_234 = arith.constant dense<0.000000e+00> : vector<2x8xf32>
    %691 = tpu.matmul %687, %456, %cst_234 {dimension_numbers = #tpu.dot_dimension_numbers<[1], [0], [0], [1], [0, 0, 1, 1], [], []>} : vector<2x32xf32>, vector<32x8xf32>, vector<2x8xf32> -> vector<2x8xf32>
    %692 = vector.broadcast %457 : vector<1x8xf32> to vector<2x8xf32>
    %693 = arith.addf %691, %692 : vector<2x8xf32>
    %cst_235 = arith.constant 0.000000e+00 : f32
    %694 = vector.broadcast %cst_235 : f32 to vector<8x128xf32>
    %c0_236 = arith.constant 0 : index
    %c0_237 = arith.constant 0 : index
    %695 = vector.load %arg8[%c0_236, %c0_237] : memref<8x128xf32, #tpu.memory_space<vmem>>, vector<8x128xf32>
    tpu.vector_store %arg8[%c0_236, %c0_237], %694 {strides = array<i32>} : memref<8x128xf32, #tpu.memory_space<vmem>>, vector<8x128xf32>,
    %c0_238 = arith.constant 0 : index
    %c0_239 = arith.constant 0 : index
    %696 = vector.load %arg8[%c0_238, %c0_239] : memref<8x128xf32, #tpu.memory_space<vmem>>, vector<2x8xf32>
    tpu.vector_store %arg8[%c0_238, %c0_239], %690 {strides = array<i32>} : memref<8x128xf32, #tpu.memory_space<vmem>>, vector<2x8xf32>,
    %c0_240 = arith.constant 0 : index
    %c8 = arith.constant 8 : index
    %697 = vector.load %arg8[%c0_240, %c8] : memref<8x128xf32, #tpu.memory_space<vmem>>, vector<2x8xf32>
    tpu.vector_store %arg8[%c0_240, %c8], %693 {strides = array<i32>} : memref<8x128xf32, #tpu.memory_space<vmem>>, vector<2x8xf32>,
    %698 = tpu.concatenate %394, %681, %680 in 1 : vector<1x1xf32>, vector<1x1xf32>, vector<1x1xf32> -> vector<1x3xf32>
    %c0_241 = arith.constant 0 : index
    %c16 = arith.constant 16 : index
    %699 = vector.load %arg8[%c0_241, %c16] : memref<8x128xf32, #tpu.memory_space<vmem>>, vector<1x3xf32>
    tpu.vector_store %arg8[%c0_241, %c16], %698 {strides = array<i32>} : memref<8x128xf32, #tpu.memory_space<vmem>>, vector<1x3xf32>,
    return
  }
}

</mosaic_0001>

<bundles_post_ra>
// kernel: tpu_custom_call.1
= control target key start
LH: loop header
LB: loop body
LE: loop exit
PB: predicated region body
PF: predicated region fallthrough
CT: control target
= control target key end

     0   :  { %13 = vsyncpa [#allocation3], 0  ;;  %s6523_s0 = inlined_call_operand.hbm [shape: f32[8,16], index: 0, kind: input, shape index: {}]   ;;  %s6524_s1 = inlined_call_operand.hbm [shape: f32[8,16], index: 1, kind: input, shape index: {}]   ;;  %s6525_s2 = inlined_call_operand.hbm [shape: f32[2,32], index: 2, kind: input, shape index: {}]   ;;  %s6526_s3 = inlined_call_operand.vmem [shape: f32[4,16], index: 3, kind: input, shape index: {}]   ;;  %s6527_s4 = inlined_call_operand.hbm [shape: f32[12,32], index: 4, kind: input, shape index: {}]   ;;  %s6528_s5 = inlined_call_operand.hbm [shape: f32[16,192], index: 5, kind: input, shape index: {}]   ;;  %s6529_s6 = inlined_call_operand.hbm [shape: f32[32,640], index: 6, kind: input, shape index: {}]   ;;  %s6530_s7 = inlined_call_operand.vmem [shape: f32[1,656], index: 7, kind: input, shape index: {}]   ;;  %s6531_s8 = inlined_call_operand.hbm [shape: f32[8,128], index: 8, kind: output, shape index: {}]  }
   0x1   :  { %14 = vsyncpa [#allocation6], 0 }
   0x2   :  { %15 = vsyncpa [#allocation9], 0 }
   0x3   :  { %16 = vsyncpa [#allocation12], 0 }
   0x4   :  { %17 = vsyncpa [#allocation4], 0  ;;  %s5555_s27 = smov [#allocation5]   ;;  %s5556_s29 = smov [#allocation8]  }
   0x5   :  { %s34_s28 = sshll.u32 %s5555_s27, 4  ;;  %s55_s30 = sshll.u32 %s5556_s29, 4  ;;  %s35_s28 = int_to_ptr.vmem [resolvable:$true] %s34_s28  ;;  %s5623_s30 = int_to_ptr.vmem [resolvable:$true] %s55_s30 }
   0x6   :  { %s5391_s11 = scalar_lea.hbm %s6524_s1, 128 }
   0x7   :  { %p5392_p0 = scmp.ne.s32.totalorder %s6524_s1, %s5391_s11  ;;  %p5395_p1 = scmp.lt.u32.totalorder %s5391_s11, %s6524_s1 }
   0x9   :  { %p5397_p2 = pnand %p5395_p1, %p5392_p0 }
   0xb   :  { %5400 = shalt.err (!%p5397_p2)
}
   0xc   :  { %s5401_s16 = scalar_lea.vmem %s35_s28, 128  ;;  %p5406_p4 = scmp.lt.s32.totalorder %s35_s28, %s35_s28 }
   0xd   :  { %p5402_p3 = scmp.ne.s32.totalorder %s35_s28, %s5401_s16  ;;  %p5407_p5 = scmp.lt.s32.totalorder %s5401_s16, %s5401_s16 }
   0xf   :  { %p5408_p6 = por %p5407_p5, %p5406_p4 }
  0x11   :  { %p5409_p7 = pnand %p5408_p6, %p5402_p3 }
  0x13   :  { %5412 = shalt.err (!%p5409_p7)
}
  0x14   :  { %37 = dma.hbm_to_vmem [thread:$0]  %s6524_s1, 128, %s35_s28, [#allocation6]  }
  0x15   :  { %s5413_s21 = scalar_lea.hbm %s6527_s4, 256 }
  0x16   :  { %p5414_p8 = scmp.ne.s32.totalorder %s6527_s4, %s5413_s21  ;;  %p5417_p9 = scmp.lt.u32.totalorder %s5413_s21, %s6527_s4 }
  0x18   :  { %p5419_p10 = pnand %p5417_p9, %p5414_p8 }
  0x1a   :  { %5422 = shalt.err (!%p5419_p10)
}
  0x1b   :  { %s5423_s26 = scalar_lea.vmem %s5623_s30, 256  ;;  %p5428_p12 = scmp.lt.s32.totalorder %s5623_s30, %s5623_s30 }
  0x1c   :  { %p5424_p11 = scmp.ne.s32.totalorder %s5623_s30, %s5423_s26  ;;  %p5429_p13 = scmp.lt.s32.totalorder %s5423_s26, %s5423_s26 }
  0x1e   :  { %p5430_p0 = por %p5429_p13, %p5428_p12 }
  0x20   :  { %p5431_p1 = pnand %p5430_p0, %p5424_p11 }
  0x22   :  { %5434 = shalt.err (!%p5431_p1)
}
  0x23   :  { %s5557_s1 = smov 128   ;;  %s5558_s27 = smov 8  }
  0x24   :  { %61 = dma.hbm_to_vmem [thread:$0]  %s6527_s4, 256, %s5623_s30, [#allocation9], %s5557_s1, %s5557_s1, %s5558_s27  }
  0x25   :  { %s5559_s9 = smov [#allocation2]   ;;  %s5560_s11 = smov [#allocation7]  }
  0x26   :  { %s24_s10 = sshll.u32 %s5559_s9, 4  ;;  %s44_s12 = sshll.u32 %s5560_s11, 4  ;;  %s25_s10 = int_to_ptr.vmem [resolvable:$true] %s24_s10  ;;  %s45_s12 = int_to_ptr.vmem [resolvable:$true] %s44_s12 }
  0x27   :  { %s5435_s15 = scalar_lea.hbm %s6523_s0, 128 }
  0x28   :  { %p5436_p2 = scmp.ne.s32.totalorder %s6523_s0, %s5435_s15  ;;  %p5439_p3 = scmp.lt.u32.totalorder %s5435_s15, %s6523_s0 }
  0x2a   :  { %p5441_p4 = pnand %p5439_p3, %p5436_p2 }
  0x2c   :  { %5444 = shalt.err (!%p5441_p4)
}
  0x2d   :  { %s5445_s4 = scalar_lea.vmem %s25_s10, 128  ;;  %p5450_p6 = scmp.lt.s32.totalorder %s25_s10, %s25_s10 }
  0x2e   :  { %p5446_p5 = scmp.ne.s32.totalorder %s25_s10, %s5445_s4  ;;  %p5451_p7 = scmp.lt.s32.totalorder %s5445_s4, %s5445_s4 }
  0x30   :  { %p5452_p8 = por %p5451_p7, %p5450_p6 }
  0x32   :  { %p5453_p9 = pnand %p5452_p8, %p5446_p5 }
  0x34   :  { %5456 = shalt.err (!%p5453_p9)
}
  0x35   :  { %27 = dma.hbm_to_vmem [thread:$0]  %s6523_s0, 128, %s25_s10, [#allocation3]  }
  0x36   :  { %s5457_s23 = scalar_lea.hbm %s6525_s2, 32 }
  0x37   :  { %p5458_p10 = scmp.ne.s32.totalorder %s6525_s2, %s5457_s23  ;;  %p5461_p11 = scmp.lt.u32.totalorder %s5457_s23, %s6525_s2 }
  0x39   :  { %p5463_p12 = pnand %p5461_p11, %p5458_p10 }
  0x3b   :  { %5466 = shalt.err (!%p5463_p12)
}
  0x3c   :  { %s5467_s28 = scalar_lea.vmem %s45_s12, 32  ;;  %p5472_p0 = scmp.lt.s32.totalorder %s45_s12, %s45_s12 }
  0x3d   :  { %p5468_p13 = scmp.ne.s32.totalorder %s45_s12, %s5467_s28  ;;  %p5473_p1 = scmp.lt.s32.totalorder %s5467_s28, %s5467_s28 }
  0x3f   :  { %p5474_p2 = por %p5473_p1, %p5472_p0 }
  0x41   :  { %p5475_p3 = pnand %p5474_p2, %p5468_p13 }
  0x43   :  { %5478 = shalt.err (!%p5475_p3)
}
  0x44   :  { %47 = dma.hbm_to_vmem [thread:$0]  %s6525_s2, 32, %s45_s12, [#allocation6]  }
  0x45   :  { %s5561_s9 = smov [#allocation10]   ;;  %s5479_s14 = scalar_lea.hbm %s6528_s5, 512 }
  0x46   :  { %s67_s10 = sshll.u32 %s5561_s9, 4  ;;  %p5480_p4 = scmp.ne.s32.totalorder %s6528_s5, %s5479_s14  ;;  %s68_s10 = int_to_ptr.vmem [resolvable:$true] %s67_s10 }
  0x47   :  { %p5483_p5 = scmp.lt.u32.totalorder %s5479_s14, %s6528_s5 }
  0x49   :  { %p5485_p6 = pnand %p5483_p5, %p5480_p4 }
  0x4b   :  { %5488 = shalt.err (!%p5485_p6)
}
  0x4c   :  { %s5489_s19 = scalar_lea.vmem %s68_s10, 512  ;;  %p5494_p8 = scmp.lt.s32.totalorder %s68_s10, %s68_s10 }
  0x4d   :  { %p5490_p7 = scmp.ne.s32.totalorder %s68_s10, %s5489_s19  ;;  %p5495_p9 = scmp.lt.s32.totalorder %s5489_s19, %s5489_s19 }
  0x4f   :  { %p5496_p10 = por %p5495_p9, %p5494_p8 }
  0x51   :  { %p5497_p11 = pnand %p5496_p10, %p5490_p7 }
  0x53   :  { %5500 = shalt.err (!%p5497_p11)
}
  0x54   :  { %s5562_s2 = smov 256   ;;  %s5563_s12 = smov 16  }
  0x55   :  { %73 = dma.hbm_to_vmem [thread:$0]  %s6528_s5, 512, %s68_s10, [#allocation9], %s5562_s2, %s5562_s2, %s5563_s12  }
  0x56   :  { %s5564_s20 = smov [#allocation11]   ;;  %s5501_s24 = scalar_lea.hbm %s6529_s6, 2560 }
  0x57   :  { %s79_s21 = sshll.u32 %s5564_s20, 4  ;;  %p5502_p12 = scmp.ne.s32.totalorder %s6529_s6, %s5501_s24  ;;  %s80_s21 = int_to_ptr.vmem [resolvable:$true] %s79_s21 }
  0x58   :  { %p5505_p13 = scmp.lt.u32.totalorder %s5501_s24, %s6529_s6 }
  0x5a   :  { %p5507_p0 = pnand %p5505_p13, %p5502_p12 }
  0x5c   :  { %5510 = shalt.err (!%p5507_p0)
}
  0x5d   :  { %s5511_s0 = scalar_lea.vmem %s80_s21, 2560  ;;  %p5516_p2 = scmp.lt.s32.totalorder %s80_s21, %s80_s21 }
  0x5e   :  { %p5512_p1 = scmp.ne.s32.totalorder %s80_s21, %s5511_s0  ;;  %p5517_p3 = scmp.lt.s32.totalorder %s5511_s0, %s5511_s0 }
  0x60   :  { %p5518_p4 = por %p5517_p3, %p5516_p2 }
  0x62   :  { %p5519_p5 = pnand %p5518_p4, %p5512_p1 }
  0x64   :  { %5522 = shalt.err (!%p5519_p5)
}
  0x65   :  { %s5565_s5 = smov 640   ;;  %s5566_s29 = smov 40  }
  0x66   :  { %85 = dma.hbm_to_vmem [thread:$0]  %s6529_s6, 2560, %s80_s21, [#allocation12], %s5565_s5, %s5565_s5, %s5566_s29  }
  0x67   :  { %5545 = dma.done.wait [#allocation3], 128  }
  0x68   :  { %5546 = vsyncadd [#allocation3], 4294967168 }
  0x69   :  { %5547 = dma.done.wait [#allocation6], 160  }
  0x6a   :  { %5548 = vsyncadd [#allocation6], 4294967136 }
  0x6b   :  { %5549 = dma.done.wait [#allocation9], 768  }
  0x6c   :  { %5550 = vsyncadd [#allocation9], 4294966528 }
  0x6d   :  { %5551 = dma.done.wait [#allocation12], 2560  }
  0x6e   :  { %5552 = vsyncadd [#allocation12], 4294964736  ;;  %v5567_v0 = vmov 0.0|0.0   ;;  %vm5568_vm0 = vmmov 0   ;;  %v5569_v1 = vmov 0.0   ;;  %v106_v2 = vld [vmem:[#allocation10] sm:$0xff]  ;;  %v129_v28 = vlaneseq }
  0x6f   :  { %4786 = vmatprep.subr.bf16.mxu1 %v5567_v0  ;;  %4434 = vmatprep.mubr.msk.f32.mxu1 %vm5568_vm0, %v5569_v1  ;;  %4170 = vst [vmem:[#allocation13] sm:$0xff] %v5569_v1  ;;  %v107_v3 = vld [vmem:[#allocation10 + $0x10] sm:$0xff]  ;;  %v116_v5 = vld [vmem:[#allocation11 + $0x58] sm:$0xff]  ;;  %v114_v10 = vld [vmem:[#allocation11 + $0x8] sm:$0xff]  ;;  %vm156_vm1 = vcmask 130048   ;;  %s5570_s6 = smov 96  }
  0x70   :  { %4795 = vmatprep.subr.bf16.mxu0 %v5567_v0  ;;  %4456 = vmatprep.mubr.msk.f32.mxu0 %vm5568_vm0, %v5569_v1  ;;  %v4787_v4 = vpack.c.bf16 %v107_v3, %v106_v2  ;;  %v111_v6 = vld [vmem:[#allocation11 + $0x50] sm:$0xff]  ;;  %v149_v7 = vld [vmem:[#allocation2] sm:$0xff]  ;;  %v110_v12 = vld [vmem:[#allocation11 + $0x28] sm:$0xff]  ;;  %s5571_s11 = smov 64   ;;  %v130_v29 = vshrl.u32 %v129_v28, 7  ;;  %v5095_v36 = vpack.i.bf16 %v107_v3, %v106_v2  ;;  %vm448_vm2 = vcmask 785408  }
  0x71   :  { %v112_v8 = vld [vmem:[#allocation11 + $0x78] sm:$0xff]  ;;  %v5065_v9 = vpack.i.bf16 %v116_v5, %v111_v6  ;;  %v109_v11 = vld [vmem:[#allocation11] sm:$0xff]  ;;  %v115_v17 = vld [vmem:[#allocation11 + $0x30] sm:$0xff]  ;;  %vm341_vm3 = vcmask 523264   ;;  %vm234_vm4 = vcmask 261120   ;;  %s5572_s20 = smov 32  }
  0x72   :  { %4788 = vmatpush3.bf16.msra.mxu1 %v4787_v4  ;;  %v117_v13 = vld [vmem:[#allocation11 + $0x80] sm:$0xff]  ;;  %v5055_v14 = vpack.i.bf16 %v114_v10, %v109_v11  ;;  %v4790_v15 = vpack.c.bf16 %v110_v12, %v109_v11  ;;  %v119_v18 = vld [vmem:[#allocation11 + $0x38] sm:$0xff]  ;;  %v5060_v19 = vpack.i.bf16 %v115_v17, %v110_v12  ;;  %v4793_v20 = vpack.c.bf16 %v112_v8, %v111_v6  ;;  %v118_v21 = vld [vmem:[#allocation11 + $0x10] sm:$0xff]  ;;  %s5573_s21 = smov 112   ;;  %s5574_s22 = smov 48  }
  0x73   :  { %5066 = vrot.lane.b32.xlu1 %v5065_v9, %s5570_s6  ;;  %v5070_v16 = vpack.i.bf16 %v117_v13, %v112_v8  ;;  %4789 = vmatprep.subr.bf16.mxu1 %v5567_v0  ;;  %v5080_v22 = vpack.i.bf16 %v119_v18, %v115_v17  ;;  %v121_v23 = vld [vmem:[#allocation11 + $0x88] sm:$0xff]  ;;  %v5075_v24 = vpack.i.bf16 %v118_v21, %v114_v10  ;;  %v120_v25 = vld [vmem:[#allocation11 + $0x60] sm:$0xff]  ;;  %v127_v30 = vld [vmem:[%s6530_s7] sm:$0x3]  ;;  %v5727_v31 = vsub.s32 0, %v130_v29  ;;  %s5575_s1 = smov 80  }
  0x74   :  { %5056 = vrot.lane.b32.xlu0 %v5055_v14, %s5570_s6  ;;  %v5090_v26 = vpack.i.bf16 %v121_v23, %v117_v13  ;;  %v5085_v27 = vpack.i.bf16 %v120_v25, %v116_v5  ;;  %v5729_v32 = vsub.s32 1, %v130_v29  ;;  %v5738_v35 = vld [vmem:[%s6530_s7 + $0x2] ss:$0 sm:$0xff]  ;;  %v5100_v37 = vpack.i.bf16 %v119_v18, %v118_v21  ;;  %v4209_v18 = vld [vmem:[%s6530_s7] ss:$0 sm:$0xff]  ;;  %v5803_v28 = vld [vmem:[#allocation11 + $0x90] sm:$0xff] }
  0x75   :  { %4435 = vmatmul.mubr.msk.f32.vlgmr.msra.gmra.mrb[0].mxu1 %vm156_vm1, %v149_v7  ;;  %v132_v33 = vrot.slane %v127_v30, %v5727_v31  ;;  %v122_v38 = vld [vmem:[%s6530_s7 + $0x1] sm:$0x3]  ;;  %v5105_v40 = vpack.i.bf16 %v121_v23, %v120_v25  ;;  %v5784_v23 = vld [vmem:[#allocation7] sm:$0x3]  ;;  %vm749_vm5 = vcmask 123904   ;;  %vm2733_vm6 = vcmask 1041408  }
  0x76   :  { %4791 = vmatpush3.bf16.msra.mxu1 %v4790_v15  ;;  %4445 = vmatprep.mubr.msk.f32.mxu1 %vm5568_vm0, %v5569_v1  ;;  %v136_v34 = vrot.slane %v127_v30, %v5729_v32  ;;  %v312_v41 = vrot.slane %v122_v38, %v5727_v31  ;;  %v316_v48 = vrot.slane %v122_v38, %v5729_v32  ;;  %v5793_v25 = vld [vmem:[#allocation11 + $0x40] sm:$0xff]  ;;  %vm3378_vm7 = vcmask 1043456   ;;  %s5576_s13 = smov 120   ;;  %s5577_s2 = smov [#allocation13]  }
  0x77   :  { %5071 = vrot.lane.b32.xlu1 %v5070_v16, %s5570_s6  ;;  %4792 = vmatprep.subr.bf16.mxu1 %v5567_v0  ;;  %vm3811_vm8 = vcmask 1045504   ;;  %vm4179_vm11 = vcmask 7168   ;;  %vm4181_vm12 = vcmask 15360   ;;  %vm4171_vm13 = vcmask 58368   ;;  %s4195_s4 = sshll.u32 %s5577_s2, 4  ;;  %s4196_s4 = int_to_ptr.vmem [resolvable:$true] %s4195_s4 }
  0x78   :  { %5061 = vrot.lane.b32.xlu0 %v5060_v19, %s5570_s6  ;;  %vm4177_vm14 = vcmask 123968   ;;  %vm4187_vm15 = vcmask 147584   ;;  %s5523_s30 = scalar_lea.vmem %s4196_s4, 128  ;;  %p5528_p7 = scmp.lt.s32.totalorder %s4196_s4, %s4196_s4 }
  0x79   :  { %p5524_p6 = scmp.ne.s32.totalorder %s4196_s4, %s5523_s30  ;;  %p5529_p8 = scmp.lt.s32.totalorder %s5523_s30, %s5523_s30 }
  0x7a   :  { %4794 = vmatpush3.bf16.msra.mxu1 %v4793_v20 }
  0x7b   :  { %5081 = vrot.lane.b32.xlu1 %v5080_v22, %s5571_s11  ;;  %p5530_p9 = por %p5529_p8, %p5528_p7 }
  0x7c   :  { %5076 = vrot.lane.b32.xlu0 %v5075_v24, %s5571_s11  ;;  %v5791_v24 = vld [vmem:[#allocation11 + $0x18] sm:$0xff] }
  0x7d   :  { %p5531_p10 = pnand %p5530_p9, %p5524_p6 }
  0x7f   :  { %5091 = vrot.lane.b32.xlu1 %v5090_v26, %s5571_s11  ;;  %v5797_v26 = vpack.c.bf16 %v5793_v25, %v5791_v24 }
  0x80   :  { %5086 = vrot.lane.b32.xlu0 %v5085_v27, %s5571_s11  ;;  %v5801_v27 = vld [vmem:[#allocation11 + $0x68] sm:$0xff] }
  0x81   :  { %v5807_v29 = vpack.c.bf16 %v5803_v28, %v5801_v27 }
  0x83   :  { %463 = vrot.lane.b32.xlu1 %v136_v34, %s5570_s6 }
  0x84   :  { %461 = vrot.lane.b32.xlu0 %v132_v33, %s5570_s6 }
  0x87   :  { %545 = vrot.lane.b32.xlu1 %v5738_v35, %s5571_s11 }
  0x88   :  { %231 = vrot.lane.b32.xlu0 %v5738_v35, %s5570_s6 }
  0x8b   :  { %5101 = vrot.lane.b32.xlu1 %v5100_v37, %s5570_s6 }
  0x8c   :  { %5096 = vrot.lane.b32.xlu0 %v5095_v36, %s5570_s6 }
  0x8f   :  { %350 = vrot.lane.b32.xlu1 %v312_v41, %s5571_s11 }
  0x90   :  { %5106 = vrot.lane.b32.xlu0 %v5105_v40, %s5570_s6 }
  0x94   :  { %352 = vrot.lane.b32.xlu0 %v316_v48, %s5571_s11 }
  0xe5   :  { %v5067_v39 = vpop.permute.xlu1 %5066 }
  0xe6   :  { %v5069_v42 = vunpack.i.h.bf16 %v5067_v39  ;;  %v5068_v43 = vunpack.i.l.bf16 %v5067_v39  ;;  %v5057_v44 = vpop.permute.xlu0 %5056 }
  0xe7   :  { %v5059_v45 = vunpack.i.h.bf16 %v5057_v44  ;;  %v5058_v46 = vunpack.i.l.bf16 %v5057_v44 }
  0xe8   :  { %v451_v49 = vsel %vm448_vm2, %v5068_v43, %v5069_v42 }
  0xe9   :  { %v5072_v47 = vpop.permute.xlu1 %5071  ;;  %v449_v50 = vsel %vm448_vm2, %v5058_v46, %v5059_v45 }
  0xea   :  { %v5074_v51 = vunpack.i.h.bf16 %v5072_v47  ;;  %v5073_v52 = vunpack.i.l.bf16 %v5072_v47  ;;  %v5062_v53 = vpop.permute.xlu0 %5061 }
  0xeb   :  { %v5064_v56 = vunpack.i.h.bf16 %v5062_v53  ;;  %v5063_v57 = vunpack.i.l.bf16 %v5062_v53 }
  0xec   :  { %v452_v54 = vsel %vm448_vm2, %v5073_v52, %v5074_v51  ;;  %v5756_v55 = vpack.c.bf16 %v5074_v51, %v5069_v42 }
  0xed   :  { %v5758_v58 = vpack.c.bf16 %v452_v54, %v451_v49  ;;  %v5082_v59 = vpop.permute.xlu1 %5081  ;;  %v450_v60 = vsel %vm448_vm2, %v5063_v57, %v5064_v56  ;;  %v5762_v61 = vpack.c.bf16 %v5064_v56, %v5059_v45 }
  0xee   :  { %v5084_v62 = vunpack.i.h.bf16 %v5082_v59  ;;  %v5083_v63 = vunpack.i.l.bf16 %v5082_v59  ;;  %v5764_v2 = vpack.c.bf16 %v450_v60, %v449_v50  ;;  %v5077_v3 = vpop.permute.xlu0 %5076 }
  0xef   :  { %v5079_v4 = vunpack.i.h.bf16 %v5077_v3  ;;  %v5078_v5 = vunpack.i.l.bf16 %v5077_v3  ;;  %4802 = vmatprep.subr.bf16.mxu1 %v5762_v61 }
  0xf0   :  { %v343_v6 = vsel %vm341_vm3, %v5083_v63, %v5084_v62 }
  0xf1   :  { %v5092_v7 = vpop.permute.xlu1 %5091  ;;  %v342_v10 = vsel %vm341_vm3, %v5078_v5, %v5079_v4 }
  0xf2   :  { %v5094_v8 = vunpack.i.h.bf16 %v5092_v7  ;;  %v5093_v9 = vunpack.i.l.bf16 %v5092_v7  ;;  %v5087_v11 = vpop.permute.xlu0 %5086  ;;  %v4796_v12 = vpack.c.bf16 %v343_v6, %v342_v10 }
  0xf3   :  { %v5089_v13 = vunpack.i.h.bf16 %v5087_v11  ;;  %v5088_v14 = vunpack.i.l.bf16 %v5087_v11 }
  0xf4   :  { %v345_v15 = vsel %vm341_vm3, %v5093_v9, %v5094_v8  ;;  %4797 = vmatpush3.bf16.msra.mxu0 %v4796_v12  ;;  %v5844_v8 = vld [vmem:[#allocation5] sm:$0xff] }
  0xf5   :  { %4798 = vmatprep.subr.bf16.mxu0 %v5567_v0  ;;  %v344_v16 = vsel %vm341_vm3, %v5088_v14, %v5089_v13  ;;  %v5813_v39 = vpop.permute.xlu1 %463 }
  0xf6   :  { %v4799_v17 = vpack.c.bf16 %v345_v15, %v344_v16  ;;  %v462_v30 = vpop.permute.xlu0 %461 }
  0xf7   :  { %v5817_v43 = vsel %vm448_vm2, %v462_v30, %v5813_v39 }
  0xf8   :  { %4800 = vmatpush3.bf16.msra.mxu0 %v4799_v17  ;;  %v5865_v17 = vld [vmem:[%s6530_s7 + $0x3] ss:$0 sm:$0xff] }
  0xf9   :  { %4809 = vmatprep.subr.bf16.mxu0 %v5567_v0  ;;  %v5837_v51 = vpop.permute.xlu1 %545 }
  0xfa   :  { %v232_v33 = vpop.permute.xlu0 %231 }
  0xfd   :  { %v5102_v3 = vpop.permute.xlu1 %5101 }
  0xfe   :  { %v5097_v40 = vpop.permute.xlu0 %5096  ;;  %v5104_v6 = vunpack.i.h.bf16 %v5102_v3  ;;  %v5103_v7 = vunpack.i.l.bf16 %v5102_v3 }
  0xff   :  { %v5099_v41 = vunpack.i.h.bf16 %v5097_v40  ;;  %v5098_v42 = vunpack.i.l.bf16 %v5097_v40 }
 0x100   :  { %v5850_v12 = vpack.c.bf16 %v5104_v6, %v5103_v7 }
 0x101   :  { %v5830_v49 = vpack.c.bf16 %v5099_v41, %v5098_v42 }
 0x102   :  { %v5107_v10 = vpop.permute.xlu0 %5106 }
 0x103   :  { %v5109_v13 = vunpack.i.h.bf16 %v5107_v10  ;;  %v5108_v14 = vunpack.i.l.bf16 %v5107_v10 }
 0x105   :  { %v5854_v16 = vpack.c.bf16 %v5109_v13, %v5108_v14 }
 0x106   :  { %v353_v30 = vpop.permute.xlu0 %352 }
 0x148   :  { %v226_v19 = vpop.f32.mrb[0].mxu1 }
 0x149   :  { %v227_v20 = vadd.f32 %v4209_v18, %v226_v19  ;;  %v4436_v21 = vpop.f32.mrb[1].mxu1 }
 0x14b   :  { %v230_v22 = vmax.f32 %v227_v20, 0.0 }
 0x14d   :  { %4446 = vmatmul.mubr.msk.f32.vlgmr.msra.gmra.mrb[2].mxu1 %vm234_vm4, %v230_v22  ;;  %4457 = vmatmul.mubr.msk.f32.vlgmr.msra.gmra.mrb[0].mxu0 %vm234_vm4, %v230_v22  ;;  %v351_v22 = vpop.permute.xlu1 %350 }
 0x14e   :  { %4804 = vmatpush1.bf16.msra.mxu1 %v5764_v2  ;;  %535 = vmatprep.mubr.f32.mxu1 %v5569_v1 }
 0x14f   :  { %4806 = vmatprep.subr.bf16.mxu1 %v5756_v55  ;;  %4467 = vmatprep.mubr.msk.f32.mxu0 %vm5568_vm0, %v5569_v1 }
 0x150   :  { %4811 = vmatpush3.bf16.msra.mxu0 %v5797_v26 }
 0x151   :  { %4812 = vmatprep.subr.bf16.mxu0 %v5567_v0 }
 0x152   :  { %4808 = vmatpush1.bf16.msra.mxu1 %v5758_v58 }
 0x153   :  { %4815 = vmatprep.subr.bf16.mxu1 %v5567_v0 }
 0x154   :  { %4814 = vmatpush3.bf16.msra.mxu0 %v5807_v29 }
 0x155   :  { %4213 = vmatmul.mubr.msk.f32.vlgmr.msra.gmra.mrb[4].mxu1 %vm234_vm4, %v5784_v23  ;;  %4821 = vmatprep.subr.bf16.mxu0 %v5567_v0 }
 0x156   :  { %4478 = vmatprep.mubr.msk.f32.mxu1 %vm5568_vm0, %v5569_v1 }
 0x220   :  { %v304_v34 = vpop.f32.mrb[2].mxu1  ;;  %v5811_v36 = vpop.f32.mrb[0].mxu0 }
 0x221   :  { %v4447_v37 = vpop.f32.mrb[3].mxu1  ;;  %v4458_v38 = vpop.f32.mrb[1].mxu0  ;;  %v5819_v45 = vadd.f32 %v304_v34, %v232_v33  ;;  %v354_v33 = vsel %vm341_vm3, %v351_v22, %v353_v30 }
 0x222   :  { %v5877_v34 = vadd.f32 %v5811_v36, %v354_v33  ;;  %v5887_v36 = vpack.i.bf16 %v5803_v28, %v5801_v27 }
 0x228   :  { %v537_v44 = vpop.f32.mrb[4].mxu1 }
 0x229   :  { %v5822_v46 = vadd.f32 %v537_v44, %v5817_v43  ;;  %v5824_v47 = vpop.f32.mrb[5].mxu1 }
 0x22b   :  { %v542_v48 = vadd.f32 %v5822_v46, %v5819_v45  ;;  %934 = vrot.lane.b32.xlu1 %v5822_v46, %s5571_s11 }
 0x22d   :  { %v543_v50 = vmax.f32 %v542_v48, 0.0 }
 0x22f   :  { %4468 = vmatmul.mubr.msk.f32.vlgmr.msra.gmra.mrb[2].mxu0 %vm234_vm4, %v543_v50 }
 0x230   :  { %4823 = vmatpush3.bf16.msra.mxu0 %v5830_v49  ;;  %4485 = vmatprep.mubr.msk.f32.mxu0 %vm5568_vm0, %v5569_v1 }
 0x231   :  { %4824 = vmatprep.subr.bf16.mxu0 %v5567_v0 }
 0x29d   :  { %v935_v41 = vpop.permute.xlu1 %934 }
 0x302   :  { %v617_v52 = vpop.f32.mrb[2].mxu0 }
 0x303   :  { %v5840_v53 = vadd.f32 %v617_v52, %v5837_v51  ;;  %v4469_v54 = vpop.f32.mrb[3].mxu0 }
 0x304   :  { %v540_v54 = vadd.f32 %v5824_v47, %v5813_v39 }
 0x305   :  { %v716_v56 = vand.u32 2147483647, %v5840_v53  ;;  %v715_v4 = vmax.f32 %v5840_v53, 0.0 }
 0x307   :  { %v717_v57 = vsub.f32 0.0, %v716_v56 }
 0x309   :  { %v718_v59 = vmul.f32 1.442695, %v717_v57 }
 0x30b   :  { %5250 = vpow2.f32 %v718_v59 }
 0x315   :  { %v5251_v60 = vpop.eup %5250 }
 0x316   :  { %v720_v62 = vadd.f32 1.0, %v5251_v60 }
 0x318   :  { %5252 = vlog2.f32 %v720_v62  ;;  %v5894_v62 = vpack.i.bf16 %v5793_v25, %v5791_v24 }
 0x322   :  { %v5253_v63 = vpop.eup %5252 }
 0x323   :  { %v722_v5 = vmul.f32 0.6931472, %v5253_v63 }
 0x325   :  { %v5846_v9 = vadd.f32 %v722_v5, %v715_v4 }
 0x327   :  { %v763_v11 = vmul.f32 %v5846_v9, %v5844_v8 }
 0x329   :  { %v764_v15 = vadd.f32 %v763_v11, %v5840_v53 }
 0x32b   :  { %4486 = vmatmul.mubr.msk.f32.vlgmr.msra.gmra.mrb[4].mxu0 %vm156_vm1, %v764_v15 }
 0x32c   :  { %4826 = vmatpush3.bf16.msra.mxu0 %v5850_v12  ;;  %4496 = vmatprep.mubr.msk.f32.mxu0 %vm5568_vm0, %v5569_v1 }
 0x32d   :  { %4827 = vmatprep.subr.bf16.mxu0 %v5567_v0 }
 0x330   :  { %4829 = vmatpush3.bf16.msra.mxu0 %v5854_v16 }
 0x331   :  { %4838 = vmatprep.subr.bf16.mxu0 %v5567_v0 }
 0x3fe   :  { %v842_v18 = vpop.f32.mrb[4].mxu0 }
 0x3ff   :  { %v843_v19 = vadd.f32 %v5865_v17, %v842_v18  ;;  %v4487_v20 = vpop.f32.mrb[5].mxu0 }
 0x401   :  { %v846_v21 = vmax.f32 %v843_v19, 0.0 }
 0x403   :  { %4497 = vmatmul.mubr.msk.f32.vlgmr.msra.gmra.mrb[6].mxu0 %vm234_vm4, %v846_v21 }
 0x404   :  { %4840 = vmatpush3.bf16.msra.mxu0 %v5797_v26  ;;  %4507 = vmatprep.mubr.msk.f32.mxu0 %vm5568_vm0, %v5569_v1 }
 0x405   :  { %4841 = vmatprep.subr.bf16.mxu0 %v5567_v0 }
 0x408   :  { %4843 = vmatpush3.bf16.msra.mxu0 %v5807_v29 }
 0x409   :  { %4850 = vmatprep.subr.bf16.mxu0 %v5567_v0 }
 0x4d6   :  { %v928_v37 = vpop.f32.mrb[6].mxu0 }
 0x4d7   :  { %v932_v38 = vadd.f32 %v928_v37, %v5877_v34  ;;  %v4498_v40 = vpop.f32.mrb[7].mxu0 }
 0x4d9   :  { %v937_v42 = vadd.f32 %v935_v41, %v932_v38 }
 0x4db   :  { %v938_v44 = vsub.f32 0.0, %v937_v42 }
 0x4dd   :  { %v939_v48 = vmul.f32 1.442695, %v938_v44 }
 0x4df   :  { %5254 = vpow2.f32 %v939_v48 }
 0x4e9   :  { %v5255_v50 = vpop.eup %5254 }
 0x4ea   :  { %v941_v52 = vadd.f32 1.0, %v5255_v50 }
 0x4ec   :  { %5256 = vrcp.f32 %v941_v52 }
 0x4f6   :  { %v5257_v56 = vpop.eup %5256 }
 0x4f7   :  { %v944_v57 = vmul.f32 %v5257_v56, %v540_v54  ;;  %v951_v3 = vsub.f32 1.0, %v5257_v56 }
 0x4f9   :  { %946 = vrot.lane.b32.xlu0 %v944_v57, %s5571_s11 }
 0x4fd   :  { %957 = vrot.lane.b32.xlu0 %v5784_v23, %s5572_s20  ;;  %v544_v23 = vmax.f32 %v5822_v46, 0.0 }
 0x501   :  { %5116 = vrot.lane.b32.xlu0 %v5887_v36, %s5573_s21 }
 0x56b   :  { %v947_v59 = vpop.permute.xlu0 %946 }
 0x56c   :  { %v949_v60 = vadd.f32 %v947_v59, %v932_v38  ;;  %v1039_v38 = vrot.slane %v5819_v45, 2 }
 0x56e   :  { %5258 = vtanh.f32 %v949_v60 }
 0x56f   :  { %v958_v63 = vpop.permute.xlu0 %957 }
 0x570   :  { %v960_v5 = vmul.f32 %v5257_v56, %v958_v63 }
 0x573   :  { %v5117_v7 = vpop.permute.xlu0 %5116 }
 0x574   :  { %v5119_v15 = vunpack.i.h.bf16 %v5117_v7  ;;  %v5118_v18 = vunpack.i.l.bf16 %v5117_v7 }
 0x576   :  { %v5906_v46 = vpack.c.bf16 %v5119_v15, %v5118_v18 }
 0x578   :  { %v5259_v47 = vpop.eup %5258 }
 0x579   :  { %953 = vrot.lane.b32.xlu1 %v5259_v47, %s5570_s6 }
 0x57d   :  { %5111 = vrot.lane.b32.xlu1 %v5894_v62, %s5573_s21 }
 0x581   :  { %622 = vrot.lane.b32.xlu1 %v544_v23, %s5570_s6 }
 0x5eb   :  { %v954_v4 = vpop.permute.xlu1 %953 }
 0x5ec   :  { %v956_v6 = vmul.f32 %v954_v4, %v951_v3 }
 0x5ee   :  { %v5900_v10 = vadd.f32 %v960_v5, %v956_v6 }
 0x5ef   :  { %v5112_v11 = vpop.permute.xlu1 %5111 }
 0x5f0   :  { %v5114_v13 = vunpack.i.h.bf16 %v5112_v11  ;;  %v5113_v14 = vunpack.i.l.bf16 %v5112_v11  ;;  %963 = vrot.lane.b32.xlu0 %v5900_v10, %s5570_s6 }
 0x5f2   :  { %v5904_v19 = vpack.c.bf16 %v5114_v13, %v5113_v14 }
 0x5f3   :  { %v623_v20 = vpop.permute.xlu1 %622 }
 0x5f4   :  { %4817 = vmatpush3.bf16.msra.mxu1 %v5904_v19 }
 0x5f5   :  { %4818 = vmatprep.subr.bf16.mxu1 %v5567_v0 }
 0x5f8   :  { %4820 = vmatpush3.bf16.msra.mxu1 %v5906_v46 }
 0x5f9   :  { %4831 = vmatprep.subr.bf16.mxu1 %v5762_v61 }
 0x5fb   :  { %4479 = vmatmul.mubr.msk.f32.vlgmr.msra.gmra.mrb[6].mxu1 %vm234_vm4, %v623_v20 }
 0x5fc   :  { %4833 = vmatpush1.bf16.msra.mxu1 %v5764_v2  ;;  %1031 = vmatprep.mubr.f32.mxu1 %v5569_v1 }
 0x5fd   :  { %4835 = vmatprep.subr.bf16.mxu1 %v5756_v55 }
 0x600   :  { %4837 = vmatpush1.bf16.msra.mxu1 %v5758_v58 }
 0x601   :  { %4844 = vmatprep.subr.bf16.mxu1 %v5567_v0 }
 0x662   :  { %v964_v21 = vpop.permute.xlu0 %963 }
 0x663   :  { %4219 = vmatmul.mubr.msk.f32.vlgmr.msra.gmra.mrb[8].mxu1 %vm234_vm4, %v964_v21 }
 0x664   :  { %4846 = vmatpush3.bf16.msra.mxu1 %v5904_v19  ;;  %4518 = vmatprep.mubr.msk.f32.mxu1 %vm5568_vm0, %v5569_v1 }
 0x665   :  { %4847 = vmatprep.subr.bf16.mxu1 %v5567_v0 }
 0x668   :  { %4849 = vmatpush3.bf16.msra.mxu1 %v5906_v46 }
 0x669   :  { %4853 = vmatprep.subr.bf16.mxu1 %v5567_v0 }
 0x6ce   :  { %v5925_v22 = vpop.f32.mrb[6].mxu1 }
 0x6cf   :  { %v4480_v30 = vpop.f32.mrb[7].mxu1 }
 0x736   :  { %v1033_v33 = vpop.f32.mrb[8].mxu1 }
 0x737   :  { %v1034_v37 = vadd.f32 %v1033_v33, %v5817_v43  ;;  %v5929_v40 = vpop.f32.mrb[9].mxu1 }
 0x739   :  { %v1041_v41 = vadd.f32 %v1039_v38, %v1034_v37  ;;  %v1400_v42 = vrot.slane %v1034_v37, 6  ;;  %v1043_v44 = vmax.f32 %v1034_v37, 0.0 }
 0x73b   :  { %v1042_v48 = vmax.f32 %v1041_v41, 0.0  ;;  %1401 = vrot.lane.b32.xlu0 %v1400_v42, %s5571_s11  ;;  %1118 = vrot.lane.b32.xlu1 %v1043_v44, %s5570_s6 }
 0x73d   :  { %4508 = vmatmul.mubr.msk.f32.vlgmr.msra.gmra.mrb[8].mxu0 %vm234_vm4, %v1042_v48 }
 0x73e   :  { %4852 = vmatpush3.bf16.msra.mxu0 %v5830_v49  ;;  %4525 = vmatprep.mubr.msk.f32.mxu0 %vm5568_vm0, %v5569_v1 }
 0x73f   :  { %4860 = vmatprep.subr.bf16.mxu0 %v5762_v61 }
 0x7ad   :  { %v1119_v50 = vpop.permute.xlu1 %1118  ;;  %v1402_v44 = vpop.permute.xlu0 %1401 }
 0x7ae   :  { %4519 = vmatmul.mubr.msk.f32.vlgmr.msra.gmra.mrb[10].mxu1 %vm234_vm4, %v1119_v50 }
 0x7af   :  { %4855 = vmatpush3.bf16.msra.mxu1 %v5850_v12  ;;  %4536 = vmatprep.mubr.msk.f32.mxu1 %vm5568_vm0, %v5569_v1 }
 0x7b0   :  { %4856 = vmatprep.subr.bf16.mxu1 %v5567_v0 }
 0x7b3   :  { %4858 = vmatpush3.bf16.msra.mxu1 %v5854_v16 }
 0x7b4   :  { %4867 = vmatprep.subr.bf16.mxu1 %v5567_v0 }
 0x810   :  { %v1113_v52 = vpop.f32.mrb[8].mxu0 }
 0x811   :  { %v5946_v54 = vadd.f32 %v1113_v52, %v5837_v51  ;;  %v4509_v56 = vpop.f32.mrb[9].mxu0 }
 0x813   :  { %v1193_v57 = vand.u32 2147483647, %v5946_v54  ;;  %v1192_v3 = vmax.f32 %v5946_v54, 0.0  ;;  %v1244_v11 = vrot.slane %v5946_v54, 6 }
 0x815   :  { %v1194_v59 = vsub.f32 0.0, %v1193_v57 }
 0x817   :  { %v1195_v60 = vmul.f32 1.442695, %v1194_v59  ;;  %v1036_v59 = vadd.f32 %v5929_v40, %v5813_v39 }
 0x819   :  { %5260 = vpow2.f32 %v1195_v60  ;;  %v1427_v60 = vrot.slane %v5900_v10, 6 }
 0x823   :  { %v5261_v47 = vpop.eup %5260 }
 0x824   :  { %v1197_v23 = vadd.f32 1.0, %v5261_v47  ;;  %v1412_v47 = vrot.slane %v1036_v59, 6 }
 0x826   :  { %5262 = vlog2.f32 %v1197_v23 }
 0x830   :  { %v5263_v63 = vpop.eup %5262 }
 0x831   :  { %v1199_v4 = vmul.f32 0.6931472, %v5263_v63 }
 0x833   :  { %v5950_v5 = vadd.f32 %v1199_v4, %v1192_v3 }
 0x835   :  { %v1240_v6 = vrot.slane %v5950_v5, 6 }
 0x837   :  { %v1242_v7 = vmul.f32 %v1240_v6, %v5844_v8 }
 0x839   :  { %v1246_v13 = vadd.f32 %v1244_v11, %v1242_v7 }
 0x83b   :  { %v1248_v14 = vrot.slane %v1246_v13, 2 }
 0x83d   :  { %4526 = vmatmul.mubr.msk.f32.vlgmr.msra.gmra.mrb[10].mxu0 %vm156_vm1, %v1248_v14 }
 0x83e   :  { %4862 = vmatpush1.bf16.msra.mxu0 %v5764_v2  ;;  %1501 = vmatprep.mubr.f32.mxu0 %v5569_v1 }
 0x83f   :  { %4864 = vmatprep.subr.bf16.mxu0 %v5756_v55 }
 0x842   :  { %4866 = vmatpush1.bf16.msra.mxu0 %v5758_v58 }
 0x843   :  { %4873 = vmatprep.subr.bf16.mxu0 %v5567_v0 }
 0x881   :  { %v5961_v15 = vpop.f32.mrb[10].mxu1 }
 0x882   :  { %v4520_v18 = vpop.f32.mrb[11].mxu1 }
 0x910   :  { %v1317_v20 = vpop.f32.mrb[10].mxu0 }
 0x911   :  { %v1318_v21 = vadd.f32 %v5865_v17, %v1317_v20  ;;  %v4527_v30 = vpop.f32.mrb[11].mxu0 }
 0x912   :  { %v1508_v30 = vrot.slane %v5819_v45, 4 }
 0x913   :  { %v1321_v33 = vmax.f32 %v1318_v21, 0.0 }
 0x915   :  { %4537 = vmatmul.mubr.msk.f32.vlgmr.msra.gmra.mrb[12].mxu1 %vm234_vm4, %v1321_v33 }
 0x916   :  { %4869 = vmatpush3.bf16.msra.mxu1 %v5797_v26  ;;  %4547 = vmatprep.mubr.msk.f32.mxu1 %vm5568_vm0, %v5569_v1 }
 0x917   :  { %4870 = vmatprep.subr.bf16.mxu1 %v5567_v0 }
 0x91a   :  { %4872 = vmatpush3.bf16.msra.mxu1 %v5807_v29 }
 0x91b   :  { %4879 = vmatprep.subr.bf16.mxu1 %v5567_v0 }
 0x9e8   :  { %v1391_v37 = vpop.f32.mrb[12].mxu1 }
 0x9e9   :  { %v1396_v38 = vrot.slane %v1391_v37, 6  ;;  %v4538_v41 = vpop.f32.mrb[13].mxu1 }
 0x9eb   :  { %v1398_v42 = vadd.f32 %v1396_v38, %v5877_v34 }
 0x9ed   :  { %v1404_v48 = vadd.f32 %v1402_v44, %v1398_v42 }
 0x9ef   :  { %v1405_v50 = vsub.f32 0.0, %v1404_v48 }
 0x9f1   :  { %v1406_v52 = vmul.f32 1.442695, %v1405_v50 }
 0x9f3   :  { %5264 = vpow2.f32 %v1406_v52 }
 0x9fd   :  { %v5265_v56 = vpop.eup %5264 }
 0x9fe   :  { %v1408_v57 = vadd.f32 1.0, %v5265_v56 }
 0xa00   :  { %5266 = vrcp.f32 %v1408_v57 }
 0xa0a   :  { %v5267_v23 = vpop.eup %5266 }
 0xa0b   :  { %v1414_v63 = vmul.f32 %v5267_v23, %v1412_v47  ;;  %v1429_v3 = vmul.f32 %v5267_v23, %v1427_v60  ;;  %v1421_v11 = vsub.f32 1.0, %v5267_v23 }
 0xa0d   :  { %1416 = vrot.lane.b32.xlu1 %v1414_v63, %s5571_s11 }
 0xa7f   :  { %v1417_v4 = vpop.permute.xlu1 %1416 }
 0xa80   :  { %v1419_v6 = vadd.f32 %v1417_v4, %v1398_v42 }
 0xa82   :  { %5268 = vtanh.f32 %v1419_v6 }
 0xa8c   :  { %v5269_v7 = vpop.eup %5268 }
 0xa8d   :  { %1423 = vrot.lane.b32.xlu0 %v5269_v7, %s5570_s6 }
 0xaff   :  { %v1424_v13 = vpop.permute.xlu0 %1423 }
 0xb00   :  { %v1426_v14 = vmul.f32 %v1424_v13, %v1421_v11 }
 0xb02   :  { %v5977_v18 = vadd.f32 %v1429_v3, %v1426_v14 }
 0xb04   :  { %v1432_v40 = vrot.slane %v5977_v18, 2 }
 0xb06   :  { %1433 = vrot.lane.b32.xlu1 %v1432_v40, %s5570_s6 }
 0xb78   :  { %v1434_v10 = vpop.permute.xlu1 %1433 }
 0xb79   :  { %4225 = vmatmul.mubr.msk.f32.vlgmr.msra.gmra.mrb[12].mxu0 %vm234_vm4, %v1434_v10 }
 0xb7a   :  { %4875 = vmatpush3.bf16.msra.mxu0 %v5904_v19  ;;  %4558 = vmatprep.mubr.msk.f32.mxu0 %vm5568_vm0, %v5569_v1 }
 0xb7b   :  { %4876 = vmatprep.subr.bf16.mxu0 %v5567_v0 }
 0xb7e   :  { %4878 = vmatpush3.bf16.msra.mxu0 %v5906_v46 }
 0xb7f   :  { %4882 = vmatprep.subr.bf16.mxu0 %v5567_v0 }
 0xc4c   :  { %v1503_v20 = vpop.f32.mrb[12].mxu0 }
 0xc4d   :  { %v1504_v21 = vadd.f32 %v1503_v20, %v5817_v43  ;;  %v5990_v33 = vpop.f32.mrb[13].mxu0 }
 0xc4f   :  { %v1510_v37 = vadd.f32 %v1508_v30, %v1504_v21  ;;  %v1869_v38 = vrot.slane %v1504_v21, 4  ;;  %v1512_v41 = vmax.f32 %v1504_v21, 0.0 }
 0xc51   :  { %v1511_v42 = vmax.f32 %v1510_v37, 0.0  ;;  %1870 = vrot.lane.b32.xlu1 %v1869_v38, %s5571_s11  ;;  %1587 = vrot.lane.b32.xlu0 %v1512_v41, %s5570_s6 }
 0xc53   :  { %4548 = vmatmul.mubr.msk.f32.vlgmr.msra.gmra.mrb[14].mxu1 %vm234_vm4, %v1511_v42 }
 0xc54   :  { %4881 = vmatpush3.bf16.msra.mxu1 %v5830_v49  ;;  %4565 = vmatprep.mubr.msk.f32.mxu1 %vm5568_vm0, %v5569_v1 }
 0xc55   :  { %4889 = vmatprep.subr.bf16.mxu1 %v5762_v61 }
 0xcc3   :  { %v1588_v44 = vpop.permute.xlu0 %1587  ;;  %v1871_v38 = vpop.permute.xlu1 %1870 }
 0xcc4   :  { %4559 = vmatmul.mubr.msk.f32.vlgmr.msra.gmra.mrb[14].mxu0 %vm234_vm4, %v1588_v44 }
 0xcc5   :  { %4884 = vmatpush3.bf16.msra.mxu0 %v5850_v12  ;;  %4576 = vmatprep.mubr.msk.f32.mxu0 %vm5568_vm0, %v5569_v1 }
 0xcc6   :  { %4885 = vmatprep.subr.bf16.mxu0 %v5567_v0 }
 0xcc9   :  { %4887 = vmatpush3.bf16.msra.mxu0 %v5854_v16 }
 0xcca   :  { %4896 = vmatprep.subr.bf16.mxu0 %v5567_v0 }
 0xd26   :  { %v1582_v48 = vpop.f32.mrb[14].mxu1 }
 0xd27   :  { %v6007_v50 = vadd.f32 %v1582_v48, %v5837_v51  ;;  %v4549_v52 = vpop.f32.mrb[15].mxu1 }
 0xd28   :  { %v1506_v52 = vadd.f32 %v5990_v33, %v5813_v39 }
 0xd29   :  { %v1662_v61 = vand.u32 2147483647, %v6007_v50  ;;  %v1661_v23 = vmax.f32 %v6007_v50, 0.0  ;;  %v1713_v7 = vrot.slane %v6007_v50, 4 }
 0xd2b   :  { %v1663_v56 = vsub.f32 0.0, %v1662_v61  ;;  %v1881_v61 = vrot.slane %v1506_v52, 4 }
 0xd2d   :  { %v1664_v57 = vmul.f32 1.442695, %v1663_v56 }
 0xd2f   :  { %5270 = vpow2.f32 %v1664_v57 }
 0xd39   :  { %v5271_v59 = vpop.eup %5270 }
 0xd3a   :  { %v1666_v60 = vadd.f32 1.0, %v5271_v59 }
 0xd3c   :  { %5272 = vlog2.f32 %v1666_v60 }
 0xd46   :  { %v5273_v47 = vpop.eup %5272 }
 0xd47   :  { %v1668_v63 = vmul.f32 0.6931472, %v5273_v47 }
 0xd49   :  { %v6011_v3 = vadd.f32 %v1668_v63, %v1661_v23 }
 0xd4b   :  { %v1709_v4 = vrot.slane %v6011_v3, 4 }
 0xd4d   :  { %v1711_v6 = vmul.f32 %v1709_v4, %v5844_v8 }
 0xd4f   :  { %v1715_v11 = vadd.f32 %v1713_v7, %v1711_v6 }
 0xd51   :  { %v1717_v13 = vrot.slane %v1715_v11, 4 }
 0xd53   :  { %4566 = vmatmul.mubr.msk.f32.vlgmr.msra.gmra.mrb[16].mxu1 %vm156_vm1, %v1717_v13 }
 0xd54   :  { %4891 = vmatpush1.bf16.msra.mxu1 %v5764_v2  ;;  %1970 = vmatprep.mubr.f32.mxu1 %v5569_v1 }
 0xd55   :  { %4893 = vmatprep.subr.bf16.mxu1 %v5756_v55 }
 0xd58   :  { %4895 = vmatpush1.bf16.msra.mxu1 %v5758_v58 }
 0xd59   :  { %4902 = vmatprep.subr.bf16.mxu1 %v5567_v0 }
 0xd97   :  { %v6022_v14 = vpop.f32.mrb[14].mxu0 }
 0xd98   :  { %v4560_v40 = vpop.f32.mrb[15].mxu0 }
 0xd99   :  { %v1977_v40 = vrot.slane %v5819_v45, 6 }
 0xe26   :  { %v1786_v10 = vpop.f32.mrb[16].mxu1 }
 0xe27   :  { %v1787_v20 = vadd.f32 %v5865_v17, %v1786_v10  ;;  %v4567_v21 = vpop.f32.mrb[17].mxu1 }
 0xe29   :  { %v1790_v30 = vmax.f32 %v1787_v20, 0.0 }
 0xe2b   :  { %4577 = vmatmul.mubr.msk.f32.vlgmr.msra.gmra.mrb[16].mxu0 %vm234_vm4, %v1790_v30 }
 0xe2c   :  { %4898 = vmatpush3.bf16.msra.mxu0 %v5797_v26  ;;  %4587 = vmatprep.mubr.msk.f32.mxu0 %vm5568_vm0, %v5569_v1 }
 0xe2d   :  { %4899 = vmatprep.subr.bf16.mxu0 %v5567_v0 }
 0xe30   :  { %4901 = vmatpush3.bf16.msra.mxu0 %v5807_v29  ;;  %v1896_v29 = vrot.slane %v5977_v18, 6 }
 0xe31   :  { %4908 = vmatprep.subr.bf16.mxu0 %v5567_v0 }
 0xefe   :  { %v1860_v55 = vpop.f32.mrb[16].mxu0 }
 0xeff   :  { %v1865_v58 = vrot.slane %v1860_v55, 4  ;;  %v4578_v2 = vpop.f32.mrb[17].mxu0 }
 0xf01   :  { %v1867_v37 = vadd.f32 %v1865_v58, %v5877_v34 }
 0xf03   :  { %v1873_v41 = vadd.f32 %v1871_v38, %v1867_v37 }
 0xf05   :  { %v1874_v42 = vsub.f32 0.0, %v1873_v41 }
 0xf07   :  { %v1875_v44 = vmul.f32 1.442695, %v1874_v42 }
 0xf09   :  { %5274 = vpow2.f32 %v1875_v44 }
 0xf13   :  { %v5275_v26 = vpop.eup %5274 }
 0xf14   :  { %v1877_v48 = vadd.f32 1.0, %v5275_v26 }
 0xf16   :  { %5276 = vrcp.f32 %v1877_v48 }
 0xf20   :  { %v5277_v56 = vpop.eup %5276 }
 0xf21   :  { %v1883_v57 = vmul.f32 %v5277_v56, %v1881_v61  ;;  %v1898_v59 = vmul.f32 %v5277_v56, %v1896_v29  ;;  %v1890_v63 = vsub.f32 1.0, %v5277_v56 }
 0xf23   :  { %1885 = vrot.lane.b32.xlu0 %v1883_v57, %s5571_s11 }
 0xf95   :  { %v1886_v60 = vpop.permute.xlu0 %1885 }
 0xf96   :  { %v1888_v47 = vadd.f32 %v1886_v60, %v1867_v37 }
 0xf98   :  { %5278 = vtanh.f32 %v1888_v47 }
 0xfa2   :  { %v5279_v23 = vpop.eup %5278 }
 0xfa3   :  { %1892 = vrot.lane.b32.xlu1 %v5279_v23, %s5570_s6 }
0x1015   :  { %v1893_v4 = vpop.permute.xlu1 %1892 }
0x1016   :  { %v1895_v6 = vmul.f32 %v1893_v4, %v1890_v63 }
0x1018   :  { %v6038_v7 = vadd.f32 %v1898_v59, %v1895_v6 }
0x101a   :  { %v1901_v33 = vrot.slane %v6038_v7, 4 }
0x101c   :  { %1902 = vrot.lane.b32.xlu0 %v1901_v33, %s5570_s6 }
0x108e   :  { %v1903_v18 = vpop.permute.xlu0 %1902 }
0x108f   :  { %4231 = vmatmul.mubr.msk.f32.vlgmr.msra.gmra.mrb[18].mxu1 %vm234_vm4, %v1903_v18 }
0x1090   :  { %4904 = vmatpush3.bf16.msra.mxu1 %v5904_v19  ;;  %4598 = vmatprep.mubr.msk.f32.mxu1 %vm5568_vm0, %v5569_v1 }
0x1091   :  { %4905 = vmatprep.subr.bf16.mxu1 %v5567_v0 }
0x1094   :  { %4907 = vmatpush3.bf16.msra.mxu1 %v5906_v46 }
0x1095   :  { %4911 = vmatprep.subr.bf16.mxu1 %v5567_v0 }
0x1162   :  { %v1972_v11 = vpop.f32.mrb[18].mxu1 }
0x1163   :  { %v1973_v13 = vadd.f32 %v1972_v11, %v5817_v43  ;;  %v6051_v10 = vpop.f32.mrb[19].mxu1 }
0x1165   :  { %v1979_v20 = vadd.f32 %v1977_v40, %v1973_v13  ;;  %v2338_v21 = vrot.slane %v1973_v13, 2  ;;  %v1981_v30 = vmax.f32 %v1973_v13, 0.0 }
0x1167   :  { %v1980_v55 = vmax.f32 %v1979_v20, 0.0  ;;  %2339 = vrot.lane.b32.xlu0 %v2338_v21, %s5571_s11  ;;  %2056 = vrot.lane.b32.xlu1 %v1981_v30, %s5570_s6  ;;  %v1975_v20 = vadd.f32 %v6051_v10, %v5813_v39  ;;  %v5381_v39 = vld [vmem:[#allocation11 + $0x50] sm:$0xff]  ;;  %v5382_v10 = vld [vmem:[#allocation11 + $0x78] sm:$0xff] }
0x1169   :  { %4588 = vmatmul.mubr.msk.f32.vlgmr.msra.gmra.mrb[18].mxu0 %vm234_vm4, %v1980_v55  ;;  %v2350_v21 = vrot.slane %v1975_v20, 2 }
0x116a   :  { %4910 = vmatpush3.bf16.msra.mxu0 %v5830_v49  ;;  %4605 = vmatprep.mubr.msk.f32.mxu0 %vm5568_vm0, %v5569_v1 }
0x116b   :  { %4917 = vmatprep.subr.bf16.mxu0 %v5567_v0 }
0x11d9   :  { %v2057_v43 = vpop.permute.xlu1 %2056  ;;  %v2340_v33 = vpop.permute.xlu0 %2339 }
0x11da   :  { %4599 = vmatmul.mubr.msk.f32.vlgmr.msra.gmra.mrb[20].mxu1 %vm234_vm4, %v2057_v43 }
0x11db   :  { %4913 = vmatpush3.bf16.msra.mxu1 %v5850_v12  ;;  %4616 = vmatprep.mubr.msk.f32.mxu1 %vm5568_vm0, %v5569_v1 }
0x11dc   :  { %4914 = vmatprep.subr.bf16.mxu1 %v5567_v0 }
0x11df   :  { %4916 = vmatpush3.bf16.msra.mxu1 %v5854_v16 }
0x11e0   :  { %4923 = vmatprep.subr.bf16.mxu1 %v5567_v0 }
0x123c   :  { %v2051_v45 = vpop.f32.mrb[18].mxu0 }
0x123d   :  { %v6068_v49 = vadd.f32 %v2051_v45, %v5837_v51  ;;  %v4589_v58 = vpop.f32.mrb[19].mxu0  ;;  %v5380_v45 = vld [vmem:[#allocation11 + $0x28] sm:$0xff] }
0x123f   :  { %v2131_v2 = vand.u32 2147483647, %v6068_v49  ;;  %v2130_v44 = vmax.f32 %v6068_v49, 0.0  ;;  %v2182_v52 = vrot.slane %v6068_v49, 2 }
0x1241   :  { %v2132_v37 = vsub.f32 0.0, %v2131_v2 }
0x1243   :  { %v2133_v38 = vmul.f32 1.442695, %v2132_v37 }
0x1245   :  { %5280 = vpow2.f32 %v2133_v38 }
0x124f   :  { %v5281_v12 = vpop.eup %5280 }
0x1250   :  { %v2135_v41 = vadd.f32 1.0, %v5281_v12 }
0x1252   :  { %5282 = vlog2.f32 %v2135_v41 }
0x125c   :  { %v5283_v42 = vpop.eup %5282 }
0x125d   :  { %v2137_v26 = vmul.f32 0.6931472, %v5283_v42 }
0x125f   :  { %v6072_v16 = vadd.f32 %v2137_v26, %v2130_v44  ;;  %v5384_v26 = vld [vmem:[#allocation10 + $0x10] sm:$0xff] }
0x1261   :  { %v2178_v48 = vrot.slane %v6072_v16, 2 }
0x1263   :  { %v2180_v51 = vmul.f32 %v2178_v48, %v5844_v8  ;;  %v6085_v8 = vld [vmem:[#allocation13] sm:$0xff] }
0x1265   :  { %v2184_v29 = vadd.f32 %v2182_v52, %v2180_v51  ;;  %v2374_v51 = vld [vmem:[#allocation11 + $0x48] sm:$0xff] }
0x1266   :  { %v5175_v52 = vpack.i.bf16 %v2374_v51, %v5793_v25 }
0x1267   :  { %v2186_v61 = vrot.slane %v2184_v29, 6  ;;  %v2378_v29 = vld [vmem:[#allocation11 + $0x98] sm:$0xff] }
0x1269   :  { %4606 = vmatmul.mubr.msk.f32.vlgmr.msra.gmra.mrb[20].mxu0 %vm156_vm1, %v2186_v61  ;;  %v5185_v61 = vpack.i.bf16 %v2378_v29, %v5803_v28 }
0x126a   :  { %4627 = vmatprep.mubr.msk.f32.mxu0 %vm5568_vm0, %v5569_v1 }
0x12ad   :  { %v6080_v56 = vpop.f32.mrb[20].mxu1 }
0x12ae   :  { %v4600_v57 = vpop.f32.mrb[21].mxu1 }
0x133c   :  { %v2255_v59 = vpop.f32.mrb[20].mxu0 }
0x133d   :  { %v2256_v60 = vadd.f32 %v5865_v17, %v2255_v59  ;;  %v4607_v47 = vpop.f32.mrb[21].mxu0  ;;  %v2379_v59 = vld [vmem:[%s6530_s7 + $0x3] sm:$0x3] }
0x133e   :  { %v3001_v47 = vrot.slane %v2379_v59, %v5729_v32  ;;  %v5385_v32 = vld [vmem:[%s6530_s7 + $0x2] ss:$0 sm:$0xff] }
0x133f   :  { %v2259_v23 = vmax.f32 %v2256_v60, 0.0 }
0x1341   :  { %4617 = vmatmul.mubr.msk.f32.vlgmr.msra.gmra.mrb[22].mxu1 %vm234_vm4, %v2259_v23 }
0x1342   :  { %4925 = vmatpush3.bf16.msra.mxu1 %v5904_v19  ;;  %4638 = vmatprep.mubr.msk.f32.mxu1 %vm5568_vm0, %v6085_v8 }
0x1343   :  { %4926 = vmatprep.subr.bf16.mxu1 %v5567_v0 }
0x1346   :  { %4928 = vmatpush3.bf16.msra.mxu1 %v5906_v46  ;;  %v2365_v46 = vrot.slane %v6038_v7, 6  ;;  %v5125_v7 = vpack.i.bf16 %v5382_v10, %v5381_v39 }
0x1347   :  { %4935 = vmatprep.subr.bf16.mxu1 %v5567_v0 }
0x1414   :  { %v2329_v1 = vpop.f32.mrb[22].mxu1 }
0x1415   :  { %v2334_v63 = vrot.slane %v2329_v1, 2  ;;  %v4618_v4 = vpop.f32.mrb[23].mxu1 }
0x1417   :  { %v2336_v6 = vadd.f32 %v2334_v63, %v5877_v34  ;;  %v5379_v34 = vld [vmem:[#allocation11] sm:$0xff] }
0x1418   :  { %v5120_v58 = vpack.i.bf16 %v5380_v45, %v5379_v34 }
0x1419   :  { %v2342_v18 = vadd.f32 %v2340_v33, %v2336_v6  ;;  %v2376_v33 = vld [vmem:[#allocation11 + $0x70] sm:$0xff] }
0x141a   :  { %v5195_v28 = vpack.i.bf16 %v2378_v29, %v2376_v33 }
0x141b   :  { %v2343_v11 = vsub.f32 0.0, %v2342_v18 }
0x141d   :  { %v2344_v19 = vmul.f32 1.442695, %v2343_v11  ;;  %v2372_v11 = vld [vmem:[#allocation11 + $0x20] sm:$0xff] }
0x141f   :  { %5284 = vpow2.f32 %v2344_v19  ;;  %v5220_v19 = vpack.i.bf16 %v2374_v51, %v2372_v11 }
0x1429   :  { %v5285_v13 = vpop.eup %5284 }
0x142a   :  { %v2346_v40 = vadd.f32 1.0, %v5285_v13  ;;  %v6140_v13 = vld [vmem:[#allocation10 + $0x8] sm:$0xff] }
0x142c   :  { %5286 = vrcp.f32 %v2346_v40  ;;  %v6142_v40 = vld [vmem:[#allocation10 + $0x18] sm:$0xff] }
0x142d   :  { %v5230_v20 = vpack.i.bf16 %v6142_v40, %v6140_v13 }
0x1436   :  { %v5287_v30 = vpop.eup %5286 }
0x1437   :  { %v2352_v55 = vmul.f32 %v5287_v30, %v2350_v21  ;;  %v2367_v43 = vmul.f32 %v5287_v30, %v2365_v46  ;;  %v2359_v57 = vsub.f32 1.0, %v5287_v30  ;;  %v5170_v46 = vpack.i.bf16 %v2372_v11, %v5791_v24 }
0x1438   :  { %v5180_v21 = vpack.i.bf16 %v2376_v33, %v5801_v27  ;;  %v2997_v30 = vrot.slane %v2379_v59, %v5727_v31 }
0x1439   :  { %2354 = vrot.lane.b32.xlu1 %v2352_v55, %s5571_s11 }
0x143d   :  { %5121 = vrot.lane.b32.xlu1 %v5120_v58, %s5571_s11 }
0x14ab   :  { %v2355_v2 = vpop.permute.xlu1 %2354 }
0x14ac   :  { %v2357_v37 = vadd.f32 %v2355_v2, %v2336_v6 }
0x14ae   :  { %5288 = vtanh.f32 %v2357_v37 }
0x14af   :  { %v5122_v12 = vpop.permute.xlu1 %5121 }
0x14b0   :  { %v5124_v41 = vunpack.i.h.bf16 %v5122_v12  ;;  %v5123_v42 = vunpack.i.l.bf16 %v5122_v12 }
0x14b2   :  { %v4918_v44 = vpack.c.bf16 %v5124_v41, %v5123_v42 }
0x14b4   :  { %4919 = vmatpush3.bf16.msra.mxu0 %v4918_v44 }
0x14b5   :  { %4920 = vmatprep.subr.bf16.mxu0 %v5567_v0 }
0x14b8   :  { %v5289_v38 = vpop.eup %5288 }
0x14b9   :  { %2361 = vrot.lane.b32.xlu0 %v5289_v38, %s5570_s6 }
0x14bd   :  { %5126 = vrot.lane.b32.xlu0 %v5125_v7, %s5571_s11 }
0x14c1   :  { %2398 = vrot.lane.b32.xlu0 %v5738_v35, %s5574_s22  ;;  %v5383_v35 = vld [vmem:[#allocation10] sm:$0xff] }
0x14c2   :  { %v5160_v48 = vpack.i.bf16 %v5384_v26, %v5383_v35  ;;  %v1686_v26 = vmul.f32 %v6011_v3, %v6011_v3 }
0x14c5   :  { %5136 = vrot.lane.b32.xlu0 %v5887_v36, %s5570_s6 }
0x14c9   :  { %5141 = vrot.lane.b32.xlu0 %v5894_v62, %s5571_s11 }
0x14cd   :  { %2568 = vrot.lane.b32.xlu0 %v5865_v17, %s5571_s11 }
0x14d1   :  { %5156 = vrot.lane.b32.xlu0 %v5894_v62, %s5574_s22 }
0x14d5   :  { %5161 = vrot.lane.b32.xlu0 %v5160_v48, %s5572_s20 }
0x14d9   :  { %2752 = vrot.lane.b32.xlu0 %v5865_v17, %s5570_s6 }
0x14dd   :  { %5176 = vrot.lane.b32.xlu0 %v5175_v52, %s5563_s12 }
0x14e1   :  { %5186 = vrot.lane.b32.xlu0 %v5185_v61, %s5563_s12 }
0x14e5   :  { %3004 = vrot.lane.b32.xlu0 %v3001_v47, %s5563_s12 }
0x14e9   :  { %5196 = vrot.lane.b32.xlu0 %v5195_v28, %s5573_s21 }
0x14ed   :  { %5206 = vrot.lane.b32.xlu0 %v5195_v28, %s5571_s11 }
0x14f1   :  { %5216 = vrot.lane.b32.xlu0 %v5195_v28, %s5575_s1 }
0x14f5   :  { %5221 = vrot.lane.b32.xlu0 %v5220_v19, %s5572_s20 }
0x152b   :  { %v2362_v60 = vpop.permute.xlu0 %2361 }
0x152c   :  { %v2364_v23 = vmul.f32 %v2362_v60, %v2359_v57 }
0x152e   :  { %v2368_v1 = vadd.f32 %v2367_v43, %v2364_v23 }
0x152f   :  { %v5127_v25 = vpop.permute.xlu0 %5126 }
0x1530   :  { %v2383_v63 = vrot.slane %v2368_v1, 6  ;;  %v5129_v4 = vunpack.i.h.bf16 %v5127_v25  ;;  %v5128_v6 = vunpack.i.l.bf16 %v5127_v25 }
0x1532   :  { %2384 = vrot.lane.b32.xlu1 %v2383_v63, %s5570_s6  ;;  %v4921_v18 = vpack.c.bf16 %v5129_v4, %v5128_v6 }
0x1533   :  { %v6164_v24 = vpop.permute.xlu0 %2398 }
0x1534   :  { %4922 = vmatpush3.bf16.msra.mxu0 %v4921_v18 }
0x1535   :  { %4929 = vmatprep.subr.bf16.mxu0 %v5567_v0 }
0x1536   :  { %5131 = vrot.lane.b32.xlu1 %v5894_v62, %s5570_s6  ;;  %v4246_v62 = vld [vmem:[%s6530_s7 + $0x4] ss:$0 sm:$0xff] }
0x1537   :  { %3406 = vrot.lane.b32.xlu0 %v4246_v62, %s5571_s11  ;;  %v5137_v27 = vpop.permute.xlu0 %5136 }
0x1538   :  { %v5139_v34 = vunpack.i.h.bf16 %v5137_v27  ;;  %v5138_v45 = vunpack.i.l.bf16 %v5137_v27 }
0x153a   :  { %640 = vrot.lane.b32.xlu1 %v5385_v32, %s5563_s12  ;;  %v4933_v38 = vpack.c.bf16 %v5139_v34, %v5138_v45 }
0x153b   :  { %5231 = vrot.lane.b32.xlu0 %v5230_v20, %s5575_s1  ;;  %v6166_v31 = vpop.permute.xlu0 %5141 }
0x153e   :  { %5146 = vrot.lane.b32.xlu1 %v5887_v36, %s5571_s11 }
0x153f   :  { %3504 = vrot.lane.b32.xlu0 %v4246_v62, %s5572_s20 }
0x1542   :  { %5151 = vrot.lane.b32.xlu1 %v5160_v48, %s5571_s11  ;;  %v2155_v48 = vmul.f32 %v6072_v16, %v6072_v16 }
0x1546   :  { %2654 = vrot.lane.b32.xlu1 %v5865_v17, %s5572_s20  ;;  %v6168_v17 = vpop.permute.xlu0 %2568 }
0x154a   :  { %5166 = vrot.lane.b32.xlu1 %v5887_v36, %s5574_s22  ;;  %v6173_v55 = vpop.permute.xlu0 %5156 }
0x154e   :  { %5171 = vrot.lane.b32.xlu1 %v5170_v46, %s5563_s12  ;;  %v6193_v42 = vpop.permute.xlu0 %5161 }
0x1552   :  { %5181 = vrot.lane.b32.xlu1 %v5180_v21, %s5563_s12  ;;  %v6219_v6 = vpop.permute.xlu0 %2752 }
0x1556   :  { %3002 = vrot.lane.b32.xlu1 %v2997_v30, %s5563_s12  ;;  %v5177_v21 = vpop.permute.xlu0 %5176 }
0x1557   :  { %v5179_v27 = vunpack.i.h.bf16 %v5177_v21 }
0x155a   :  { %5191 = vrot.lane.b32.xlu1 %v5220_v19, %s5573_s21  ;;  %v5187_v34 = vpop.permute.xlu0 %5186 }
0x155e   :  { %5201 = vrot.lane.b32.xlu1 %v5220_v19, %s5571_s11 }
0x1562   :  { %5211 = vrot.lane.b32.xlu1 %v5220_v19, %s5575_s1 }
0x1566   :  { %3213 = vrot.lane.b32.xlu1 %v4246_v62, %s5573_s21 }
0x156a   :  { %5226 = vrot.lane.b32.xlu1 %v5195_v28, %s5572_s20 }
0x156e   :  { %3299 = vrot.lane.b32.xlu1 %v4246_v62, %s5575_s1 }
0x1572   :  { %5236 = vrot.lane.b32.xlu1 %v5230_v20, %s5570_s6 }
0x1576   :  { %3781 = vrot.lane.b32.xlu1 %v4246_v62, %s5563_s12 }
0x15a4   :  { %v2385_v36 = vpop.permute.xlu1 %2384 }
0x15a5   :  { %4628 = vmatmul.mubr.msk.f32.vlgmr.msra.gmra.mrb[22].mxu0 %vm234_vm4, %v2385_v36 }
0x15a6   :  { %4649 = vmatprep.mubr.msk.f32.mxu0 %vm5568_vm0, %v6085_v8 }
0x15a8   :  { %v5132_v43 = vpop.permute.xlu1 %5131 }
0x15a9   :  { %v5134_v58 = vunpack.i.h.bf16 %v5132_v43  ;;  %v5133_v2 = vunpack.i.l.bf16 %v5132_v43 }
0x15ab   :  { %v4930_v37 = vpack.c.bf16 %v5134_v58, %v5133_v2 }
0x15ac   :  { %v6175_v39 = vpop.permute.xlu1 %640 }
0x15ad   :  { %v6179_v10 = vadd.f32 %v5925_v22, %v6175_v39  ;;  %v6183_v7 = vadd.f32 %v5961_v15, %v6175_v39  ;;  %v6187_v12 = vadd.f32 %v6022_v14, %v6175_v39  ;;  %v6191_v41 = vadd.f32 %v6080_v56, %v6175_v39  ;;  %4931 = vmatpush3.bf16.msra.mxu0 %v4930_v37 }
0x15ae   :  { %4932 = vmatprep.subr.bf16.mxu0 %v5567_v0  ;;  %v1217_v15 = vmul.f32 %v5950_v5, %v5950_v5  ;;  %v740_v14 = vmul.f32 %v5846_v9, %v5846_v9 }
0x15af   :  { %v725_v22 = vand.u32 2147483647, %v6179_v10  ;;  %v1202_v44 = vand.u32 2147483647, %v6183_v7  ;;  %v1671_v35 = vand.u32 2147483647, %v6187_v12  ;;  %v1218_v61 = vsub.f32 %v5946_v54, %v6183_v7 }
0x15b0   :  { %v2140_v56 = vand.u32 2147483647, %v6191_v41  ;;  %v6208_v51 = vpop.permute.xlu1 %5146  ;;  %v741_v57 = vsub.f32 %v5840_v53, %v6179_v10  ;;  %v1687_v47 = vsub.f32 %v6007_v50, %v6187_v12  ;;  %v2156_v23 = vsub.f32 %v6068_v49, %v6191_v41 }
0x15b1   :  { %v726_v52 = vsub.f32 0.0, %v725_v22  ;;  %v1203_v29 = vsub.f32 0.0, %v1202_v44  ;;  %4934 = vmatpush3.bf16.msra.mxu0 %v4933_v38  ;;  %v1672_v59 = vsub.f32 0.0, %v1671_v35  ;;  %v1219_v63 = vmul.f32 %v1218_v61, %v1218_v61 }
0x15b2   :  { %v2141_v60 = vsub.f32 0.0, %v2140_v56  ;;  %4941 = vmatprep.subr.bf16.mxu0 %v5567_v0  ;;  %v742_v4 = vmul.f32 %v741_v57, %v741_v57  ;;  %v1688_v53 = vmul.f32 %v1687_v47, %v1687_v47  ;;  %v2157_v28 = vmul.f32 %v2156_v23, %v2156_v23 }
0x15b3   :  { %v727_v1 = vmul.f32 1.442695, %v726_v52  ;;  %v1204_v25 = vmul.f32 1.442695, %v1203_v29  ;;  %v1673_v54 = vmul.f32 1.442695, %v1672_v59  ;;  %v6222_v50 = vadd.f32 %v1219_v63, %v1217_v15 }
0x15b4   :  { %v2142_v33 = vmul.f32 1.442695, %v2141_v60  ;;  %4650 = vmatmul.mubr.msk.f32.vlgmr.msra.gmra.mrb[24].mxu0 %vm234_vm4, %v2385_v36  ;;  %v5152_v18 = vpop.permute.xlu1 %5151  ;;  %v6224_v32 = vadd.f32 %v742_v4, %v740_v14  ;;  %v6228_v49 = vadd.f32 %v1688_v53, %v1686_v26  ;;  %v6230_v11 = vadd.f32 %v2157_v28, %v2155_v48  ;;  %v3005_v4 = vpop.permute.xlu0 %3004 }
0x15b5   :  { %5290 = vpow2.f32 %v727_v1  ;;  %4667 = vmatprep.mubr.msk.f32.mxu0 %vm5568_vm0, %v6085_v8  ;;  %v5154_v19 = vunpack.i.h.bf16 %v5152_v18  ;;  %v5153_v62 = vunpack.i.l.bf16 %v5152_v18  ;;  %v5178_v36 = vunpack.i.l.bf16 %v5177_v21 }
0x15b6   :  { %5292 = vpow2.f32 %v1204_v25  ;;  %v5189_v38 = vunpack.i.h.bf16 %v5187_v34  ;;  %v5188_v35 = vunpack.i.l.bf16 %v5187_v34  ;;  %v724_v28 = vmax.f32 %v6179_v10, 0.0 }
0x15b7   :  { %5294 = vpow2.f32 %v1673_v54  ;;  %v4942_v46 = vpack.c.bf16 %v5154_v19, %v5153_v62  ;;  %v6238_v37 = vsel %vm156_vm1, %v5178_v36, %v5179_v27  ;;  %v1201_v62 = vmax.f32 %v6183_v7, 0.0 }
0x15b8   :  { %5296 = vpow2.f32 %v2142_v33  ;;  %v6232_v20 = vpop.permute.xlu1 %2654  ;;  %v6248_v47 = vsel %vm156_vm1, %v5188_v35, %v5189_v38  ;;  %v2139_v34 = vmax.f32 %v6191_v41, 0.0 }
0x15b9   :  { %4943 = vmatpush3.bf16.msra.mxu0 %v4942_v46 }
0x15ba   :  { %4944 = vmatprep.subr.bf16.mxu0 %v5567_v0 }
0x15bc   :  { %v6234_v30 = vpop.permute.xlu1 %5166 }
0x15bf   :  { %v5291_v43 = vpop.eup %5290 }
0x15c0   :  { %v5293_v45 = vpop.eup %5292  ;;  %v729_v58 = vadd.f32 1.0, %v5291_v43  ;;  %v5172_v2 = vpop.permute.xlu1 %5171 }
0x15c1   :  { %v5295_v22 = vpop.eup %5294  ;;  %v1206_v44 = vadd.f32 1.0, %v5293_v45  ;;  %v5174_v15 = vunpack.i.h.bf16 %v5172_v2  ;;  %v5173_v14 = vunpack.i.l.bf16 %v5172_v2 }
0x15c2   :  { %v5297_v56 = vpop.eup %5296  ;;  %v1675_v26 = vadd.f32 1.0, %v5295_v22  ;;  %5298 = vlog2.f32 %v729_v58 }
0x15c3   :  { %v2144_v48 = vadd.f32 1.0, %v5297_v56  ;;  %5300 = vlog2.f32 %v1206_v44  ;;  %v6241_v52 = vsel %vm156_vm1, %v5173_v14, %v5174_v15  ;;  %v6243_v29 = vpack.c.bf16 %v5179_v27, %v5174_v15 }
0x15c4   :  { %5302 = vlog2.f32 %v1675_v26  ;;  %v4954_v61 = vpack.c.bf16 %v6238_v37, %v6241_v52  ;;  %v5182_v57 = vpop.permute.xlu1 %5181  ;;  %v1670_v27 = vmax.f32 %v6187_v12, 0.0  ;;  %v4960_v52 = vpack.c.bf16 %v6142_v40, %v6140_v13 }
0x15c5   :  { %5304 = vlog2.f32 %v2144_v48  ;;  %v5184_v59 = vunpack.i.h.bf16 %v5182_v57  ;;  %v5183_v60 = vunpack.i.l.bf16 %v5182_v57 }
0x15c6   :  { %5306 = vlog2.f32 %v5846_v9 }
0x15c7   :  { %v6251_v23 = vsel %vm156_vm1, %v5183_v60, %v5184_v59  ;;  %v6253_v1 = vpack.c.bf16 %v5189_v38, %v5184_v59  ;;  %5308 = vlog2.f32 %v5950_v5 }
0x15c8   :  { %v4957_v25 = vpack.c.bf16 %v6248_v47, %v6251_v23  ;;  %v3003_v63 = vpop.permute.xlu1 %3002  ;;  %5310 = vlog2.f32 %v6011_v3 }
0x15c9   :  { %v6258_v54 = vsel %vm156_vm1, %v3003_v63, %v3005_v4  ;;  %5312 = vlog2.f32 %v6072_v16 }
0x15cc   :  { %v5299_v33 = vpop.eup %5298 }
0x15cd   :  { %v5301_v53 = vpop.eup %5300  ;;  %v731_v18 = vmul.f32 0.6931472, %v5299_v33 }
0x15ce   :  { %v5303_v19 = vpop.eup %5302  ;;  %v1208_v46 = vmul.f32 0.6931472, %v5301_v53 }
0x15cf   :  { %v5305_v21 = vpop.eup %5304  ;;  %v732_v36 = vadd.f32 %v731_v18, %v724_v28  ;;  %v1677_v43 = vmul.f32 0.6931472, %v5303_v19 }
0x15d0   :  { %v1209_v45 = vadd.f32 %v1208_v46, %v1201_v62  ;;  %v2146_v10 = vmul.f32 0.6931472, %v5305_v21  ;;  %v5307_v38 = vpop.eup %5306 }
0x15d1   :  { %5314 = vlog2.f32 %v732_v36  ;;  %v744_v9 = vmul.f32 %v732_v36, %v732_v36  ;;  %v1678_v58 = vadd.f32 %v1677_v43, %v1670_v27  ;;  %v5309_v3 = vpop.eup %5308  ;;  %v737_v44 = vmul.f32 0.6931472, %v5307_v38 }
0x15d2   :  { %5316 = vlog2.f32 %v1209_v45  ;;  %v1221_v7 = vmul.f32 %v1209_v45, %v1209_v45  ;;  %v2147_v2 = vadd.f32 %v2146_v10, %v2139_v34  ;;  %v5311_v41 = vpop.eup %5310  ;;  %v1214_v15 = vmul.f32 0.6931472, %v5309_v3 }
0x15d3   :  { %5318 = vrcp.f32 %v744_v9  ;;  %v1690_v5 = vmul.f32 %v1678_v58, %v1678_v58  ;;  %v5313_v22 = vpop.eup %5312  ;;  %v738_v59 = vmul.f32 2.0, %v737_v44  ;;  %v1683_v63 = vmul.f32 0.6931472, %v5311_v41 }
0x15d4   :  { %5320 = vrcp.f32 %v1221_v7  ;;  %v2159_v12 = vmul.f32 %v2147_v2, %v2147_v2  ;;  %v1215_v53 = vmul.f32 2.0, %v1214_v15  ;;  %v2152_v46 = vmul.f32 0.6931472, %v5313_v22 }
0x15d5   :  { %5322 = vlog2.f32 %v1678_v58  ;;  %v1684_v10 = vmul.f32 2.0, %v1683_v63 }
0x15d6   :  { %5324 = vrcp.f32 %v1690_v5  ;;  %v2153_v5 = vmul.f32 2.0, %v2152_v46 }
0x15d7   :  { %5326 = vlog2.f32 %v2147_v2 }
0x15d8   :  { %5328 = vrcp.f32 %v2159_v12 }
0x15db   :  { %v5315_v16 = vpop.eup %5314 }
0x15dc   :  { %v5317_v14 = vpop.eup %5316  ;;  %v734_v35 = vmul.f32 0.6931472, %v5315_v16 }
0x15dd   :  { %v5319_v56 = vpop.eup %5318  ;;  %v1211_v26 = vmul.f32 0.6931472, %v5317_v14  ;;  %v6276_v14 = vpop.permute.xlu1 %5191 }
0x15de   :  { %v5321_v48 = vpop.eup %5320  ;;  %v735_v57 = vmul.f32 2.0, %v734_v35  ;;  %v746_v60 = vmul.f32 %v5319_v56, %v6224_v32  ;;  %v6278_v35 = vpop.permute.xlu0 %5196 }
0x15df   :  { %v5323_v4 = vpop.eup %5322  ;;  %v1212_v33 = vmul.f32 2.0, %v1211_v26  ;;  %v1223_v28 = vmul.f32 %v5321_v48, %v6222_v50 }
0x15e0   :  { %v5325_v18 = vpop.eup %5324  ;;  %v739_v19 = vsub.f32 %v735_v57, %v738_v59  ;;  %v1680_v62 = vmul.f32 0.6931472, %v5323_v4 }
0x15e1   :  { %v5327_v21 = vpop.eup %5326  ;;  %v1216_v27 = vsub.f32 %v1212_v33, %v1215_v53  ;;  %v1692_v36 = vmul.f32 %v5325_v18, %v6228_v49  ;;  %v6280_v56 = vpop.permute.xlu1 %5201 }
0x15e2   :  { %v5329_v43 = vpop.eup %5328  ;;  %v747_v34 = vadd.f32 %v746_v60, %v739_v19  ;;  %v1681_v45 = vmul.f32 2.0, %v1680_v62  ;;  %v2149_v9 = vmul.f32 0.6931472, %v5327_v21  ;;  %v6282_v26 = vpop.permute.xlu0 %5206 }
0x15e3   :  { %v1224_v32 = vadd.f32 %v1223_v28, %v1216_v27  ;;  %v2161_v58 = vmul.f32 %v5329_v43, %v6230_v11  ;;  %v5144_v27 = vunpack.i.h.bf16 %v6166_v31 }
0x15e4   :  { %v4216_v7 = vadd.f32 -1.0, %v747_v34  ;;  %v1685_v2 = vsub.f32 %v1681_v45, %v1684_v10  ;;  %v2150_v50 = vmul.f32 2.0, %v2149_v9 }
0x15e5   :  { %v4222_v12 = vadd.f32 -1.0, %v1224_v32  ;;  %v6284_v48 = vpop.permute.xlu1 %5211 }
0x15e6   :  { %v750_v38 = vsel %vm749_vm5, %v4216_v7, 0.0  ;;  %v1693_v3 = vadd.f32 %v1692_v36, %v1685_v2  ;;  %v2154_v41 = vsub.f32 %v2150_v50, %v2153_v5  ;;  %v6286_v57 = vpop.permute.xlu0 %5216  ;;  %v5143_v36 = vunpack.i.l.bf16 %v6166_v31 }
0x15e7   :  { %v1226_v49 = vsel %vm749_vm5, %v4222_v12, 0.0  ;;  %751 = vadd.xlane.f32.xlu0 %v750_v38  ;;  %v5149_v5 = vunpack.i.h.bf16 %v6208_v51  ;;  %v5148_v12 = vunpack.i.l.bf16 %v6208_v51  ;;  %v5213_v37 = vunpack.i.l.bf16 %v6284_v48 }
0x15e8   :  { %1227 = vadd.xlane.f32.xlu1 %v1226_v49  ;;  %v4228_v22 = vadd.f32 -1.0, %v1693_v3  ;;  %v2162_v44 = vadd.f32 %v2161_v58, %v2154_v41  ;;  %v4936_v50 = vpack.c.bf16 %v5144_v27, %v5143_v36  ;;  %v5219_v23 = vunpack.i.h.bf16 %v6286_v57 }
0x15e9   :  { %v6288_v59 = vpop.permute.xlu1 %3213 }
0x15ea   :  { %v1695_v16 = vsel %vm749_vm5, %v4228_v22, 0.0  ;;  %v4234_v15 = vadd.f32 -1.0, %v2162_v44  ;;  %v6290_v60 = vpop.permute.xlu0 %5221 }
0x15eb   :  { %1696 = vadd.xlane.f32.xlu0 %v1695_v16 }
0x15ec   :  { %v2164_v11 = vsel %vm749_vm5, %v4234_v15, 0.0 }
0x15ed   :  { %v6292_v63 = vpop.permute.xlu1 %5226 }
0x15ee   :  { %v6294_v4 = vpop.permute.xlu0 %3406 }
0x15ef   :  { %2165 = vadd.xlane.f32.xlu0 %v2164_v11  ;;  %v4939_v11 = vpack.c.bf16 %v5149_v5, %v5148_v12  ;;  %v5169_v5 = vunpack.i.h.bf16 %v6234_v30  ;;  %v5168_v12 = vunpack.i.l.bf16 %v6234_v30 }
0x15f1   :  { %v6296_v33 = vpop.permute.xlu1 %3299 }
0x15f2   :  { %v6298_v53 = vpop.permute.xlu0 %5231 }
0x15f5   :  { %v6300_v28 = vpop.permute.xlu1 %5236 }
0x15f6   :  { %v6302_v18 = vpop.permute.xlu0 %3504 }
0x15f9   :  { %v6304_v19 = vpop.permute.xlu1 %3781 }
0x1674   :  { %v752_v62 = vpop.xlane.xlu0 %751 }
0x1675   :  { %v753_v46 = vrot.slane %v752_v62, 4  ;;  %v1228_v21 = vpop.xlane.xlu1 %1227 }
0x1676   :  { %v1229_v43 = vrot.slane %v1228_v21, 4 }
0x1677   :  { %v754_v34 = vadd.f32 %v753_v46, %v752_v62 }
0x1678   :  { %v1230_v45 = vadd.f32 %v1229_v43, %v1228_v21  ;;  %v1697_v10 = vpop.xlane.xlu0 %1696  ;;  %v2469_v9 = vpop.f32.mrb[22].mxu0 }
0x1679   :  { %v755_v32 = vrot.slane %v754_v34, 2  ;;  %v1698_v58 = vrot.slane %v1697_v10, 4  ;;  %v2470_v7 = vadd.f32 %v2469_v9, %v6164_v24  ;;  %v4629_v2 = vpop.f32.mrb[23].mxu0 }
0x167a   :  { %v1231_v38 = vrot.slane %v1230_v45, 2 }
0x167b   :  { %v1699_v3 = vadd.f32 %v1698_v58, %v1697_v10  ;;  %v2473_v41 = vmax.f32 %v2470_v7, 0.0  ;;  %v756_v49 = vadd.f32 %v755_v32, %v754_v34  ;;  %v5158_v10 = vunpack.i.l.bf16 %v6173_v55 }
0x167c   :  { %v2166_v31 = vpop.xlane.xlu0 %2165  ;;  %v1232_v22 = vadd.f32 %v1231_v38, %v1230_v45  ;;  %v5159_v45 = vunpack.i.h.bf16 %v6173_v55 }
0x167d   :  { %v1700_v44 = vrot.slane %v1699_v3, 2  ;;  %v2167_v16 = vrot.slane %v2166_v31, 4  ;;  %4639 = vmatmul.mubr.msk.f32.vlgmr.msra.gmra.mrb[24].mxu1 %vm234_vm4, %v2473_v41  ;;  %v757_v15 = vrot.slane %v756_v49, 1 }
0x167e   :  { %v1233_v62 = vrot.slane %v1232_v22, 1  ;;  %4937 = vmatpush3.bf16.msra.mxu1 %v4936_v50  ;;  %4660 = vmatprep.mubr.msk.f32.mxu1 %vm5568_vm0, %v6085_v8  ;;  %v4948_v50 = vpack.c.bf16 %v5159_v45, %v5158_v10 }
0x167f   :  { %v2168_v24 = vadd.f32 %v2167_v16, %v2166_v31  ;;  %v758_v46 = vadd.f32 %v757_v15, %v756_v49  ;;  %v1701_v51 = vadd.f32 %v1700_v44, %v1699_v3  ;;  %4938 = vmatprep.subr.bf16.mxu1 %v5567_v0  ;;  %v4951_v3 = vpack.c.bf16 %v5169_v5, %v5168_v12 }
0x1680   :  { %v1234_v21 = vadd.f32 %v1233_v62, %v1232_v22 }
0x1681   :  { %v2169_v27 = vrot.slane %v2168_v24, 2  ;;  %5012 = vpush %v758_v46  ;;  %v1702_v36 = vrot.slane %v1701_v51, 1 }
0x1682   :  { %5014 = vpush %v1234_v21  ;;  %4940 = vmatpush3.bf16.msra.mxu1 %v4939_v11 }
0x1683   :  { %v1703_v43 = vadd.f32 %v1702_v36, %v1701_v51  ;;  %v2170_v34 = vadd.f32 %v2169_v27, %v2168_v24  ;;  %4947 = vmatprep.subr.bf16.mxu1 %v5567_v0 }
0x1685   :  { %5016 = vpush %v1703_v43  ;;  %v2171_v9 = vrot.slane %v2170_v34, 1 }
0x1687   :  { %v2637_v32 = vpop.f32.mrb[24].mxu0  ;;  %v2172_v58 = vadd.f32 %v2171_v9, %v2170_v34  ;;  %v5164_v9 = vunpack.i.h.bf16 %v6193_v42 }
0x1688   :  { %v2638_v7 = vadd.f32 %v2637_v32, %v6168_v17  ;;  %v4651_v2 = vpop.f32.mrb[25].mxu0 }
0x1689   :  { %5018 = vpush %v2172_v58 }
0x168a   :  { %v2641_v38 = vmax.f32 %v2638_v7, 0.0  ;;  %v2743_v7 = vld [vmem:[%s6526_s3] sm:$0xf] }
0x168c   :  { %4661 = vmatmul.mubr.msk.f32.vlgmr.msra.gmra.mrb[26].mxu1 %vm234_vm4, %v2641_v38 }
0x168d   :  { %4949 = vmatpush3.bf16.msra.mxu1 %v4948_v50  ;;  %4685 = vmatprep.mubr.msk.f32.mxu1 %vm5568_vm0, %v6085_v8 }
0x168e   :  { %4950 = vmatprep.subr.bf16.mxu1 %v5567_v0 }
0x1691   :  { %4952 = vmatpush3.bf16.msra.mxu1 %v4951_v3 }
0x1692   :  { %4959 = vmatprep.subr.bf16.mxu1 %v5567_v0 }
0x16b2   :  { %s5013_s5 = spop %5012 }
0x16b3   :  { %v760_v17 = vstv %s5013_s5  ;;  %s5015_s29 = spop %5014 }
0x16b4   :  { %v761_v55 = vmul.f32 0.5, %v760_v17  ;;  %v1236_v41 = vstv %s5015_s29 }
0x16b5   :  { %v1237_v30 = vmul.f32 0.5, %v1236_v41 }
0x16b6   :  { %s5017_s9 = spop %5016 }
0x16b7   :  { %v1238_v49 = vadd.f32 %v1237_v30, %v761_v55  ;;  %v1705_v31 = vstv %s5017_s9 }
0x16b8   :  { %v1706_v22 = vmul.f32 0.5, %v1705_v31 }
0x16ba   :  { %v6326_v44 = vadd.f32 %v1706_v22, %v1238_v49 }
0x1750   :  { %v2543_v16 = vpop.f32.mrb[24].mxu1 }
0x1751   :  { %v6329_v15 = vadd.f32 %v2543_v16, %v6175_v39  ;;  %v4640_v11 = vpop.f32.mrb[25].mxu1  ;;  %v5163_v39 = vunpack.i.l.bf16 %v6193_v42  ;;  %v5214_v16 = vunpack.i.h.bf16 %v6284_v48  ;;  %v5223_v48 = vunpack.i.l.bf16 %v6290_v60 }
0x1753   :  { %v2548_v62 = vand.u32 2147483647, %v6329_v15  ;;  %v2547_v34 = vmax.f32 %v6329_v15, 0.0  ;;  %v2731_v32 = vrot.slane %v6329_v15, 6  ;;  %v4945_v3 = vpack.c.bf16 %v5164_v9, %v5163_v39 }
0x1754   :  { %v4969_v47 = vpack.c.bf16 %v5214_v16, %v5213_v37 }
0x1755   :  { %v2549_v24 = vsub.f32 0.0, %v2548_v62  ;;  %v6348_v17 = vsel %vm2733_vm6, %v6329_v15, %v2731_v32 }
0x1757   :  { %v2550_v46 = vmul.f32 1.442695, %v2549_v24  ;;  %v5193_v24 = vunpack.i.l.bf16 %v6276_v14 }
0x1759   :  { %5330 = vpow2.f32 %v2550_v46 }
0x175f   :  { %v2726_v51 = vpop.f32.mrb[26].mxu1 }
0x1760   :  { %v4662_v21 = vpop.f32.mrb[27].mxu1  ;;  %v2727_v50 = vadd.f32 %v2726_v51, %v6232_v20 }
0x1762   :  { %v2740_v41 = vrot.slane %v2727_v50, 6 }
0x1763   :  { %v5331_v27 = vpop.eup %5330 }
0x1764   :  { %v2552_v36 = vadd.f32 1.0, %v5331_v27  ;;  %v2742_v30 = vsel %vm2733_vm6, %v2727_v50, %v2740_v41 }
0x1766   :  { %5332 = vlog2.f32 %v2552_v36  ;;  %v5199_v36 = vunpack.i.h.bf16 %v6278_v35 }
0x1770   :  { %v5333_v43 = vpop.eup %5332 }
0x1771   :  { %v2554_v45 = vmul.f32 0.6931472, %v5333_v43  ;;  %v5198_v43 = vunpack.i.l.bf16 %v6278_v35  ;;  %v5208_v35 = vunpack.i.l.bf16 %v6282_v26 }
0x1773   :  { %v2555_v10 = vadd.f32 %v2554_v45, %v2547_v34  ;;  %v5204_v45 = vunpack.i.h.bf16 %v6280_v56 }
0x1775   :  { %v2736_v58 = vrot.slane %v2555_v10, 6  ;;  %v3813_v2 = vrot.slane %v2555_v10, 4  ;;  %v3815_v12 = vrot.slane %v2555_v10, 2 }
0x1777   :  { %v6341_v5 = vsel %vm2733_vm6, %v2555_v10, %v2736_v58  ;;  %v5203_v10 = vunpack.i.l.bf16 %v6280_v56  ;;  %v5209_v58 = vunpack.i.h.bf16 %v6282_v26 }
0x1778   :  { %v2744_v38 = vmul.f32 %v2743_v7, %v6341_v5  ;;  %v3817_v42 = vsel %vm3378_vm7, %v6341_v5, %v3813_v2  ;;  %v5234_v7 = vunpack.i.h.bf16 %v6298_v53  ;;  %v5233_v2 = vunpack.i.l.bf16 %v6298_v53 }
0x1779   :  { %v6351_v55 = vsel %vm3811_vm8, %v3817_v42, %v3815_v12  ;;  %v4974_v32 = vpack.c.bf16 %v5204_v45, %v5203_v10  ;;  %v4978_v56 = vpack.c.bf16 %v5209_v58, %v5208_v35 }
0x177a   :  { %v2745_v20 = vadd.f32 %v2744_v38, %v6348_v17  ;;  %v4990_v50 = vpack.c.bf16 %v5234_v7, %v5233_v2 }
0x177c   :  { %4668 = vmatmul.mubr.msk.f32.vlgmr.msra.gmra.mrb[26].mxu0 %vm156_vm1, %v2745_v20  ;;  %v5228_v20 = vunpack.i.l.bf16 %v6292_v63 }
0x177d   :  { %4946 = vmatpush3.bf16.msra.mxu0 %v4945_v3  ;;  %4674 = vmatprep.mubr.msk.f32.mxu0 %vm5568_vm0, %v6085_v8  ;;  %v5229_v3 = vunpack.i.h.bf16 %v6292_v63 }
0x177e   :  { %4953 = vmatprep.subr.bf16.mxu0 %v5567_v0 }
0x1780   :  { %4675 = vmatmul.mubr.msk.f32.vlgmr.msra.gmra.mrb[28].mxu0 %vm156_vm1, %v2742_v30 }
0x1781   :  { %4955 = vmatpush3.bf16.msra.mxu0 %v4954_v61  ;;  %4696 = vmatprep.mubr.msk.f32.mxu0 %vm5568_vm0, %v6085_v8 }
0x1782   :  { %4956 = vmatprep.subr.bf16.mxu0 %v5567_v0 }
0x1785   :  { %4958 = vmatpush3.bf16.msra.mxu0 %v4957_v25  ;;  %v5218_v25 = vunpack.i.l.bf16 %v6286_v57  ;;  %v5194_v57 = vunpack.i.h.bf16 %v6276_v14  ;;  %v4966_v14 = vpack.c.bf16 %v5199_v36, %v5198_v43 }
0x1786   :  { %4962 = vmatprep.subr.bf16.mxu0 %v5567_v0 }
0x1787   :  { %v4972_v13 = vpack.c.bf16 %v5219_v23, %v5218_v25  ;;  %v4963_v27 = vpack.c.bf16 %v5194_v57, %v5193_v24  ;;  %v3388_v25 = vld [vmem:[#allocation8] sm:$0xff] }
0x184f   :  { %v2824_v49 = vpop.f32.mrb[26].mxu0 }
0x1850   :  { %v2825_v31 = vadd.f32 %v2824_v49, %v6219_v6  ;;  %v4669_v22 = vpop.f32.mrb[27].mxu0  ;;  %v5224_v6 = vunpack.i.h.bf16 %v6290_v60 }
0x1851   :  { %v4986_v22 = vpack.c.bf16 %v5229_v3, %v5228_v20  ;;  %v3808_v20 = vrot.slane %v6329_v15, 2 }
0x1852   :  { %v2828_v61 = vmax.f32 %v2825_v31, 0.0  ;;  %v4982_v40 = vpack.c.bf16 %v5224_v6, %v5223_v48  ;;  %v5239_v6 = vunpack.i.h.bf16 %v6300_v28  ;;  %v5238_v48 = vunpack.i.l.bf16 %v6300_v28 }
0x1853   :  { %v2904_v11 = vpop.f32.mrb[28].mxu0 }
0x1854   :  { %v4676_v62 = vpop.f32.mrb[29].mxu0  ;;  %4686 = vmatmul.mubr.msk.f32.vlgmr.msra.gmra.mrb[28].mxu1 %vm234_vm4, %v2828_v61 }
0x1855   :  { %4961 = vmatpush3.bf16.msra.mxu1 %v4960_v52  ;;  %4703 = vmatprep.mubr.msk.f32.mxu1 %vm5568_vm0, %v6085_v8 }
0x1856   :  { %4968 = vmatprep.subr.bf16.mxu1 %v5567_v0 }
0x1858   :  { %4704 = vmatmul.mubr.msk.f32.vlgmr.msra.gmra.mrb[30].mxu1 %vm156_vm1, %v2742_v30 }
0x1859   :  { %4970 = vmatpush3.bf16.msra.mxu1 %v4969_v47  ;;  %4725 = vmatprep.mubr.msk.f32.mxu1 %vm5568_vm0, %v6085_v8 }
0x185a   :  { %4971 = vmatprep.subr.bf16.mxu1 %v5567_v0 }
0x185d   :  { %4973 = vmatpush3.bf16.msra.mxu1 %v4972_v13 }
0x185e   :  { %4983 = vmatprep.subr.bf16.mxu1 %v4982_v40 }
0x1927   :  { %v2989_v46 = vpop.f32.mrb[28].mxu1 }
0x1928   :  { %v2990_v60 = vadd.f32 %v2989_v46, %v2904_v11  ;;  %v4687_v51 = vpop.f32.mrb[29].mxu1 }
0x192a   :  { %v3008_v21 = vadd.f32 %v6258_v54, %v2990_v60  ;;  %v4994_v60 = vpack.c.bf16 %v5239_v6, %v5238_v48 }
0x192b   :  { %v3181_v34 = vpop.f32.mrb[30].mxu1 }
0x192c   :  { %v6394_v9 = vmax.f32 %v3008_v21, 0.0  ;;  %v4705_v39 = vpop.f32.mrb[31].mxu1 }
0x192e   :  { %4697 = vmatmul.mubr.msk.f32.vlgmr.msra.gmra.mrb[30].mxu0 %vm234_vm4, %v6394_v9 }
0x192f   :  { %4964 = vmatpush3.bf16.msra.mxu0 %v4963_v27  ;;  %4714 = vmatprep.mubr.msk.f32.mxu0 %vm5568_vm0, %v6085_v8 }
0x1930   :  { %4965 = vmatprep.subr.bf16.mxu0 %v5567_v0 }
0x1933   :  { %4967 = vmatpush3.bf16.msra.mxu0 %v4966_v14 }
0x1934   :  { %4975 = vmatprep.subr.bf16.mxu0 %v4974_v32 }
0x1936   :  { %4715 = vmatmul.mubr.msk.f32.vlgmr.msra.gmra.mrb[32].mxu0 %vm234_vm4, %v6394_v9 }
0x1937   :  { %4977 = vmatpush3.bf16.msra.mxu0 %v4974_v32 }
0x1938   :  { %4979 = vmatprep.subr.bf16.mxu0 %v4978_v56 }
0x193b   :  { %4981 = vmatpush3.bf16.msra.mxu0 %v4978_v56 }
0x193c   :  { %4991 = vmatprep.subr.bf16.mxu0 %v4990_v50 }
0x1a01   :  { %v3111_v8 = vpop.f32.mrb[30].mxu0 }
0x1a02   :  { %v3182_v12 = vadd.f32 %v3181_v34, %v3111_v8  ;;  %v4698_v26 = vpop.f32.mrb[31].mxu0 }
0x1a04   :  { %v3185_v38 = vadd.f32 %v3182_v12, %v6258_v54 }
0x1a06   :  { %v3186_v42 = vmax.f32 %v3185_v38, 0.0 }
0x1a08   :  { %v3188_v53 = vand.u32 2147483647, %v3186_v42  ;;  %v3187_v61 = vmax.f32 %v3186_v42, 0.0  ;;  %v3376_v47 = vrot.slane %v3186_v42, 4 }
0x1a09   :  { %v3282_v41 = vpop.f32.mrb[32].mxu0 }
0x1a0a   :  { %v3189_v30 = vsub.f32 0.0, %v3188_v53  ;;  %v3283_v49 = vadd.f32 %v3282_v41, %v6288_v59  ;;  %v4716_v31 = vpop.f32.mrb[33].mxu0  ;;  %v3389_v59 = vld [vmem:[#allocation8 + $0x8] sm:$0xf]  ;;  %v3379_v24 = vsel %vm3378_vm7, %v3186_v42, %v3376_v47 }
0x1a0c   :  { %v3190_v16 = vmul.f32 1.442695, %v3189_v30  ;;  %v3286_v37 = vmax.f32 %v3283_v49, 0.0 }
0x1a0e   :  { %5334 = vpow2.f32 %v3190_v16  ;;  %4726 = vmatmul.mubr.msk.f32.vlgmr.msra.gmra.mrb[32].mxu1 %vm234_vm4, %v3286_v37 }
0x1a0f   :  { %4985 = vmatpush3.bf16.msra.mxu1 %v4982_v40 }
0x1a10   :  { %4987 = vmatprep.subr.bf16.mxu1 %v4986_v22 }
0x1a13   :  { %4989 = vmatpush3.bf16.msra.mxu1 %v4986_v22 }
0x1a14   :  { %4998 = vmatprep.subr.bf16.mxu1 %v5567_v0 }
0x1a18   :  { %v5335_v54 = vpop.eup %5334 }
0x1a19   :  { %v3192_v52 = vadd.f32 1.0, %v5335_v54 }
0x1a1b   :  { %5336 = vlog2.f32 %v3192_v52  ;;  %v3834_v52 = vmul.f32 %v6341_v5, %v6341_v5 }
0x1a25   :  { %v5337_v63 = vpop.eup %5336 }
0x1a26   :  { %v3194_v11 = vmul.f32 0.6931472, %v5337_v63 }
0x1a28   :  { %v3195_v62 = vadd.f32 %v3194_v11, %v3187_v61  ;;  %v3833_v11 = vmul.f32 %v6351_v55, %v6351_v55 }
0x1a2a   :  { %v3381_v23 = vrot.slane %v3195_v62, 4  ;;  %v3391_v40 = vmul.f32 %v3389_v59, %v3195_v62 }
0x1a2c   :  { %v3383_v13 = vsel %vm3378_vm7, %v3195_v62, %v3381_v23  ;;  %v6419_v51 = vadd.f32 %v3391_v40, %v3186_v42 }
0x1a2d   :  { %v3390_v57 = vmul.f32 %v3388_v25, %v3383_v13 }
0x1a2f   :  { %v6417_v46 = vadd.f32 %v3390_v57, %v3379_v24 }
0x1a31   :  { %4736 = vmatprep.mubr.msk.f32.mxu0 %vm234_vm4, %v6417_v46 }
0x1a32   :  { %4737 = vmatmul.mubr.msk.f32.vlgmr.msra.gmra.mrb[34].mxu0 %vm234_vm4, %v6419_v51 }
0x1a33   :  { %4993 = vmatpush3.bf16.msra.mxu0 %v4990_v50 }
0x1a34   :  { %4995 = vmatprep.subr.bf16.mxu0 %v4994_v60 }
0x1ae1   :  { %v3371_v28 = vpop.f32.mrb[32].mxu1 }
0x1ae2   :  { %v3372_v21 = vadd.f32 %v3371_v28, %v6296_v33  ;;  %v4727_v27 = vpop.f32.mrb[33].mxu1  ;;  %v5386_v33 = vld [vmem:[#allocation13] sm:$0xff] }
0x1ae4   :  { %v3385_v36 = vrot.slane %v3372_v21, 4 }
0x1ae6   :  { %v3387_v43 = vsel %vm3378_vm7, %v3372_v21, %v3385_v36 }
0x1ae7   :  { %4754 = vmatprep.mubr.msk.f32.mxu0 %vm156_vm1, %v3387_v43 }
0x1ae8   :  { %4755 = vmatmul.mubr.msk.f32.vlgmr.msra.gmra.mrb[36].mxu0 %vm156_vm1, %v3372_v21 }
0x1ae9   :  { %4997 = vmatpush3.bf16.msra.mxu0 %v4994_v60 }
0x1aea   :  { %5004 = vmatprep.subr.bf16.mxu0 %v5567_v0 }
0x1b05   :  { %v4738_v34 = vpop.f32.mrb[34].mxu0 }
0x1b06   :  { %v3487_v45 = vadd.f32 %v4738_v34, %v6294_v4  ;;  %v3481_v10 = vpop.f32.mrb[35].mxu0 }
0x1b07   :  { %v3482_v39 = vadd.f32 %v3481_v10, %v6294_v4 }
0x1b08   :  { %v3491_v32 = vmax.f32 %v3487_v45, 0.0 }
0x1b09   :  { %v3490_v14 = vmax.f32 %v3482_v39, 0.0 }
0x1b0b   :  { %4747 = vmatprep.mubr.msk.f32.mxu1 %vm234_vm4, %v3490_v14 }
0x1b0c   :  { %4748 = vmatmul.mubr.msk.f32.vlgmr.msra.gmra.mrb[34].mxu1 %vm234_vm4, %v3491_v32 }
0x1b0d   :  { %5000 = vmatpush3.bf16.msra.mxu1 %v6243_v29  ;;  %4772 = vmatprep.mubr.msk.f32.mxu1 %vm5568_vm0, %v5386_v33 }
0x1b0e   :  { %5001 = vmatprep.subr.bf16.mxu1 %v5567_v0 }
0x1b11   :  { %5003 = vmatpush3.bf16.msra.mxu1 %v6253_v1 }
0x1bdf   :  { %v4749_v58 = vpop.f32.mrb[34].mxu1 }
0x1be0   :  { %v3579_v35 = vpop.f32.mrb[35].mxu1  ;;  %v6442_v4 = vadd.f32 %v4749_v58, %v6302_v18 }
0x1be1   :  { %v6439_v56 = vadd.f32 %v3579_v35, %v6302_v18  ;;  %v3806_v18 = vrot.slane %v6329_v15, 4 }
0x1be2   :  { %v3591_v29 = vand.u32 2147483647, %v6442_v4  ;;  %v3589_v27 = vmax.f32 %v6442_v4, 0.0 }
0x1be3   :  { %4761 = vmatprep.mubr.msk.f32.mxu0 %vm156_vm1, %v6439_v56  ;;  %v3590_v1 = vand.u32 2147483647, %v6439_v56  ;;  %v3810_v42 = vsel %vm3378_vm7, %v6348_v17, %v3806_v18  ;;  %v3588_v34 = vmax.f32 %v6439_v56, 0.0 }
0x1be4   :  { %4762 = vmatmul.mubr.msk.f32.vlgmr.msra.gmra.mrb[36].mxu0 %vm156_vm1, %v6442_v4  ;;  %v3593_v7 = vsub.f32 0.0, %v3591_v29  ;;  %v3812_v31 = vsel %vm3811_vm8, %v3810_v42, %v3808_v20 }
0x1be5   :  { %4783 = vmatprep.mubr.msk.f32.mxu0 %vm5568_vm0, %v5386_v33  ;;  %v3592_v2 = vsub.f32 0.0, %v3590_v1 }
0x1be6   :  { %v3596_v50 = vmul.f32 1.442695, %v3593_v7 }
0x1be7   :  { %v3594_v8 = vmul.f32 1.442695, %v3592_v2 }
0x1be8   :  { %5338 = vpow2.f32 %v3596_v50 }
0x1be9   :  { %5340 = vpow2.f32 %v3594_v8 }
0x1bf2   :  { %v5339_v22 = vpop.eup %5338 }
0x1bf3   :  { %v5341_v63 = vpop.eup %5340  ;;  %v3599_v59 = vadd.f32 1.0, %v5339_v22 }
0x1bf4   :  { %v3598_v48 = vadd.f32 1.0, %v5341_v63 }
0x1cb7   :  { %v4763_v12 = vpop.f32.mrb[36].mxu0 }
0x1cb8   :  { %v3785_v26 = vadd.f32 %v4763_v12, %v6304_v19  ;;  %v3772_v38 = vpop.f32.mrb[37].mxu0 }
0x1cb9   :  { %v3784_v3 = vadd.f32 %v6304_v19, %v3772_v38 }
0x1cba   :  { %v3787_v53 = vmax.f32 %v3785_v26, 0.0 }
0x1cbb   :  { %v6457_v41 = vmax.f32 %v3784_v3, 0.0 }
0x1cbc   :  { %v3791_v30 = vand.u32 2147483647, %v3787_v53  ;;  %v3836_v49 = vsub.f32 %v6348_v17, %v3787_v53  ;;  %v3789_v14 = vmax.f32 %v3787_v53, 0.0  ;;  %v3854_v33 = vsub.f32 %v3787_v53, %v6348_v17 }
0x1cbd   :  { %v3790_v16 = vand.u32 2147483647, %v6457_v41  ;;  %v3835_v37 = vsub.f32 %v3812_v31, %v6457_v41  ;;  %v3853_v15 = vsub.f32 %v6457_v41, %v3812_v31  ;;  %v3878_v58 = vsub.f32 %v3787_v53, %v6442_v4 }
0x1cbe   :  { %v3793_v54 = vsub.f32 0.0, %v3791_v30  ;;  %v3838_v19 = vmul.f32 %v3836_v49, %v3836_v49  ;;  %v3788_v35 = vmax.f32 %v6457_v41, 0.0  ;;  %v3877_v31 = vsub.f32 %v6457_v41, %v6439_v56 }
0x1cbf   :  { %v3792_v61 = vsub.f32 0.0, %v3790_v16  ;;  %v3837_v62 = vmul.f32 %v3835_v37, %v3835_v37  ;;  %v3880_v50 = vmul.f32 %v3878_v58, %v3878_v58  ;;  %v3855_v26 = vmul.f32 %v3853_v15, %v3853_v15 }
0x1cc0   :  { %v3796_v47 = vmul.f32 1.442695, %v3793_v54  ;;  %v6468_v23 = vadd.f32 %v3838_v19, %v3834_v52  ;;  %v3879_v19 = vmul.f32 %v3877_v31, %v3877_v31  ;;  %v5390_v31 = vld [vmem:[#allocation11 + $0x20] sm:$0xff] }
0x1cc1   :  { %v3794_v25 = vmul.f32 1.442695, %v3792_v61  ;;  %v6470_v6 = vadd.f32 %v3837_v62, %v3833_v11 }
0x1cc2   :  { %5342 = vpow2.f32 %v3796_v47 }
0x1cc3   :  { %5344 = vpow2.f32 %v3794_v25 }
0x1cc4   :  { %5346 = vlog2.f32 %v3599_v59 }
0x1cc5   :  { %5348 = vlog2.f32 %v3598_v48 }
0x1ccc   :  { %v5343_v13 = vpop.eup %5342 }
0x1ccd   :  { %v5345_v40 = vpop.eup %5344  ;;  %v3799_v57 = vadd.f32 1.0, %v5343_v13 }
0x1cce   :  { %v5347_v24 = vpop.eup %5346  ;;  %v3798_v60 = vadd.f32 1.0, %v5345_v40 }
0x1ccf   :  { %5350 = vlog2.f32 %v3799_v57  ;;  %v5349_v28 = vpop.eup %5348  ;;  %v3603_v21 = vmul.f32 0.6931472, %v5347_v24 }
0x1cd0   :  { %5352 = vlog2.f32 %v3798_v60  ;;  %v3601_v36 = vmul.f32 0.6931472, %v5349_v28 }
0x1cd1   :  { %v3605_v43 = vadd.f32 %v3603_v21, %v3589_v27  ;;  %5354 = vlog2.f32 %v6341_v5 }
0x1cd2   :  { %5356 = vrcp.f32 %v3834_v52  ;;  %v3604_v45 = vadd.f32 %v3601_v36, %v3588_v34 }
0x1cd3   :  { %5358 = vlog2.f32 %v6351_v55  ;;  %v3884_v5 = vmul.f32 %v3605_v43, %v3605_v43  ;;  %v3856_v55 = vmul.f32 %v3854_v33, %v3854_v33 }
0x1cd4   :  { %5360 = vrcp.f32 %v3833_v11  ;;  %v3883_v18 = vmul.f32 %v3604_v45, %v3604_v45 }
0x1cd5   :  { %5362 = vlog2.f32 %v3605_v43 }
0x1cd6   :  { %5364 = vlog2.f32 %v3604_v45 }
0x1cd9   :  { %v5351_v10 = vpop.eup %5350 }
0x1cda   :  { %v5353_v39 = vpop.eup %5352  ;;  %v3803_v32 = vmul.f32 0.6931472, %v5351_v10 }
0x1cdb   :  { %v3801_v29 = vmul.f32 0.6931472, %v5353_v39  ;;  %v5355_v8 = vpop.eup %5354 }
0x1cdc   :  { %v3805_v1 = vadd.f32 %v3803_v32, %v3789_v14  ;;  %v5357_v38 = vpop.eup %5356  ;;  %v3828_v16 = vmul.f32 0.6931472, %v5355_v8 }
0x1cdd   :  { %v3804_v7 = vadd.f32 %v3801_v29, %v3788_v35  ;;  %v5359_v42 = vpop.eup %5358 }
0x1cde   :  { %5366 = vlog2.f32 %v3805_v1  ;;  %v3842_v2 = vmul.f32 %v3805_v1, %v3805_v1  ;;  %v5361_v20 = vpop.eup %5360  ;;  %v3826_v15 = vmul.f32 0.6931472, %v5359_v42  ;;  %v3830_v48 = vmul.f32 2.0, %v3828_v16 }
0x1cdf   :  { %5368 = vlog2.f32 %v3804_v7  ;;  %v3841_v12 = vmul.f32 %v3804_v7, %v3804_v7  ;;  %v5363_v30 = vpop.eup %5362 }
0x1ce0   :  { %5370 = vrcp.f32 %v3842_v2  ;;  %v3858_v17 = vadd.f32 %v3856_v55, %v3842_v2  ;;  %v3882_v4 = vadd.f32 %v3880_v50, %v3842_v2  ;;  %v5365_v22 = vpop.eup %5364  ;;  %v3872_v37 = vmul.f32 0.6931472, %v5363_v30 }
0x1ce1   :  { %5372 = vrcp.f32 %v3841_v12  ;;  %v3857_v3 = vadd.f32 %v3855_v26, %v3841_v12  ;;  %v3870_v52 = vmul.f32 0.6931472, %v5365_v22  ;;  %v3881_v59 = vadd.f32 %v3879_v19, %v3841_v12 }
0x1ce2   :  { %5374 = vrcp.f32 %v3884_v5  ;;  %v3862_v53 = vmul.f32 %v5357_v38, %v3858_v17  ;;  %v3874_v40 = vmul.f32 2.0, %v3872_v37  ;;  %v3829_v24 = vmul.f32 2.0, %v3826_v15 }
0x1ce3   :  { %5376 = vrcp.f32 %v3883_v18  ;;  %v3860_v49 = vmul.f32 %v5361_v20, %v3857_v3  ;;  %v3873_v41 = vmul.f32 2.0, %v3870_v52  ;;  %v5387_v20 = vld [vmem:[#allocation11 + $0x98] sm:$0xff]  ;;  %v6494_v52 = vld [vmem:[%s6530_s7 + $0x5] ss:$0 sm:$0xff]  ;;  %s6500_s7 = spop %5018 }
0x1ce8   :  { %v5367_v54 = vpop.eup %5366 }
0x1ce9   :  { %v5369_v63 = vpop.eup %5368  ;;  %v3822_v61 = vmul.f32 0.6931472, %v5367_v54 }
0x1cea   :  { %v5371_v11 = vpop.eup %5370  ;;  %v3820_v62 = vmul.f32 0.6931472, %v5369_v63 }
0x1ceb   :  { %v5373_v47 = vpop.eup %5372  ;;  %v3824_v25 = vmul.f32 2.0, %v3822_v61  ;;  %v3846_v13 = vmul.f32 %v5371_v11, %v6468_v23 }
0x1cec   :  { %v5375_v57 = vpop.eup %5374  ;;  %v3823_v56 = vmul.f32 2.0, %v3820_v62  ;;  %v3844_v60 = vmul.f32 %v5373_v47, %v6470_v6 }
0x1ced   :  { %v5377_v28 = vpop.eup %5376  ;;  %v3832_v21 = vsub.f32 %v3824_v25, %v3830_v48  ;;  %v3852_v27 = vsub.f32 %v3830_v48, %v3824_v25  ;;  %v3876_v36 = vsub.f32 %v3874_v40, %v3824_v25  ;;  %v3888_v43 = vmul.f32 %v5375_v57, %v3882_v4 }
0x1cee   :  { %v3875_v34 = vsub.f32 %v3873_v41, %v3823_v56  ;;  %v3886_v45 = vmul.f32 %v5377_v28, %v3881_v59  ;;  %v3831_v10 = vsub.f32 %v3823_v56, %v3829_v24  ;;  %v3851_v39 = vsub.f32 %v3829_v24, %v3823_v56 }
0x1cef   :  { %v3848_v14 = vadd.f32 %v3846_v13, %v3832_v21  ;;  %v3864_v32 = vadd.f32 %v3862_v53, %v3852_v27  ;;  %v3890_v33 = vadd.f32 %v3888_v43, %v3876_v36  ;;  %v5388_v53 = vld [vmem:[#allocation11 + $0x70] sm:$0xff] }
0x1cf0   :  { %v3889_v23 = vadd.f32 %v3886_v45, %v3875_v34  ;;  %v3847_v58 = vadd.f32 %v3844_v60, %v3831_v10  ;;  %v3863_v35 = vadd.f32 %v3860_v49, %v3851_v39  ;;  %v5245_v30 = vpack.i.bf16 %v5387_v20, %v5388_v53  ;;  %v5389_v49 = vld [vmem:[#allocation11 + $0x48] sm:$0xff] }
0x1cf1   :  { %v4258_v29 = vadd.f32 -1.0, %v3848_v14  ;;  %v4260_v1 = vadd.f32 -1.0, %v3864_v32  ;;  %v5240_v22 = vpack.i.bf16 %v5389_v49, %v5390_v31  ;;  %v4262_v16 = vadd.f32 -1.0, %v3890_v33 }
0x1cf2   :  { %v4261_v5 = vadd.f32 -1.0, %v3889_v23  ;;  %v4257_v7 = vadd.f32 -1.0, %v3847_v58  ;;  %v4259_v6 = vadd.f32 -1.0, %v3863_v35 }
0x1cf3   :  { %v3868_v2 = vadd.f32 %v4260_v1, %v4258_v29  ;;  %v3975_v37 = vrot.slane %v4262_v16, 2 }
0x1cf4   :  { %v3909_v55 = vrot.slane %v4261_v5, 2  ;;  %v3867_v50 = vadd.f32 %v4259_v6, %v4257_v7  ;;  %v3937_v12 = vrot.slane %v4261_v5, 6 }
0x1cf5   :  { %v3960_v8 = vrot.slane %v3868_v2, 2  ;;  %v3977_v54 = vsel %vm749_vm5, %v3975_v37, 0.0  ;;  %v3956_v37 = vrot.slane %v6417_v46, 4 }
0x1cf6   :  { %v3911_v18 = vsel %vm749_vm5, %v3909_v55, 0.0  ;;  %v3894_v38 = vrot.slane %v3867_v50, 2  ;;  %v3939_v17 = vsel %vm749_vm5, %v3937_v12, 0.0  ;;  %v3923_v42 = vrot.slane %v3867_v50, 6 }
0x1cf7   :  { %3912 = vadd.xlane.f32.xlu0 %v3911_v18  ;;  %v3962_v26 = vsel %vm749_vm5, %v3960_v8, 0.0  ;;  %v4082_v8 = vrot.slane %v6394_v9, 2 }
0x1cf8   :  { %3963 = vadd.xlane.f32.xlu1 %v3962_v26  ;;  %v3896_v4 = vsel %vm749_vm5, %v3894_v38, 0.0  ;;  %v3925_v3 = vsel %vm749_vm5, %v3923_v42, 0.0 }
0x1cfb   :  { %3940 = vadd.xlane.f32.xlu0 %v3939_v17 }
0x1cfc   :  { %3897 = vadd.xlane.f32.xlu1 %v3896_v4 }
0x1d00   :  { %3926 = vadd.xlane.f32.xlu1 %v3925_v3 }
0x1d11   :  { %5246 = vrot.lane.b32.xlu1 %v5245_v30, %s5558_s27  ;;  %5241 = vrot.lane.b32.xlu0 %v5240_v22, %s5558_s27 }
0x1d15   :  { %4095 = vrot.lane.b32.xlu0 %v6494_v52, %s5576_s13 }
0x1d35   :  { %3978 = vadd.xlane.f32.xlu1 %v3977_v54 }
0x1d84   :  { %v3913_v19 = vpop.xlane.xlu0 %3912 }
0x1d85   :  { %v3914_v15 = vrot.slane %v3913_v19, 4  ;;  %v3964_v63 = vpop.xlane.xlu1 %3963 }
0x1d86   :  { %v3965_v61 = vrot.slane %v3964_v63, 4 }
0x1d87   :  { %v3915_v11 = vadd.f32 %v3914_v15, %v3913_v19 }
0x1d88   :  { %v3966_v62 = vadd.f32 %v3965_v61, %v3964_v63  ;;  %v3941_v59 = vpop.xlane.xlu0 %3940 }
0x1d89   :  { %v3916_v47 = vrot.slane %v3915_v11, 2  ;;  %v3942_v25 = vrot.slane %v3941_v59, 4  ;;  %v3898_v48 = vpop.xlane.xlu1 %3897 }
0x1d8a   :  { %v3899_v13 = vrot.slane %v3898_v48, 4  ;;  %v3967_v57 = vrot.slane %v3966_v62, 2 }
0x1d8b   :  { %v3943_v40 = vadd.f32 %v3942_v25, %v3941_v59  ;;  %v3917_v27 = vadd.f32 %v3916_v47, %v3915_v11 }
0x1d8c   :  { %v3900_v56 = vadd.f32 %v3899_v13, %v3898_v48  ;;  %v5242_v41 = vpop.permute.xlu0 %5241  ;;  %v3968_v33 = vadd.f32 %v3967_v57, %v3966_v62  ;;  %v2174_v48 = vstv %s6500_s7 }
0x1d8d   :  { %v3944_v24 = vrot.slane %v3943_v40, 2  ;;  %v3927_v60 = vpop.xlane.xlu1 %3926  ;;  %v5244_v28 = vunpack.i.h.bf16 %v5242_v41  ;;  %v5243_v21 = vunpack.i.l.bf16 %v5242_v41  ;;  %v3918_v14 = vrot.slane %v3917_v27, 1 }
0x1d8e   :  { %v3901_v36 = vrot.slane %v3900_v56, 2  ;;  %v3928_v43 = vrot.slane %v3927_v60, 4  ;;  %v3969_v50 = vrot.slane %v3968_v33, 1  ;;  %v2175_v13 = vmul.f32 0.5, %v2174_v48 }
0x1d8f   :  { %v5005_v34 = vpack.c.bf16 %v5244_v28, %v5243_v21  ;;  %v3945_v32 = vadd.f32 %v3944_v24, %v3943_v40  ;;  %v3919_v6 = vadd.f32 %v3918_v14, %v3917_v27 }
0x1d90   :  { %v3929_v45 = vadd.f32 %v3928_v43, %v3927_v60  ;;  %v3902_v10 = vadd.f32 %v3901_v36, %v3900_v56  ;;  %v3970_v26 = vadd.f32 %v3969_v50, %v3968_v33  ;;  %v2176_v56 = vadd.f32 %v2175_v13, %v6326_v44  ;;  %v4096_v60 = vpop.permute.xlu0 %4095 }
0x1d91   :  { %v5247_v39 = vpop.permute.xlu1 %5246  ;;  %5006 = vmatpush3.bf16.msra.mxu0 %v5005_v34  ;;  %v3946_v2 = vrot.slane %v3945_v32, 1 }
0x1d92   :  { %v3930_v23 = vrot.slane %v3929_v45, 2  ;;  %v5249_v58 = vunpack.i.h.bf16 %v5247_v39  ;;  %v5248_v35 = vunpack.i.l.bf16 %v5247_v39  ;;  %5007 = vmatprep.subr.bf16.mxu0 %v5567_v0  ;;  %v3903_v29 = vrot.slane %v3902_v10, 1 }
0x1d93   :  { %v3947_v12 = vadd.f32 %v3946_v2, %v3945_v32 }
0x1d94   :  { %v5008_v1 = vpack.c.bf16 %v5249_v58, %v5248_v35  ;;  %v3904_v5 = vadd.f32 %v3903_v29, %v3902_v10  ;;  %v3931_v7 = vadd.f32 %v3930_v23, %v3929_v45 }
0x1d96   :  { %5020 = vpush %v3904_v5  ;;  %5009 = vmatpush3.bf16.msra.mxu0 %v5008_v1  ;;  %v3932_v55 = vrot.slane %v3931_v7, 1 }
0x1d97   :  { %5022 = vpush %v3919_v6 }
0x1d98   :  { %v3933_v18 = vadd.f32 %v3932_v55, %v3931_v7 }
0x1d99   :  { %4784 = vmatmul.mubr.msk.f32.vlgmr.msra.gmra.mrb[38].mxu0 %vm234_vm4, %v4082_v8 }
0x1d9a   :  { %5024 = vpush %v3933_v18 }
0x1d9b   :  { %5026 = vpush %v3947_v12 }
0x1d9c   :  { %5028 = vpush %v3970_v26 }
0x1dc2   :  { %v3979_v0 = vpop.xlane.xlu1 %3978 }
0x1dc3   :  { %v3980_v38 = vrot.slane %v3979_v0, 4 }
0x1dc5   :  { %v3981_v17 = vadd.f32 %v3980_v38, %v3979_v0 }
0x1dc7   :  { %v3982_v4 = vrot.slane %v3981_v17, 2  ;;  %s5021_s14 = spop %5020 }
0x1dc8   :  { %s5023_s15 = spop %5022  ;;  %v3906_v3 = vstv %s5021_s14 }
0x1dc9   :  { %v3983_v42 = vadd.f32 %v3982_v4, %v3981_v17  ;;  %v3921_v9 = vstv %s5023_s15  ;;  %v3907_v30 = vmul.f32 0.5, %v3906_v3 }
0x1dca   :  { %v3922_v16 = vmul.f32 0.5, %v3921_v9 }
0x1dcb   :  { %s5025_s16 = spop %5024  ;;  %v3984_v20 = vrot.slane %v3983_v42, 1 }
0x1dcc   :  { %v3935_v53 = vstv %s5025_s16  ;;  %s5027_s17 = spop %5026 }
0x1dcd   :  { %v3936_v49 = vmul.f32 0.5, %v3935_v53  ;;  %v3949_v31 = vstv %s5027_s17  ;;  %s5029_s18 = spop %5028  ;;  %v3985_v22 = vadd.f32 %v3984_v20, %v3983_v42 }
0x1dce   :  { %v3950_v54 = vmul.f32 0.5, %v3949_v31  ;;  %v3972_v19 = vstv %s5029_s18 }
0x1dcf   :  { %vm3951_vm9 = vcmp.lt.f32.partialorder %v3936_v49, %v3907_v30  ;;  %v3973_v15 = vmul.f32 0.5, %v3972_v19  ;;  %5030 = vpush %v3985_v22 }
0x1dd0   :  { %v3958_v63 = vsel %vm3951_vm9, %v6417_v46, %v3956_v37  ;;  %v3953_v61 = vsel %vm3951_vm9, %v3950_v54, %v3922_v16  ;;  %v3952_v11 = vsel %vm3951_vm9, %v3936_v49, %v3907_v30 }
0x1dd1   :  { %v3995_v62 = vrot.slane %v3958_v63, 4  ;;  %vm3989_vm10 = vcmp.lt.f32.partialorder %v3973_v15, %v3952_v11 }
0x1dd2   :  { %v3990_v59 = vsel %vm3989_vm10, %v3973_v15, %v3952_v11 }
0x1dd3   :  { %v3997_v47 = vsel %vm3989_vm10, %v6419_v51, %v3995_v62 }
0x1dd4   :  { %v4005_v25 = vrot.slane %v3997_v47, 2 }
0x1dd6   :  { %4773 = vmatmul.mubr.msk.f32.vlgmr.msra.gmra.mrb[36].mxu1 %vm234_vm4, %v4005_v25 }
0x1e00   :  { %s5031_s19 = spop %5030 }
0x1e01   :  { %v3987_v40 = vstv %s5031_s19 }
0x1e02   :  { %v3988_v57 = vmul.f32 0.5, %v3987_v40 }
0x1e04   :  { %v3991_v46 = vsel %vm3989_vm10, %v3988_v57, %v3953_v61 }
0x1e05   :  { %v4180_v41 = vsel %vm4179_vm11, %v2176_v56, %v3991_v46 }
0x1e06   :  { %v4182_v24 = vsel %vm4181_vm12, %v4180_v41, %v3990_v59 }
0x1e6c   :  { %v4166_v28 = vpop.f32.mrb[38].mxu0 }
0x1e6d   :  { %v4167_v21 = vadd.f32 %v4166_v28, %v4096_v60  ;;  %v4785_v27 = vpop.f32.mrb[39].mxu0 }
0x1e6f   :  { %4174 = vrot.lane.b32.xlu0 %v4167_v21, %s5558_s27 }
0x1e73   :  { %4184 = vrot.lane.b32.xlu0 %v4182_v24, %s5563_s12 }
0x1ea9   :  { %v4078_v51 = vpop.f32.mrb[36].mxu1 }
0x1eaa   :  { %v4079_v36 = vadd.f32 %v6494_v52, %v4078_v51  ;;  %v4774_v43 = vpop.f32.mrb[37].mxu1 }
0x1eac   :  { %4172 = vst.msk [vmem:[#allocation13] sm:$0x3] %vm4171_vm13, %v4079_v36 }
0x1ee1   :  { %v4175_v44 = vpop.permute.xlu0 %4174 }
0x1ee2   :  { %4178 = vst.msk [vmem:[#allocation13] sm:$0x3] %vm4177_vm14, %v4175_v44 }
0x1ee5   :  { %v4185_v34 = vpop.permute.xlu0 %4184 }
0x1ee6   :  { %4188 = vst.msk [vmem:[#allocation13] sm:$0x1] %vm4187_vm15, %v4185_v34 }
0x1ee7   :  { %5534 = shalt.err (!%p5531_p10)
}
0x1ee8   :  { %s5535_s20 = scalar_lea.hbm %s6531_s8, 128 }
0x1ee9   :  { %p5536_p11 = scmp.ne.s32.totalorder %s6531_s8, %s5535_s20  ;;  %p5539_p12 = scmp.lt.u32.totalorder %s5535_s20, %s6531_s8 }
0x1eeb   :  { %p5541_p13 = pnand %p5539_p12, %p5536_p11 }
0x1eed   :  { %5544 = shalt.err (!%p5541_p13)
}
0x1eee   :  { %4198 = dma.vmem_to_hbm [thread:$0]  %s4196_s4, 128, %s6531_s8, [#allocation4]  }
0x1eef   :  { %5553 = dma.done.wait [#allocation4], 128  }
0x1ef0   :  { %5554 = vsyncadd [#allocation4], 4294967168 }
0x1ef1   :  { %4202 = vsyncpa [#allocation3], 1 }
0x1ef2   :  { %4203 = vsyncpa [#allocation6], 1 }
0x1ef3   :  { %4204 = vsyncpa [#allocation9], 1 }
0x1ef4   :  { %4205 = vsyncpa [#allocation12], 1 }
0x1ef5   :  { %4206 = vsyncpa [#allocation4], 1 }

</bundles_post_ra>
